<compile_context>
chip_gen: v5e
topology: v5e:2x2
jax: 0.10.0
libtpu: 0.0.40
codegen_flags: <defaults>
</compile_context>

<pallas_src>
import numpy as np
import jax
import jax.numpy as jnp
from jax import lax
from jax.experimental import pallas as pl
from jax.experimental.pallas import tpu as pltpu

# ----------------------------- model sizes ---------------------------------
E = 64            # emb_dim
H = 2 * E         # GRU hidden size (emb_dim * 2) = 128
V0 = 64           # vocab_size[0]  (diagnosis)
V1 = 64           # vocab_size[1]  (procedure)
V2 = 128          # vocab_size[2]  (medication)
T = 3             # number of admissions (visits)
N_DIAG = 5        # diag codes per admission
N_PROC = 4        # proc codes per admission
N_MED = 6         # med codes per admission


def _vmem():
    return pl.BlockSpec(memory_space=pltpu.MemorySpace.VMEM)


def _smem():
    return pl.BlockSpec(memory_space=pltpu.MemorySpace.SMEM)


# ----------------------------------------------------------------------------
# In-kernel helpers
# ----------------------------------------------------------------------------
def _multihot_counts(codes_ref, n_rows, n_codes, vocab, binary=False):
    """Build an (n_rows, vocab) f32 count matrix (or 0/1 multi-hot if binary)
    from int32 code indices living in SMEM, using iota compares (no gathers)."""
    col = lax.broadcasted_iota(jnp.int32, (n_rows, vocab), 1)
    row = lax.broadcasted_iota(jnp.int32, (n_rows, vocab), 0)
    acc = jnp.zeros((n_rows, vocab), jnp.float32)
    for t in range(n_rows):
        row_mask = row == t
        for j in range(n_codes):
            hit = jnp.where(row_mask & (col == codes_ref[t, j]), 1.0, 0.0)
            acc = jnp.maximum(acc, hit) if binary else acc + hit
    return acc


def _softmax_lastdim(x):
    m = jnp.max(x, axis=-1, keepdims=True)
    e = jnp.exp(x - m)
    s = jnp.sum(e, axis=-1, keepdims=True)
    return e * pl.reciprocal(s, approx=True)


# ----------------------------------------------------------------------------
# Fused GAMENet forward kernel (eval mode)
# ----------------------------------------------------------------------------
def gamenet_kernel(
        # SMEM scalars
        diag_ref, proc_ref, med_ref, inter_ref,
        # VMEM weights
        emb0_ref, emb1_ref,
        g0_wih_ref, g0_whh_ref, g0_bih_ref, g0_bhh_ref,
        g1_wih_ref, g1_whh_ref, g1_bih_ref, g1_bhh_ref,
        wq_ref, bq_ref,
        adj_e_ref, e_w1_ref, e_b1_ref, e_w2_ref, e_b2_ref,
        adj_d_ref, d_w1_ref, d_b1_ref, d_w2_ref, d_b2_ref,
        wo1_ref, bo1_ref, wo2_ref, bo2_ref,
        # output
        out_ref,
        # scratch
        gx1_sc, gx2_sc, o1_sc, o2_sc, q_sc):
    f32 = jnp.float32

    # --- 1. embedding gather + per-admission mean (dropout = identity in eval)
    c1 = _multihot_counts(diag_ref, T, N_DIAG, V0)                     # (T, V0)
    c2 = _multihot_counts(proc_ref, T, N_PROC, V1)                     # (T, V1)
    i1 = jnp.dot(c1, emb0_ref[...], preferred_element_type=f32) * (1.0 / N_DIAG)
    i2 = jnp.dot(c2, emb1_ref[...], preferred_element_type=f32) * (1.0 / N_PROC)

    # --- 2. GRU encoders; input-side matmul hoisted out of the recurrence
    gx1_sc[...] = jnp.dot(i1, g0_wih_ref[...], preferred_element_type=f32) + g0_bih_ref[...]
    gx2_sc[...] = jnp.dot(i2, g1_wih_ref[...], preferred_element_type=f32) + g1_bih_ref[...]

    def gru_cell(gx, h, whh_ref, bhh_ref):
        gh = jnp.dot(h, whh_ref[...], preferred_element_type=f32) + bhh_ref[...]
        r = jax.nn.sigmoid(gx[:, 0:H] + gh[:, 0:H])
        z = jax.nn.sigmoid(gx[:, H:2 * H] + gh[:, H:2 * H])
        n = jnp.tanh(gx[:, 2 * H:3 * H] + r * gh[:, 2 * H:3 * H])
        return (1.0 - z) * n + z * h

    h1 = jnp.zeros((1, H), f32)
    h2 = jnp.zeros((1, H), f32)
    for t in range(T):          # fully unrolled; two independent recurrences interleaved
        h1 = gru_cell(gx1_sc[pl.ds(t, 1), :], h1, g0_whh_ref, g0_bhh_ref)
        h2 = gru_cell(gx2_sc[pl.ds(t, 1), :], h2, g1_whh_ref, g1_bhh_ref)
        o1_sc[pl.ds(t, 1), :] = h1
        o2_sc[pl.ds(t, 1), :] = h2

    # --- 3. query head: relu(concat([o1, o2])) @ Wq == partial matmuls over Wq row blocks
    ro1 = jnp.maximum(o1_sc[...], 0.0)
    ro2 = jnp.maximum(o2_sc[...], 0.0)
    q_sc[...] = (jnp.dot(ro1, wq_ref[0:H, :], preferred_element_type=f32)
                 + jnp.dot(ro2, wq_ref[H:2 * H, :], preferred_element_type=f32)
                 + bq_ref[...])                                        # (T, E)
    query = q_sc[pl.ds(T - 1, 1), :]                                   # (1, E)
    hk = q_sc[pl.ds(0, T - 1), :]                                      # (T-1, E)

    # --- 4. the two GCNs -> drug memory
    def gcn(adj_ref, w1_ref, b1_ref, w2_ref, b2_ref):
        adj = adj_ref[...]
        h = jnp.maximum(jnp.dot(adj, w1_ref[...], preferred_element_type=f32) + b1_ref[...], 0.0)
        s = jnp.dot(h, w2_ref[...], preferred_element_type=f32)
        return jnp.dot(adj, s, preferred_element_type=f32) + b2_ref[...]

    dm = (gcn(adj_e_ref, e_w1_ref, e_b1_ref, e_w2_ref, e_b2_ref)
          - gcn(adj_d_ref, d_w1_ref, d_b1_ref, d_w2_ref, d_b2_ref) * inter_ref[0, 0])  # (V2, E)

    # --- 5. history multi-hot + memory attention
    hv = _multihot_counts(med_ref, T - 1, N_MED, V2, binary=True)      # (T-1, V2)

    logits1 = lax.dot_general(query, dm, (((1,), (1,)), ((), ())),
                              preferred_element_type=f32)              # (1, V2)
    kw1 = _softmax_lastdim(logits1)
    fact1 = jnp.dot(kw1, dm, preferred_element_type=f32)               # (1, E)

    logits2 = lax.dot_general(query, hk, (((1,), (1,)), ((), ())),
                              preferred_element_type=f32)              # (1, T-1)
    vw = _softmax_lastdim(logits2)
    wv = jnp.dot(vw, hv, preferred_element_type=f32)                   # (1, V2)
    fact2 = jnp.dot(wv, dm, preferred_element_type=f32)                # (1, E)

    # --- 6. output MLP: relu(concat([q, f1, f2])) @ Wo1 via Wo1 row-block partials
    rq = jnp.maximum(query, 0.0)
    rf1 = jnp.maximum(fact1, 0.0)
    rf2 = jnp.maximum(fact2, 0.0)
    hmid = (jnp.dot(rq, wo1_ref[0:E, :], preferred_element_type=f32)
            + jnp.dot(rf1, wo1_ref[E:2 * E, :], preferred_element_type=f32)
            + jnp.dot(rf2, wo1_ref[2 * E:3 * E, :], preferred_element_type=f32)
            + bo1_ref[...])
    hmid = jnp.maximum(hmid, 0.0)
    out_ref[...] = jnp.dot(hmid, wo2_ref[...], preferred_element_type=f32) + bo2_ref[...]
    # TODO(synk): training-mode DDI regularizer (batch_neg) is not implemented
    #             (eval-mode forward only, matching self.training == False).


def gamenet_forward(params, diag_codes, proc_codes, med_codes, adj_e, adj_d):
    args = [
        diag_codes.astype(jnp.int32),
        proc_codes.astype(jnp.int32),
        med_codes.astype(jnp.int32),
        params["inter"].reshape(1, 1),
        params["emb0"], params["emb1"],
        params["gru0_wih"], params["gru0_whh"], params["gru0_bih"], params["gru0_bhh"],
        params["gru1_wih"], params["gru1_whh"], params["gru1_bih"], params["gru1_bhh"],
        params["wq"], params["bq"],
        adj_e, params["ehr_w1"], params["ehr_b1"], params["ehr_w2"], params["ehr_b2"],
        adj_d, params["ddi_w1"], params["ddi_b1"], params["ddi_w2"], params["ddi_b2"],
        params["wo1"], params["bo1"], params["wo2"], params["bo2"],
    ]
    return pl.pallas_call(
        gamenet_kernel,
        out_shape=jax.ShapeDtypeStruct((1, V2), jnp.float32),
        in_specs=[_smem()] * 4 + [_vmem()] * 26,
        out_specs=_vmem(),
        scratch_shapes=[
            pltpu.VMEM((T, 3 * H), jnp.float32),   # gx1 (hoisted GRU-0 input gates)
            pltpu.VMEM((T, 3 * H), jnp.float32),   # gx2 (hoisted GRU-1 input gates)
            pltpu.VMEM((T, H), jnp.float32),       # o1  (GRU-0 outputs)
            pltpu.VMEM((T, H), jnp.float32),       # o2  (GRU-1 outputs)
            pltpu.VMEM((T, E), jnp.float32),       # queries
        ],
    )(*args)


# ----------------------------------------------------------------------------
# Parameter / input construction (deterministic)
# ----------------------------------------------------------------------------
def uniform(key, shape, scale=0.1):
    return jax.random.uniform(key, shape, jnp.float32, -scale, scale)


def row_normalize(mx):
    rowsum = mx.sum(1)
    r_inv = np.where(rowsum > 0, 1.0 / np.maximum(rowsum, 1e-12), 0.0)
    return (r_inv[:, None] * mx).astype(np.float32)


def build_params(key):
    ks = jax.random.split(key, 32)
    p = {}
    p["emb0"] = uniform(ks[0], (V0, E))
    p["emb1"] = uniform(ks[1], (V1, E))
    # GRU encoders (weights stored transposed: (in, 3H) / (H, 3H))
    for i in range(2):
        p[f"gru{i}_wih"] = uniform(ks[2 + 4 * i], (E, 3 * H))
        p[f"gru{i}_whh"] = uniform(ks[3 + 4 * i], (H, 3 * H))
        p[f"gru{i}_bih"] = uniform(ks[4 + 4 * i], (1, 3 * H))
        p[f"gru{i}_bhh"] = uniform(ks[5 + 4 * i], (1, 3 * H))
    # query head
    p["wq"] = uniform(ks[10], (4 * E, E))
    p["bq"] = uniform(ks[11], (1, E))
    # GCNs (ehr / ddi): x = I so layer-1 weight is (V2, E)
    for name, base in (("ehr", 12), ("ddi", 16)):
        p[f"{name}_w1"] = uniform(ks[base + 0], (V2, E))
        p[f"{name}_b1"] = uniform(ks[base + 1], (1, E))
        p[f"{name}_w2"] = uniform(ks[base + 2], (E, E))
        p[f"{name}_b2"] = uniform(ks[base + 3], (1, E))
    p["inter"] = uniform(ks[20], (1,))
    # output MLP
    p["wo1"] = uniform(ks[21], (3 * E, 2 * E))
    p["bo1"] = uniform(ks[22], (1, 2 * E))
    p["wo2"] = uniform(ks[23], (2 * E, V2))
    p["bo2"] = uniform(ks[24], (1, V2))
    return p


# ----------------------------------------------------------------------------
# Pure-JAX reference (same math, used for a correctness sanity check)
# ----------------------------------------------------------------------------
def gamenet_reference(params, diag_codes, proc_codes, med_codes, adj_e, adj_d):
    i1_seq = params["emb0"][diag_codes].mean(axis=1)
    i2_seq = params["emb1"][proc_codes].mean(axis=1)

    def gru_ref(x, wih, whh, bih, bhh):
        h = jnp.zeros((1, H), jnp.float32)
        outs = []
        for t in range(x.shape[0]):
            gx = x[t:t + 1] @ wih + bih
            gh = h @ whh + bhh
            r = jax.nn.sigmoid(gx[:, :H] + gh[:, :H])
            z = jax.nn.sigmoid(gx[:, H:2 * H] + gh[:, H:2 * H])
            n = jnp.tanh(gx[:, 2 * H:] + r * gh[:, 2 * H:])
            h = (1.0 - z) * n + z * h
            outs.append(h)
        return jnp.concatenate(outs, axis=0)

    o1 = gru_ref(i1_seq, params["gru0_wih"], params["gru0_whh"],
                 params["gru0_bih"], params["gru0_bhh"])
    o2 = gru_ref(i2_seq, params["gru1_wih"], params["gru1_whh"],
                 params["gru1_bih"], params["gru1_bhh"])
    pr = jnp.concatenate([o1, o2], axis=-1)
    queries = jnp.maximum(pr, 0.0) @ params["wq"] + params["bq"]
    query, hk = queries[-1:], queries[:-1]

    def gcn(adj, w1, b1, w2, b2):
        h = jnp.maximum(adj @ w1 + b1, 0.0)
        return adj @ (h @ w2) + b2

    dm = (gcn(adj_e, params["ehr_w1"], params["ehr_b1"], params["ehr_w2"], params["ehr_b2"])
          - gcn(adj_d, params["ddi_w1"], params["ddi_b1"], params["ddi_w2"], params["ddi_b2"])
          * params["inter"][0])

    hv = (jax.nn.one_hot(med_codes[:T - 1], V2, dtype=jnp.float32).sum(axis=1) > 0
          ).astype(jnp.float32)

    kw1 = jax.nn.softmax(query @ dm.T, axis=-1)
    fact1 = kw1 @ dm
    vw = jax.nn.softmax(query @ hk.T, axis=-1)
    fact2 = (vw @ hv) @ dm
    x = jnp.maximum(jnp.concatenate([query, fact1, fact2], axis=-1), 0.0)
    h1 = jnp.maximum(x @ params["wo1"] + params["bo1"], 0.0)
    return h1 @ params["wo2"] + params["bo2"]


# ----------------------------------------------------------------------------
if __name__ == "__main__":
    key = jax.random.PRNGKey(0)
    k_par, k_adj_e, k_adj_d, k_d, k_p, k_m = jax.random.split(key, 6)

    params = build_params(k_par)

    # adjacency matrices (symmetric 0/1), then GCN-style row normalization of adj + I
    def make_adj(k):
        a = (jax.random.uniform(k, (V2, V2)) < 0.05).astype(np.float32)
        a = np.array(a)
        a = np.maximum(a, a.T)
        np.fill_diagonal(a, 0.0)
        return jnp.asarray(row_normalize(a + np.eye(V2, dtype=np.float32)))

    adj_e = make_adj(k_adj_e)
    adj_d = make_adj(k_adj_d)

    # patient record: T admissions, each with fixed-length code lists
    diag_codes = jax.random.randint(k_d, (T, N_DIAG), 0, V0)
    proc_codes = jax.random.randint(k_p, (T, N_PROC), 0, V1)
    med_codes = jax.random.randint(k_m, (T, N_MED), 0, V2)

    out = gamenet_forward(params, diag_codes, proc_codes, med_codes, adj_e, adj_d)
    out = jax.block_until_ready(out)

    ref = gamenet_reference(params, diag_codes, proc_codes, med_codes, adj_e, adj_d)
    ref = jax.block_until_ready(ref)

    assert out.shape == (1, V2)
    np.testing.assert_allclose(np.asarray(out), np.asarray(ref), rtol=2e-3, atol=2e-3)
    print("KERNEL_OK")
</pallas_src>

<mosaic_0001>
module attributes {stable_mosaic.version = 11 : i64} {
  func.func @gamenet_kernel(%arg0: memref<3x5xi32, #tpu.memory_space<smem>>, %arg1: memref<3x4xi32, #tpu.memory_space<smem>>, %arg2: memref<3x6xi32, #tpu.memory_space<smem>>, %arg3: memref<1x1xf32, #tpu.memory_space<smem>>, %arg4: memref<64x64xf32, #tpu.memory_space<vmem>>, %arg5: memref<64x64xf32, #tpu.memory_space<vmem>>, %arg6: memref<64x384xf32, #tpu.memory_space<vmem>>, %arg7: memref<128x384xf32, #tpu.memory_space<vmem>>, %arg8: memref<1x384xf32, #tpu.memory_space<vmem>>, %arg9: memref<1x384xf32, #tpu.memory_space<vmem>>, %arg10: memref<64x384xf32, #tpu.memory_space<vmem>>, %arg11: memref<128x384xf32, #tpu.memory_space<vmem>>, %arg12: memref<1x384xf32, #tpu.memory_space<vmem>>, %arg13: memref<1x384xf32, #tpu.memory_space<vmem>>, %arg14: memref<256x64xf32, #tpu.memory_space<vmem>>, %arg15: memref<1x64xf32, #tpu.memory_space<vmem>>, %arg16: memref<128x128xf32, #tpu.memory_space<vmem>>, %arg17: memref<128x64xf32, #tpu.memory_space<vmem>>, %arg18: memref<1x64xf32, #tpu.memory_space<vmem>>, %arg19: memref<64x64xf32, #tpu.memory_space<vmem>>, %arg20: memref<1x64xf32, #tpu.memory_space<vmem>>, %arg21: memref<128x128xf32, #tpu.memory_space<vmem>>, %arg22: memref<128x64xf32, #tpu.memory_space<vmem>>, %arg23: memref<1x64xf32, #tpu.memory_space<vmem>>, %arg24: memref<64x64xf32, #tpu.memory_space<vmem>>, %arg25: memref<1x64xf32, #tpu.memory_space<vmem>>, %arg26: memref<192x128xf32, #tpu.memory_space<vmem>>, %arg27: memref<1x128xf32, #tpu.memory_space<vmem>>, %arg28: memref<128x128xf32, #tpu.memory_space<vmem>>, %arg29: memref<1x128xf32, #tpu.memory_space<vmem>>, %arg30: memref<1x128xf32, #tpu.memory_space<vmem>>, %arg31: memref<3x384xf32, #tpu.memory_space<vmem>>, %arg32: memref<3x384xf32, #tpu.memory_space<vmem>>, %arg33: memref<3x128xf32, #tpu.memory_space<vmem>>, %arg34: memref<3x128xf32, #tpu.memory_space<vmem>>, %arg35: memref<3x64xf32, #tpu.memory_space<vmem>>) attributes {dimension_semantics = [], scalar_prefetch = 0 : i64, scratch_operands = 5 : i64, tpu.core_type = #tpu.core_type<tc>} {
    %0 = tpu.iota {dimensions = array<i32: 1>} : vector<3x64xi32>
    %1 = tpu.iota {dimensions = array<i32: 0>} : vector<3x64xi32>
    %cst = arith.constant 0.000000e+00 : f32
    %2 = vector.broadcast %cst : f32 to vector<3x64xf32>
    %c0_i32 = arith.constant 0 : i32
    %3 = vector.broadcast %c0_i32 : i32 to vector<3x64xi32>
    %4 = arith.cmpi eq, %1, %3 : vector<3x64xi32>
    %c0 = arith.constant 0 : index
    %c0_0 = arith.constant 0 : index
    %5 = memref.load %arg0[%c0, %c0_0] : memref<3x5xi32, #tpu.memory_space<smem>>
    %6 = vector.broadcast %5 : i32 to vector<3x64xi32>
    %7 = arith.cmpi eq, %0, %6 : vector<3x64xi32>
    %8 = arith.andi %4, %7 : vector<3x64xi1>
    %cst_1 = arith.constant 1.000000e+00 : f32
    %cst_2 = arith.constant 0.000000e+00 : f32
    %9 = vector.broadcast %cst_1 : f32 to vector<3x64xf32>
    %10 = vector.broadcast %cst_2 : f32 to vector<3x64xf32>
    %11 = arith.select %8, %9, %10 : vector<3x64xi1>, vector<3x64xf32>
    %12 = arith.addf %2, %11 : vector<3x64xf32>
    %c0_3 = arith.constant 0 : index
    %c1 = arith.constant 1 : index
    %13 = memref.load %arg0[%c0_3, %c1] : memref<3x5xi32, #tpu.memory_space<smem>>
    %14 = vector.broadcast %13 : i32 to vector<3x64xi32>
    %15 = arith.cmpi eq, %0, %14 : vector<3x64xi32>
    %16 = arith.andi %4, %15 : vector<3x64xi1>
    %cst_4 = arith.constant 1.000000e+00 : f32
    %cst_5 = arith.constant 0.000000e+00 : f32
    %17 = vector.broadcast %cst_4 : f32 to vector<3x64xf32>
    %18 = vector.broadcast %cst_5 : f32 to vector<3x64xf32>
    %19 = arith.select %16, %17, %18 : vector<3x64xi1>, vector<3x64xf32>
    %20 = arith.addf %12, %19 : vector<3x64xf32>
    %c0_6 = arith.constant 0 : index
    %c2 = arith.constant 2 : index
    %21 = memref.load %arg0[%c0_6, %c2] : memref<3x5xi32, #tpu.memory_space<smem>>
    %22 = vector.broadcast %21 : i32 to vector<3x64xi32>
    %23 = arith.cmpi eq, %0, %22 : vector<3x64xi32>
    %24 = arith.andi %4, %23 : vector<3x64xi1>
    %cst_7 = arith.constant 1.000000e+00 : f32
    %cst_8 = arith.constant 0.000000e+00 : f32
    %25 = vector.broadcast %cst_7 : f32 to vector<3x64xf32>
    %26 = vector.broadcast %cst_8 : f32 to vector<3x64xf32>
    %27 = arith.select %24, %25, %26 : vector<3x64xi1>, vector<3x64xf32>
    %28 = arith.addf %20, %27 : vector<3x64xf32>
    %c0_9 = arith.constant 0 : index
    %c3 = arith.constant 3 : index
    %29 = memref.load %arg0[%c0_9, %c3] : memref<3x5xi32, #tpu.memory_space<smem>>
    %30 = vector.broadcast %29 : i32 to vector<3x64xi32>
    %31 = arith.cmpi eq, %0, %30 : vector<3x64xi32>
    %32 = arith.andi %4, %31 : vector<3x64xi1>
    %cst_10 = arith.constant 1.000000e+00 : f32
    %cst_11 = arith.constant 0.000000e+00 : f32
    %33 = vector.broadcast %cst_10 : f32 to vector<3x64xf32>
    %34 = vector.broadcast %cst_11 : f32 to vector<3x64xf32>
    %35 = arith.select %32, %33, %34 : vector<3x64xi1>, vector<3x64xf32>
    %36 = arith.addf %28, %35 : vector<3x64xf32>
    %c0_12 = arith.constant 0 : index
    %c4 = arith.constant 4 : index
    %37 = memref.load %arg0[%c0_12, %c4] : memref<3x5xi32, #tpu.memory_space<smem>>
    %38 = vector.broadcast %37 : i32 to vector<3x64xi32>
    %39 = arith.cmpi eq, %0, %38 : vector<3x64xi32>
    %40 = arith.andi %4, %39 : vector<3x64xi1>
    %cst_13 = arith.constant 1.000000e+00 : f32
    %cst_14 = arith.constant 0.000000e+00 : f32
    %41 = vector.broadcast %cst_13 : f32 to vector<3x64xf32>
    %42 = vector.broadcast %cst_14 : f32 to vector<3x64xf32>
    %43 = arith.select %40, %41, %42 : vector<3x64xi1>, vector<3x64xf32>
    %44 = arith.addf %36, %43 : vector<3x64xf32>
    %c1_i32 = arith.constant 1 : i32
    %45 = vector.broadcast %c1_i32 : i32 to vector<3x64xi32>
    %46 = arith.cmpi eq, %1, %45 : vector<3x64xi32>
    %c1_15 = arith.constant 1 : index
    %c0_16 = arith.constant 0 : index
    %47 = memref.load %arg0[%c1_15, %c0_16] : memref<3x5xi32, #tpu.memory_space<smem>>
    %48 = vector.broadcast %47 : i32 to vector<3x64xi32>
    %49 = arith.cmpi eq, %0, %48 : vector<3x64xi32>
    %50 = arith.andi %46, %49 : vector<3x64xi1>
    %cst_17 = arith.constant 1.000000e+00 : f32
    %cst_18 = arith.constant 0.000000e+00 : f32
    %51 = vector.broadcast %cst_17 : f32 to vector<3x64xf32>
    %52 = vector.broadcast %cst_18 : f32 to vector<3x64xf32>
    %53 = arith.select %50, %51, %52 : vector<3x64xi1>, vector<3x64xf32>
    %54 = arith.addf %44, %53 : vector<3x64xf32>
    %c1_19 = arith.constant 1 : index
    %c1_20 = arith.constant 1 : index
    %55 = memref.load %arg0[%c1_19, %c1_20] : memref<3x5xi32, #tpu.memory_space<smem>>
    %56 = vector.broadcast %55 : i32 to vector<3x64xi32>
    %57 = arith.cmpi eq, %0, %56 : vector<3x64xi32>
    %58 = arith.andi %46, %57 : vector<3x64xi1>
    %cst_21 = arith.constant 1.000000e+00 : f32
    %cst_22 = arith.constant 0.000000e+00 : f32
    %59 = vector.broadcast %cst_21 : f32 to vector<3x64xf32>
    %60 = vector.broadcast %cst_22 : f32 to vector<3x64xf32>
    %61 = arith.select %58, %59, %60 : vector<3x64xi1>, vector<3x64xf32>
    %62 = arith.addf %54, %61 : vector<3x64xf32>
    %c1_23 = arith.constant 1 : index
    %c2_24 = arith.constant 2 : index
    %63 = memref.load %arg0[%c1_23, %c2_24] : memref<3x5xi32, #tpu.memory_space<smem>>
    %64 = vector.broadcast %63 : i32 to vector<3x64xi32>
    %65 = arith.cmpi eq, %0, %64 : vector<3x64xi32>
    %66 = arith.andi %46, %65 : vector<3x64xi1>
    %cst_25 = arith.constant 1.000000e+00 : f32
    %cst_26 = arith.constant 0.000000e+00 : f32
    %67 = vector.broadcast %cst_25 : f32 to vector<3x64xf32>
    %68 = vector.broadcast %cst_26 : f32 to vector<3x64xf32>
    %69 = arith.select %66, %67, %68 : vector<3x64xi1>, vector<3x64xf32>
    %70 = arith.addf %62, %69 : vector<3x64xf32>
    %c1_27 = arith.constant 1 : index
    %c3_28 = arith.constant 3 : index
    %71 = memref.load %arg0[%c1_27, %c3_28] : memref<3x5xi32, #tpu.memory_space<smem>>
    %72 = vector.broadcast %71 : i32 to vector<3x64xi32>
    %73 = arith.cmpi eq, %0, %72 : vector<3x64xi32>
    %74 = arith.andi %46, %73 : vector<3x64xi1>
    %cst_29 = arith.constant 1.000000e+00 : f32
    %cst_30 = arith.constant 0.000000e+00 : f32
    %75 = vector.broadcast %cst_29 : f32 to vector<3x64xf32>
    %76 = vector.broadcast %cst_30 : f32 to vector<3x64xf32>
    %77 = arith.select %74, %75, %76 : vector<3x64xi1>, vector<3x64xf32>
    %78 = arith.addf %70, %77 : vector<3x64xf32>
    %c1_31 = arith.constant 1 : index
    %c4_32 = arith.constant 4 : index
    %79 = memref.load %arg0[%c1_31, %c4_32] : memref<3x5xi32, #tpu.memory_space<smem>>
    %80 = vector.broadcast %79 : i32 to vector<3x64xi32>
    %81 = arith.cmpi eq, %0, %80 : vector<3x64xi32>
    %82 = arith.andi %46, %81 : vector<3x64xi1>
    %cst_33 = arith.constant 1.000000e+00 : f32
    %cst_34 = arith.constant 0.000000e+00 : f32
    %83 = vector.broadcast %cst_33 : f32 to vector<3x64xf32>
    %84 = vector.broadcast %cst_34 : f32 to vector<3x64xf32>
    %85 = arith.select %82, %83, %84 : vector<3x64xi1>, vector<3x64xf32>
    %86 = arith.addf %78, %85 : vector<3x64xf32>
    %c2_i32 = arith.constant 2 : i32
    %87 = vector.broadcast %c2_i32 : i32 to vector<3x64xi32>
    %88 = arith.cmpi eq, %1, %87 : vector<3x64xi32>
    %c2_35 = arith.constant 2 : index
    %c0_36 = arith.constant 0 : index
    %89 = memref.load %arg0[%c2_35, %c0_36] : memref<3x5xi32, #tpu.memory_space<smem>>
    %90 = vector.broadcast %89 : i32 to vector<3x64xi32>
    %91 = arith.cmpi eq, %0, %90 : vector<3x64xi32>
    %92 = arith.andi %88, %91 : vector<3x64xi1>
    %cst_37 = arith.constant 1.000000e+00 : f32
    %cst_38 = arith.constant 0.000000e+00 : f32
    %93 = vector.broadcast %cst_37 : f32 to vector<3x64xf32>
    %94 = vector.broadcast %cst_38 : f32 to vector<3x64xf32>
    %95 = arith.select %92, %93, %94 : vector<3x64xi1>, vector<3x64xf32>
    %96 = arith.addf %86, %95 : vector<3x64xf32>
    %c2_39 = arith.constant 2 : index
    %c1_40 = arith.constant 1 : index
    %97 = memref.load %arg0[%c2_39, %c1_40] : memref<3x5xi32, #tpu.memory_space<smem>>
    %98 = vector.broadcast %97 : i32 to vector<3x64xi32>
    %99 = arith.cmpi eq, %0, %98 : vector<3x64xi32>
    %100 = arith.andi %88, %99 : vector<3x64xi1>
    %cst_41 = arith.constant 1.000000e+00 : f32
    %cst_42 = arith.constant 0.000000e+00 : f32
    %101 = vector.broadcast %cst_41 : f32 to vector<3x64xf32>
    %102 = vector.broadcast %cst_42 : f32 to vector<3x64xf32>
    %103 = arith.select %100, %101, %102 : vector<3x64xi1>, vector<3x64xf32>
    %104 = arith.addf %96, %103 : vector<3x64xf32>
    %c2_43 = arith.constant 2 : index
    %c2_44 = arith.constant 2 : index
    %105 = memref.load %arg0[%c2_43, %c2_44] : memref<3x5xi32, #tpu.memory_space<smem>>
    %106 = vector.broadcast %105 : i32 to vector<3x64xi32>
    %107 = arith.cmpi eq, %0, %106 : vector<3x64xi32>
    %108 = arith.andi %88, %107 : vector<3x64xi1>
    %cst_45 = arith.constant 1.000000e+00 : f32
    %cst_46 = arith.constant 0.000000e+00 : f32
    %109 = vector.broadcast %cst_45 : f32 to vector<3x64xf32>
    %110 = vector.broadcast %cst_46 : f32 to vector<3x64xf32>
    %111 = arith.select %108, %109, %110 : vector<3x64xi1>, vector<3x64xf32>
    %112 = arith.addf %104, %111 : vector<3x64xf32>
    %c2_47 = arith.constant 2 : index
    %c3_48 = arith.constant 3 : index
    %113 = memref.load %arg0[%c2_47, %c3_48] : memref<3x5xi32, #tpu.memory_space<smem>>
    %114 = vector.broadcast %113 : i32 to vector<3x64xi32>
    %115 = arith.cmpi eq, %0, %114 : vector<3x64xi32>
    %116 = arith.andi %88, %115 : vector<3x64xi1>
    %cst_49 = arith.constant 1.000000e+00 : f32
    %cst_50 = arith.constant 0.000000e+00 : f32
    %117 = vector.broadcast %cst_49 : f32 to vector<3x64xf32>
    %118 = vector.broadcast %cst_50 : f32 to vector<3x64xf32>
    %119 = arith.select %116, %117, %118 : vector<3x64xi1>, vector<3x64xf32>
    %120 = arith.addf %112, %119 : vector<3x64xf32>
    %c2_51 = arith.constant 2 : index
    %c4_52 = arith.constant 4 : index
    %121 = memref.load %arg0[%c2_51, %c4_52] : memref<3x5xi32, #tpu.memory_space<smem>>
    %122 = vector.broadcast %121 : i32 to vector<3x64xi32>
    %123 = arith.cmpi eq, %0, %122 : vector<3x64xi32>
    %124 = arith.andi %88, %123 : vector<3x64xi1>
    %cst_53 = arith.constant 1.000000e+00 : f32
    %cst_54 = arith.constant 0.000000e+00 : f32
    %125 = vector.broadcast %cst_53 : f32 to vector<3x64xf32>
    %126 = vector.broadcast %cst_54 : f32 to vector<3x64xf32>
    %127 = arith.select %124, %125, %126 : vector<3x64xi1>, vector<3x64xf32>
    %128 = arith.addf %120, %127 : vector<3x64xf32>
    %129 = tpu.iota {dimensions = array<i32: 1>} : vector<3x64xi32>
    %130 = tpu.iota {dimensions = array<i32: 0>} : vector<3x64xi32>
    %cst_55 = arith.constant 0.000000e+00 : f32
    %131 = vector.broadcast %cst_55 : f32 to vector<3x64xf32>
    %c0_i32_56 = arith.constant 0 : i32
    %132 = vector.broadcast %c0_i32_56 : i32 to vector<3x64xi32>
    %133 = arith.cmpi eq, %130, %132 : vector<3x64xi32>
    %c0_57 = arith.constant 0 : index
    %c0_58 = arith.constant 0 : index
    %134 = memref.load %arg1[%c0_57, %c0_58] : memref<3x4xi32, #tpu.memory_space<smem>>
    %135 = vector.broadcast %134 : i32 to vector<3x64xi32>
    %136 = arith.cmpi eq, %129, %135 : vector<3x64xi32>
    %137 = arith.andi %133, %136 : vector<3x64xi1>
    %cst_59 = arith.constant 1.000000e+00 : f32
    %cst_60 = arith.constant 0.000000e+00 : f32
    %138 = vector.broadcast %cst_59 : f32 to vector<3x64xf32>
    %139 = vector.broadcast %cst_60 : f32 to vector<3x64xf32>
    %140 = arith.select %137, %138, %139 : vector<3x64xi1>, vector<3x64xf32>
    %141 = arith.addf %131, %140 : vector<3x64xf32>
    %c0_61 = arith.constant 0 : index
    %c1_62 = arith.constant 1 : index
    %142 = memref.load %arg1[%c0_61, %c1_62] : memref<3x4xi32, #tpu.memory_space<smem>>
    %143 = vector.broadcast %142 : i32 to vector<3x64xi32>
    %144 = arith.cmpi eq, %129, %143 : vector<3x64xi32>
    %145 = arith.andi %133, %144 : vector<3x64xi1>
    %cst_63 = arith.constant 1.000000e+00 : f32
    %cst_64 = arith.constant 0.000000e+00 : f32
    %146 = vector.broadcast %cst_63 : f32 to vector<3x64xf32>
    %147 = vector.broadcast %cst_64 : f32 to vector<3x64xf32>
    %148 = arith.select %145, %146, %147 : vector<3x64xi1>, vector<3x64xf32>
    %149 = arith.addf %141, %148 : vector<3x64xf32>
    %c0_65 = arith.constant 0 : index
    %c2_66 = arith.constant 2 : index
    %150 = memref.load %arg1[%c0_65, %c2_66] : memref<3x4xi32, #tpu.memory_space<smem>>
    %151 = vector.broadcast %150 : i32 to vector<3x64xi32>
    %152 = arith.cmpi eq, %129, %151 : vector<3x64xi32>
    %153 = arith.andi %133, %152 : vector<3x64xi1>
    %cst_67 = arith.constant 1.000000e+00 : f32
    %cst_68 = arith.constant 0.000000e+00 : f32
    %154 = vector.broadcast %cst_67 : f32 to vector<3x64xf32>
    %155 = vector.broadcast %cst_68 : f32 to vector<3x64xf32>
    %156 = arith.select %153, %154, %155 : vector<3x64xi1>, vector<3x64xf32>
    %157 = arith.addf %149, %156 : vector<3x64xf32>
    %c0_69 = arith.constant 0 : index
    %c3_70 = arith.constant 3 : index
    %158 = memref.load %arg1[%c0_69, %c3_70] : memref<3x4xi32, #tpu.memory_space<smem>>
    %159 = vector.broadcast %158 : i32 to vector<3x64xi32>
    %160 = arith.cmpi eq, %129, %159 : vector<3x64xi32>
    %161 = arith.andi %133, %160 : vector<3x64xi1>
    %cst_71 = arith.constant 1.000000e+00 : f32
    %cst_72 = arith.constant 0.000000e+00 : f32
    %162 = vector.broadcast %cst_71 : f32 to vector<3x64xf32>
    %163 = vector.broadcast %cst_72 : f32 to vector<3x64xf32>
    %164 = arith.select %161, %162, %163 : vector<3x64xi1>, vector<3x64xf32>
    %165 = arith.addf %157, %164 : vector<3x64xf32>
    %c1_i32_73 = arith.constant 1 : i32
    %166 = vector.broadcast %c1_i32_73 : i32 to vector<3x64xi32>
    %167 = arith.cmpi eq, %130, %166 : vector<3x64xi32>
    %c1_74 = arith.constant 1 : index
    %c0_75 = arith.constant 0 : index
    %168 = memref.load %arg1[%c1_74, %c0_75] : memref<3x4xi32, #tpu.memory_space<smem>>
    %169 = vector.broadcast %168 : i32 to vector<3x64xi32>
    %170 = arith.cmpi eq, %129, %169 : vector<3x64xi32>
    %171 = arith.andi %167, %170 : vector<3x64xi1>
    %cst_76 = arith.constant 1.000000e+00 : f32
    %cst_77 = arith.constant 0.000000e+00 : f32
    %172 = vector.broadcast %cst_76 : f32 to vector<3x64xf32>
    %173 = vector.broadcast %cst_77 : f32 to vector<3x64xf32>
    %174 = arith.select %171, %172, %173 : vector<3x64xi1>, vector<3x64xf32>
    %175 = arith.addf %165, %174 : vector<3x64xf32>
    %c1_78 = arith.constant 1 : index
    %c1_79 = arith.constant 1 : index
    %176 = memref.load %arg1[%c1_78, %c1_79] : memref<3x4xi32, #tpu.memory_space<smem>>
    %177 = vector.broadcast %176 : i32 to vector<3x64xi32>
    %178 = arith.cmpi eq, %129, %177 : vector<3x64xi32>
    %179 = arith.andi %167, %178 : vector<3x64xi1>
    %cst_80 = arith.constant 1.000000e+00 : f32
    %cst_81 = arith.constant 0.000000e+00 : f32
    %180 = vector.broadcast %cst_80 : f32 to vector<3x64xf32>
    %181 = vector.broadcast %cst_81 : f32 to vector<3x64xf32>
    %182 = arith.select %179, %180, %181 : vector<3x64xi1>, vector<3x64xf32>
    %183 = arith.addf %175, %182 : vector<3x64xf32>
    %c1_82 = arith.constant 1 : index
    %c2_83 = arith.constant 2 : index
    %184 = memref.load %arg1[%c1_82, %c2_83] : memref<3x4xi32, #tpu.memory_space<smem>>
    %185 = vector.broadcast %184 : i32 to vector<3x64xi32>
    %186 = arith.cmpi eq, %129, %185 : vector<3x64xi32>
    %187 = arith.andi %167, %186 : vector<3x64xi1>
    %cst_84 = arith.constant 1.000000e+00 : f32
    %cst_85 = arith.constant 0.000000e+00 : f32
    %188 = vector.broadcast %cst_84 : f32 to vector<3x64xf32>
    %189 = vector.broadcast %cst_85 : f32 to vector<3x64xf32>
    %190 = arith.select %187, %188, %189 : vector<3x64xi1>, vector<3x64xf32>
    %191 = arith.addf %183, %190 : vector<3x64xf32>
    %c1_86 = arith.constant 1 : index
    %c3_87 = arith.constant 3 : index
    %192 = memref.load %arg1[%c1_86, %c3_87] : memref<3x4xi32, #tpu.memory_space<smem>>
    %193 = vector.broadcast %192 : i32 to vector<3x64xi32>
    %194 = arith.cmpi eq, %129, %193 : vector<3x64xi32>
    %195 = arith.andi %167, %194 : vector<3x64xi1>
    %cst_88 = arith.constant 1.000000e+00 : f32
    %cst_89 = arith.constant 0.000000e+00 : f32
    %196 = vector.broadcast %cst_88 : f32 to vector<3x64xf32>
    %197 = vector.broadcast %cst_89 : f32 to vector<3x64xf32>
    %198 = arith.select %195, %196, %197 : vector<3x64xi1>, vector<3x64xf32>
    %199 = arith.addf %191, %198 : vector<3x64xf32>
    %c2_i32_90 = arith.constant 2 : i32
    %200 = vector.broadcast %c2_i32_90 : i32 to vector<3x64xi32>
    %201 = arith.cmpi eq, %130, %200 : vector<3x64xi32>
    %c2_91 = arith.constant 2 : index
    %c0_92 = arith.constant 0 : index
    %202 = memref.load %arg1[%c2_91, %c0_92] : memref<3x4xi32, #tpu.memory_space<smem>>
    %203 = vector.broadcast %202 : i32 to vector<3x64xi32>
    %204 = arith.cmpi eq, %129, %203 : vector<3x64xi32>
    %205 = arith.andi %201, %204 : vector<3x64xi1>
    %cst_93 = arith.constant 1.000000e+00 : f32
    %cst_94 = arith.constant 0.000000e+00 : f32
    %206 = vector.broadcast %cst_93 : f32 to vector<3x64xf32>
    %207 = vector.broadcast %cst_94 : f32 to vector<3x64xf32>
    %208 = arith.select %205, %206, %207 : vector<3x64xi1>, vector<3x64xf32>
    %209 = arith.addf %199, %208 : vector<3x64xf32>
    %c2_95 = arith.constant 2 : index
    %c1_96 = arith.constant 1 : index
    %210 = memref.load %arg1[%c2_95, %c1_96] : memref<3x4xi32, #tpu.memory_space<smem>>
    %211 = vector.broadcast %210 : i32 to vector<3x64xi32>
    %212 = arith.cmpi eq, %129, %211 : vector<3x64xi32>
    %213 = arith.andi %201, %212 : vector<3x64xi1>
    %cst_97 = arith.constant 1.000000e+00 : f32
    %cst_98 = arith.constant 0.000000e+00 : f32
    %214 = vector.broadcast %cst_97 : f32 to vector<3x64xf32>
    %215 = vector.broadcast %cst_98 : f32 to vector<3x64xf32>
    %216 = arith.select %213, %214, %215 : vector<3x64xi1>, vector<3x64xf32>
    %217 = arith.addf %209, %216 : vector<3x64xf32>
    %c2_99 = arith.constant 2 : index
    %c2_100 = arith.constant 2 : index
    %218 = memref.load %arg1[%c2_99, %c2_100] : memref<3x4xi32, #tpu.memory_space<smem>>
    %219 = vector.broadcast %218 : i32 to vector<3x64xi32>
    %220 = arith.cmpi eq, %129, %219 : vector<3x64xi32>
    %221 = arith.andi %201, %220 : vector<3x64xi1>
    %cst_101 = arith.constant 1.000000e+00 : f32
    %cst_102 = arith.constant 0.000000e+00 : f32
    %222 = vector.broadcast %cst_101 : f32 to vector<3x64xf32>
    %223 = vector.broadcast %cst_102 : f32 to vector<3x64xf32>
    %224 = arith.select %221, %222, %223 : vector<3x64xi1>, vector<3x64xf32>
    %225 = arith.addf %217, %224 : vector<3x64xf32>
    %c2_103 = arith.constant 2 : index
    %c3_104 = arith.constant 3 : index
    %226 = memref.load %arg1[%c2_103, %c3_104] : memref<3x4xi32, #tpu.memory_space<smem>>
    %227 = vector.broadcast %226 : i32 to vector<3x64xi32>
    %228 = arith.cmpi eq, %129, %227 : vector<3x64xi32>
    %229 = arith.andi %201, %228 : vector<3x64xi1>
    %cst_105 = arith.constant 1.000000e+00 : f32
    %cst_106 = arith.constant 0.000000e+00 : f32
    %230 = vector.broadcast %cst_105 : f32 to vector<3x64xf32>
    %231 = vector.broadcast %cst_106 : f32 to vector<3x64xf32>
    %232 = arith.select %229, %230, %231 : vector<3x64xi1>, vector<3x64xf32>
    %233 = arith.addf %225, %232 : vector<3x64xf32>
    %c0_107 = arith.constant 0 : index
    %c0_108 = arith.constant 0 : index
    %234 = vector.load %arg4[%c0_107, %c0_108] : memref<64x64xf32, #tpu.memory_space<vmem>>, vector<64x64xf32>
    %cst_109 = arith.constant dense<0.000000e+00> : vector<3x64xf32>
    %235 = tpu.matmul %128, %234, %cst_109 {dimension_numbers = #tpu.dot_dimension_numbers<[1], [0], [0], [1], [0, 0, 1, 1], [], []>} : vector<3x64xf32>, vector<64x64xf32>, vector<3x64xf32> -> vector<3x64xf32>
    %cst_110 = arith.constant 2.000000e-01 : f32
    %236 = vector.broadcast %cst_110 : f32 to vector<3x64xf32>
    %237 = arith.mulf %235, %236 : vector<3x64xf32>
    %c0_111 = arith.constant 0 : index
    %c0_112 = arith.constant 0 : index
    %238 = vector.load %arg5[%c0_111, %c0_112] : memref<64x64xf32, #tpu.memory_space<vmem>>, vector<64x64xf32>
    %cst_113 = arith.constant dense<0.000000e+00> : vector<3x64xf32>
    %239 = tpu.matmul %233, %238, %cst_113 {dimension_numbers = #tpu.dot_dimension_numbers<[1], [0], [0], [1], [0, 0, 1, 1], [], []>} : vector<3x64xf32>, vector<64x64xf32>, vector<3x64xf32> -> vector<3x64xf32>
    %cst_114 = arith.constant 2.500000e-01 : f32
    %240 = vector.broadcast %cst_114 : f32 to vector<3x64xf32>
    %241 = arith.mulf %239, %240 : vector<3x64xf32>
    %c0_115 = arith.constant 0 : index
    %c0_116 = arith.constant 0 : index
    %242 = vector.load %arg6[%c0_115, %c0_116] : memref<64x384xf32, #tpu.memory_space<vmem>>, vector<64x384xf32>
    %cst_117 = arith.constant dense<0.000000e+00> : vector<3x384xf32>
    %243 = tpu.matmul %237, %242, %cst_117 {dimension_numbers = #tpu.dot_dimension_numbers<[1], [0], [0], [1], [0, 0, 1, 1], [], []>} : vector<3x64xf32>, vector<64x384xf32>, vector<3x384xf32> -> vector<3x384xf32>
    %c0_118 = arith.constant 0 : index
    %c0_119 = arith.constant 0 : index
    %244 = vector.load %arg8[%c0_118, %c0_119] : memref<1x384xf32, #tpu.memory_space<vmem>>, vector<1x384xf32>
    %245 = vector.broadcast %244 : vector<1x384xf32> to vector<3x384xf32>
    %246 = arith.addf %243, %245 : vector<3x384xf32>
    %c0_120 = arith.constant 0 : index
    %c0_121 = arith.constant 0 : index
    %247 = vector.load %arg31[%c0_120, %c0_121] : memref<3x384xf32, #tpu.memory_space<vmem>>, vector<3x384xf32>
    tpu.vector_store %arg31[%c0_120, %c0_121], %246 {strides = array<i32>} : memref<3x384xf32, #tpu.memory_space<vmem>>, vector<3x384xf32>,
    %c0_122 = arith.constant 0 : index
    %c0_123 = arith.constant 0 : index
    %248 = vector.load %arg10[%c0_122, %c0_123] : memref<64x384xf32, #tpu.memory_space<vmem>>, vector<64x384xf32>
    %cst_124 = arith.constant dense<0.000000e+00> : vector<3x384xf32>
    %249 = tpu.matmul %241, %248, %cst_124 {dimension_numbers = #tpu.dot_dimension_numbers<[1], [0], [0], [1], [0, 0, 1, 1], [], []>} : vector<3x64xf32>, vector<64x384xf32>, vector<3x384xf32> -> vector<3x384xf32>
    %c0_125 = arith.constant 0 : index
    %c0_126 = arith.constant 0 : index
    %250 = vector.load %arg12[%c0_125, %c0_126] : memref<1x384xf32, #tpu.memory_space<vmem>>, vector<1x384xf32>
    %251 = vector.broadcast %250 : vector<1x384xf32> to vector<3x384xf32>
    %252 = arith.addf %249, %251 : vector<3x384xf32>
    %c0_127 = arith.constant 0 : index
    %c0_128 = arith.constant 0 : index
    %253 = vector.load %arg32[%c0_127, %c0_128] : memref<3x384xf32, #tpu.memory_space<vmem>>, vector<3x384xf32>
    tpu.vector_store %arg32[%c0_127, %c0_128], %252 {strides = array<i32>} : memref<3x384xf32, #tpu.memory_space<vmem>>, vector<3x384xf32>,
    %cst_129 = arith.constant 0.000000e+00 : f32
    %254 = vector.broadcast %cst_129 : f32 to vector<1x128xf32>
    %cst_130 = arith.constant 0.000000e+00 : f32
    %255 = vector.broadcast %cst_130 : f32 to vector<1x128xf32>
    %c0_131 = arith.constant 0 : index
    %c0_132 = arith.constant 0 : index
    %256 = vector.load %arg31[%c0_131, %c0_132] : memref<3x384xf32, #tpu.memory_space<vmem>>, vector<1x384xf32>
    %c0_133 = arith.constant 0 : index
    %c0_134 = arith.constant 0 : index
    %257 = vector.load %arg7[%c0_133, %c0_134] : memref<128x384xf32, #tpu.memory_space<vmem>>, vector<128x384xf32>
    %cst_135 = arith.constant dense<0.000000e+00> : vector<1x384xf32>
    %258 = tpu.matmul %254, %257, %cst_135 {dimension_numbers = #tpu.dot_dimension_numbers<[1], [0], [0], [1], [0, 0, 1, 1], [], []>} : vector<1x128xf32>, vector<128x384xf32>, vector<1x384xf32> -> vector<1x384xf32>
    %c0_136 = arith.constant 0 : index
    %c0_137 = arith.constant 0 : index
    %259 = vector.load %arg9[%c0_136, %c0_137] : memref<1x384xf32, #tpu.memory_space<vmem>>, vector<1x384xf32>
    %260 = arith.addf %258, %259 : vector<1x384xf32>
    %261 = vector.extract_strided_slice %256 {offsets = [0, 0], sizes = [1, 128], strides = [1, 1]} : vector<1x384xf32> to vector<1x128xf32>
    %262 = vector.extract_strided_slice %260 {offsets = [0, 0], sizes = [1, 128], strides = [1, 1]} : vector<1x384xf32> to vector<1x128xf32>
    %263 = arith.addf %261, %262 : vector<1x128xf32>
    %264 = arith.negf %263 : vector<1x128xf32>
    %265 = math.exp %264 : vector<1x128xf32>
    %cst_138 = arith.constant 1.000000e+00 : f32
    %266 = vector.broadcast %cst_138 : f32 to vector<1x128xf32>
    %267 = arith.addf %266, %265 : vector<1x128xf32>
    %268 = arith.divf %266, %267 : vector<1x128xf32>
    %269 = vector.extract_strided_slice %256 {offsets = [0, 128], sizes = [1, 128], strides = [1, 1]} : vector<1x384xf32> to vector<1x128xf32>
    %270 = vector.extract_strided_slice %260 {offsets = [0, 128], sizes = [1, 128], strides = [1, 1]} : vector<1x384xf32> to vector<1x128xf32>
    %271 = arith.addf %269, %270 : vector<1x128xf32>
    %272 = arith.negf %271 : vector<1x128xf32>
    %273 = math.exp %272 : vector<1x128xf32>
    %cst_139 = arith.constant 1.000000e+00 : f32
    %274 = vector.broadcast %cst_139 : f32 to vector<1x128xf32>
    %275 = arith.addf %274, %273 : vector<1x128xf32>
    %276 = arith.divf %274, %275 : vector<1x128xf32>
    %277 = vector.extract_strided_slice %256 {offsets = [0, 256], sizes = [1, 128], strides = [1, 1]} : vector<1x384xf32> to vector<1x128xf32>
    %278 = vector.extract_strided_slice %260 {offsets = [0, 256], sizes = [1, 128], strides = [1, 1]} : vector<1x384xf32> to vector<1x128xf32>
    %279 = arith.mulf %268, %278 : vector<1x128xf32>
    %280 = arith.addf %277, %279 : vector<1x128xf32>
    %281 = math.tanh %280 : vector<1x128xf32>
    %cst_140 = arith.constant 1.000000e+00 : f32
    %282 = vector.broadcast %cst_140 : f32 to vector<1x128xf32>
    %283 = arith.subf %282, %276 : vector<1x128xf32>
    %284 = arith.mulf %283, %281 : vector<1x128xf32>
    %285 = arith.mulf %276, %254 : vector<1x128xf32>
    %286 = arith.addf %284, %285 : vector<1x128xf32>
    %c0_141 = arith.constant 0 : index
    %c0_142 = arith.constant 0 : index
    %287 = vector.load %arg32[%c0_141, %c0_142] : memref<3x384xf32, #tpu.memory_space<vmem>>, vector<1x384xf32>
    %c0_143 = arith.constant 0 : index
    %c0_144 = arith.constant 0 : index
    %288 = vector.load %arg11[%c0_143, %c0_144] : memref<128x384xf32, #tpu.memory_space<vmem>>, vector<128x384xf32>
    %cst_145 = arith.constant dense<0.000000e+00> : vector<1x384xf32>
    %289 = tpu.matmul %255, %288, %cst_145 {dimension_numbers = #tpu.dot_dimension_numbers<[1], [0], [0], [1], [0, 0, 1, 1], [], []>} : vector<1x128xf32>, vector<128x384xf32>, vector<1x384xf32> -> vector<1x384xf32>
    %c0_146 = arith.constant 0 : index
    %c0_147 = arith.constant 0 : index
    %290 = vector.load %arg13[%c0_146, %c0_147] : memref<1x384xf32, #tpu.memory_space<vmem>>, vector<1x384xf32>
    %291 = arith.addf %289, %290 : vector<1x384xf32>
    %292 = vector.extract_strided_slice %287 {offsets = [0, 0], sizes = [1, 128], strides = [1, 1]} : vector<1x384xf32> to vector<1x128xf32>
    %293 = vector.extract_strided_slice %291 {offsets = [0, 0], sizes = [1, 128], strides = [1, 1]} : vector<1x384xf32> to vector<1x128xf32>
    %294 = arith.addf %292, %293 : vector<1x128xf32>
    %295 = arith.negf %294 : vector<1x128xf32>
    %296 = math.exp %295 : vector<1x128xf32>
    %cst_148 = arith.constant 1.000000e+00 : f32
    %297 = vector.broadcast %cst_148 : f32 to vector<1x128xf32>
    %298 = arith.addf %297, %296 : vector<1x128xf32>
    %299 = arith.divf %297, %298 : vector<1x128xf32>
    %300 = vector.extract_strided_slice %287 {offsets = [0, 128], sizes = [1, 128], strides = [1, 1]} : vector<1x384xf32> to vector<1x128xf32>
    %301 = vector.extract_strided_slice %291 {offsets = [0, 128], sizes = [1, 128], strides = [1, 1]} : vector<1x384xf32> to vector<1x128xf32>
    %302 = arith.addf %300, %301 : vector<1x128xf32>
    %303 = arith.negf %302 : vector<1x128xf32>
    %304 = math.exp %303 : vector<1x128xf32>
    %cst_149 = arith.constant 1.000000e+00 : f32
    %305 = vector.broadcast %cst_149 : f32 to vector<1x128xf32>
    %306 = arith.addf %305, %304 : vector<1x128xf32>
    %307 = arith.divf %305, %306 : vector<1x128xf32>
    %308 = vector.extract_strided_slice %287 {offsets = [0, 256], sizes = [1, 128], strides = [1, 1]} : vector<1x384xf32> to vector<1x128xf32>
    %309 = vector.extract_strided_slice %291 {offsets = [0, 256], sizes = [1, 128], strides = [1, 1]} : vector<1x384xf32> to vector<1x128xf32>
    %310 = arith.mulf %299, %309 : vector<1x128xf32>
    %311 = arith.addf %308, %310 : vector<1x128xf32>
    %312 = math.tanh %311 : vector<1x128xf32>
    %cst_150 = arith.constant 1.000000e+00 : f32
    %313 = vector.broadcast %cst_150 : f32 to vector<1x128xf32>
    %314 = arith.subf %313, %307 : vector<1x128xf32>
    %315 = arith.mulf %314, %312 : vector<1x128xf32>
    %316 = arith.mulf %307, %255 : vector<1x128xf32>
    %317 = arith.addf %315, %316 : vector<1x128xf32>
    %c0_151 = arith.constant 0 : index
    %c0_152 = arith.constant 0 : index
    %318 = vector.load %arg33[%c0_151, %c0_152] : memref<3x128xf32, #tpu.memory_space<vmem>>, vector<1x128xf32>
    tpu.vector_store %arg33[%c0_151, %c0_152], %286 {strides = array<i32>} : memref<3x128xf32, #tpu.memory_space<vmem>>, vector<1x128xf32>,
    %c0_153 = arith.constant 0 : index
    %c0_154 = arith.constant 0 : index
    %319 = vector.load %arg34[%c0_153, %c0_154] : memref<3x128xf32, #tpu.memory_space<vmem>>, vector<1x128xf32>
    tpu.vector_store %arg34[%c0_153, %c0_154], %317 {strides = array<i32>} : memref<3x128xf32, #tpu.memory_space<vmem>>, vector<1x128xf32>,
    %c1_155 = arith.constant 1 : index
    %c0_156 = arith.constant 0 : index
    %320 = vector.load %arg31[%c1_155, %c0_156] : memref<3x384xf32, #tpu.memory_space<vmem>>, vector<1x384xf32>
    %c0_157 = arith.constant 0 : index
    %c0_158 = arith.constant 0 : index
    %321 = vector.load %arg7[%c0_157, %c0_158] : memref<128x384xf32, #tpu.memory_space<vmem>>, vector<128x384xf32>
    %cst_159 = arith.constant dense<0.000000e+00> : vector<1x384xf32>
    %322 = tpu.matmul %286, %321, %cst_159 {dimension_numbers = #tpu.dot_dimension_numbers<[1], [0], [0], [1], [0, 0, 1, 1], [], []>} : vector<1x128xf32>, vector<128x384xf32>, vector<1x384xf32> -> vector<1x384xf32>
    %c0_160 = arith.constant 0 : index
    %c0_161 = arith.constant 0 : index
    %323 = vector.load %arg9[%c0_160, %c0_161] : memref<1x384xf32, #tpu.memory_space<vmem>>, vector<1x384xf32>
    %324 = arith.addf %322, %323 : vector<1x384xf32>
    %325 = vector.extract_strided_slice %320 {offsets = [0, 0], sizes = [1, 128], strides = [1, 1]} : vector<1x384xf32> to vector<1x128xf32>
    %326 = vector.extract_strided_slice %324 {offsets = [0, 0], sizes = [1, 128], strides = [1, 1]} : vector<1x384xf32> to vector<1x128xf32>
    %327 = arith.addf %325, %326 : vector<1x128xf32>
    %328 = arith.negf %327 : vector<1x128xf32>
    %329 = math.exp %328 : vector<1x128xf32>
    %cst_162 = arith.constant 1.000000e+00 : f32
    %330 = vector.broadcast %cst_162 : f32 to vector<1x128xf32>
    %331 = arith.addf %330, %329 : vector<1x128xf32>
    %332 = arith.divf %330, %331 : vector<1x128xf32>
    %333 = vector.extract_strided_slice %320 {offsets = [0, 128], sizes = [1, 128], strides = [1, 1]} : vector<1x384xf32> to vector<1x128xf32>
    %334 = vector.extract_strided_slice %324 {offsets = [0, 128], sizes = [1, 128], strides = [1, 1]} : vector<1x384xf32> to vector<1x128xf32>
    %335 = arith.addf %333, %334 : vector<1x128xf32>
    %336 = arith.negf %335 : vector<1x128xf32>
    %337 = math.exp %336 : vector<1x128xf32>
    %cst_163 = arith.constant 1.000000e+00 : f32
    %338 = vector.broadcast %cst_163 : f32 to vector<1x128xf32>
    %339 = arith.addf %338, %337 : vector<1x128xf32>
    %340 = arith.divf %338, %339 : vector<1x128xf32>
    %341 = vector.extract_strided_slice %320 {offsets = [0, 256], sizes = [1, 128], strides = [1, 1]} : vector<1x384xf32> to vector<1x128xf32>
    %342 = vector.extract_strided_slice %324 {offsets = [0, 256], sizes = [1, 128], strides = [1, 1]} : vector<1x384xf32> to vector<1x128xf32>
    %343 = arith.mulf %332, %342 : vector<1x128xf32>
    %344 = arith.addf %341, %343 : vector<1x128xf32>
    %345 = math.tanh %344 : vector<1x128xf32>
    %cst_164 = arith.constant 1.000000e+00 : f32
    %346 = vector.broadcast %cst_164 : f32 to vector<1x128xf32>
    %347 = arith.subf %346, %340 : vector<1x128xf32>
    %348 = arith.mulf %347, %345 : vector<1x128xf32>
    %349 = arith.mulf %340, %286 : vector<1x128xf32>
    %350 = arith.addf %348, %349 : vector<1x128xf32>
    %c1_165 = arith.constant 1 : index
    %c0_166 = arith.constant 0 : index
    %351 = vector.load %arg32[%c1_165, %c0_166] : memref<3x384xf32, #tpu.memory_space<vmem>>, vector<1x384xf32>
    %c0_167 = arith.constant 0 : index
    %c0_168 = arith.constant 0 : index
    %352 = vector.load %arg11[%c0_167, %c0_168] : memref<128x384xf32, #tpu.memory_space<vmem>>, vector<128x384xf32>
    %cst_169 = arith.constant dense<0.000000e+00> : vector<1x384xf32>
    %353 = tpu.matmul %317, %352, %cst_169 {dimension_numbers = #tpu.dot_dimension_numbers<[1], [0], [0], [1], [0, 0, 1, 1], [], []>} : vector<1x128xf32>, vector<128x384xf32>, vector<1x384xf32> -> vector<1x384xf32>
    %c0_170 = arith.constant 0 : index
    %c0_171 = arith.constant 0 : index
    %354 = vector.load %arg13[%c0_170, %c0_171] : memref<1x384xf32, #tpu.memory_space<vmem>>, vector<1x384xf32>
    %355 = arith.addf %353, %354 : vector<1x384xf32>
    %356 = vector.extract_strided_slice %351 {offsets = [0, 0], sizes = [1, 128], strides = [1, 1]} : vector<1x384xf32> to vector<1x128xf32>
    %357 = vector.extract_strided_slice %355 {offsets = [0, 0], sizes = [1, 128], strides = [1, 1]} : vector<1x384xf32> to vector<1x128xf32>
    %358 = arith.addf %356, %357 : vector<1x128xf32>
    %359 = arith.negf %358 : vector<1x128xf32>
    %360 = math.exp %359 : vector<1x128xf32>
    %cst_172 = arith.constant 1.000000e+00 : f32
    %361 = vector.broadcast %cst_172 : f32 to vector<1x128xf32>
    %362 = arith.addf %361, %360 : vector<1x128xf32>
    %363 = arith.divf %361, %362 : vector<1x128xf32>
    %364 = vector.extract_strided_slice %351 {offsets = [0, 128], sizes = [1, 128], strides = [1, 1]} : vector<1x384xf32> to vector<1x128xf32>
    %365 = vector.extract_strided_slice %355 {offsets = [0, 128], sizes = [1, 128], strides = [1, 1]} : vector<1x384xf32> to vector<1x128xf32>
    %366 = arith.addf %364, %365 : vector<1x128xf32>
    %367 = arith.negf %366 : vector<1x128xf32>
    %368 = math.exp %367 : vector<1x128xf32>
    %cst_173 = arith.constant 1.000000e+00 : f32
    %369 = vector.broadcast %cst_173 : f32 to vector<1x128xf32>
    %370 = arith.addf %369, %368 : vector<1x128xf32>
    %371 = arith.divf %369, %370 : vector<1x128xf32>
    %372 = vector.extract_strided_slice %351 {offsets = [0, 256], sizes = [1, 128], strides = [1, 1]} : vector<1x384xf32> to vector<1x128xf32>
    %373 = vector.extract_strided_slice %355 {offsets = [0, 256], sizes = [1, 128], strides = [1, 1]} : vector<1x384xf32> to vector<1x128xf32>
    %374 = arith.mulf %363, %373 : vector<1x128xf32>
    %375 = arith.addf %372, %374 : vector<1x128xf32>
    %376 = math.tanh %375 : vector<1x128xf32>
    %cst_174 = arith.constant 1.000000e+00 : f32
    %377 = vector.broadcast %cst_174 : f32 to vector<1x128xf32>
    %378 = arith.subf %377, %371 : vector<1x128xf32>
    %379 = arith.mulf %378, %376 : vector<1x128xf32>
    %380 = arith.mulf %371, %317 : vector<1x128xf32>
    %381 = arith.addf %379, %380 : vector<1x128xf32>
    %c1_175 = arith.constant 1 : index
    %c0_176 = arith.constant 0 : index
    %382 = vector.load %arg33[%c1_175, %c0_176] : memref<3x128xf32, #tpu.memory_space<vmem>>, vector<1x128xf32>
    tpu.vector_store %arg33[%c1_175, %c0_176], %350 {strides = array<i32>} : memref<3x128xf32, #tpu.memory_space<vmem>>, vector<1x128xf32>,
    %c1_177 = arith.constant 1 : index
    %c0_178 = arith.constant 0 : index
    %383 = vector.load %arg34[%c1_177, %c0_178] : memref<3x128xf32, #tpu.memory_space<vmem>>, vector<1x128xf32>
    tpu.vector_store %arg34[%c1_177, %c0_178], %381 {strides = array<i32>} : memref<3x128xf32, #tpu.memory_space<vmem>>, vector<1x128xf32>,
    %c2_179 = arith.constant 2 : index
    %c0_180 = arith.constant 0 : index
    %384 = vector.load %arg31[%c2_179, %c0_180] : memref<3x384xf32, #tpu.memory_space<vmem>>, vector<1x384xf32>
    %c0_181 = arith.constant 0 : index
    %c0_182 = arith.constant 0 : index
    %385 = vector.load %arg7[%c0_181, %c0_182] : memref<128x384xf32, #tpu.memory_space<vmem>>, vector<128x384xf32>
    %cst_183 = arith.constant dense<0.000000e+00> : vector<1x384xf32>
    %386 = tpu.matmul %350, %385, %cst_183 {dimension_numbers = #tpu.dot_dimension_numbers<[1], [0], [0], [1], [0, 0, 1, 1], [], []>} : vector<1x128xf32>, vector<128x384xf32>, vector<1x384xf32> -> vector<1x384xf32>
    %c0_184 = arith.constant 0 : index
    %c0_185 = arith.constant 0 : index
    %387 = vector.load %arg9[%c0_184, %c0_185] : memref<1x384xf32, #tpu.memory_space<vmem>>, vector<1x384xf32>
    %388 = arith.addf %386, %387 : vector<1x384xf32>
    %389 = vector.extract_strided_slice %384 {offsets = [0, 0], sizes = [1, 128], strides = [1, 1]} : vector<1x384xf32> to vector<1x128xf32>
    %390 = vector.extract_strided_slice %388 {offsets = [0, 0], sizes = [1, 128], strides = [1, 1]} : vector<1x384xf32> to vector<1x128xf32>
    %391 = arith.addf %389, %390 : vector<1x128xf32>
    %392 = arith.negf %391 : vector<1x128xf32>
    %393 = math.exp %392 : vector<1x128xf32>
    %cst_186 = arith.constant 1.000000e+00 : f32
    %394 = vector.broadcast %cst_186 : f32 to vector<1x128xf32>
    %395 = arith.addf %394, %393 : vector<1x128xf32>
    %396 = arith.divf %394, %395 : vector<1x128xf32>
    %397 = vector.extract_strided_slice %384 {offsets = [0, 128], sizes = [1, 128], strides = [1, 1]} : vector<1x384xf32> to vector<1x128xf32>
    %398 = vector.extract_strided_slice %388 {offsets = [0, 128], sizes = [1, 128], strides = [1, 1]} : vector<1x384xf32> to vector<1x128xf32>
    %399 = arith.addf %397, %398 : vector<1x128xf32>
    %400 = arith.negf %399 : vector<1x128xf32>
    %401 = math.exp %400 : vector<1x128xf32>
    %cst_187 = arith.constant 1.000000e+00 : f32
    %402 = vector.broadcast %cst_187 : f32 to vector<1x128xf32>
    %403 = arith.addf %402, %401 : vector<1x128xf32>
    %404 = arith.divf %402, %403 : vector<1x128xf32>
    %405 = vector.extract_strided_slice %384 {offsets = [0, 256], sizes = [1, 128], strides = [1, 1]} : vector<1x384xf32> to vector<1x128xf32>
    %406 = vector.extract_strided_slice %388 {offsets = [0, 256], sizes = [1, 128], strides = [1, 1]} : vector<1x384xf32> to vector<1x128xf32>
    %407 = arith.mulf %396, %406 : vector<1x128xf32>
    %408 = arith.addf %405, %407 : vector<1x128xf32>
    %409 = math.tanh %408 : vector<1x128xf32>
    %cst_188 = arith.constant 1.000000e+00 : f32
    %410 = vector.broadcast %cst_188 : f32 to vector<1x128xf32>
    %411 = arith.subf %410, %404 : vector<1x128xf32>
    %412 = arith.mulf %411, %409 : vector<1x128xf32>
    %413 = arith.mulf %404, %350 : vector<1x128xf32>
    %414 = arith.addf %412, %413 : vector<1x128xf32>
    %c2_189 = arith.constant 2 : index
    %c0_190 = arith.constant 0 : index
    %415 = vector.load %arg32[%c2_189, %c0_190] : memref<3x384xf32, #tpu.memory_space<vmem>>, vector<1x384xf32>
    %c0_191 = arith.constant 0 : index
    %c0_192 = arith.constant 0 : index
    %416 = vector.load %arg11[%c0_191, %c0_192] : memref<128x384xf32, #tpu.memory_space<vmem>>, vector<128x384xf32>
    %cst_193 = arith.constant dense<0.000000e+00> : vector<1x384xf32>
    %417 = tpu.matmul %381, %416, %cst_193 {dimension_numbers = #tpu.dot_dimension_numbers<[1], [0], [0], [1], [0, 0, 1, 1], [], []>} : vector<1x128xf32>, vector<128x384xf32>, vector<1x384xf32> -> vector<1x384xf32>
    %c0_194 = arith.constant 0 : index
    %c0_195 = arith.constant 0 : index
    %418 = vector.load %arg13[%c0_194, %c0_195] : memref<1x384xf32, #tpu.memory_space<vmem>>, vector<1x384xf32>
    %419 = arith.addf %417, %418 : vector<1x384xf32>
    %420 = vector.extract_strided_slice %415 {offsets = [0, 0], sizes = [1, 128], strides = [1, 1]} : vector<1x384xf32> to vector<1x128xf32>
    %421 = vector.extract_strided_slice %419 {offsets = [0, 0], sizes = [1, 128], strides = [1, 1]} : vector<1x384xf32> to vector<1x128xf32>
    %422 = arith.addf %420, %421 : vector<1x128xf32>
    %423 = arith.negf %422 : vector<1x128xf32>
    %424 = math.exp %423 : vector<1x128xf32>
    %cst_196 = arith.constant 1.000000e+00 : f32
    %425 = vector.broadcast %cst_196 : f32 to vector<1x128xf32>
    %426 = arith.addf %425, %424 : vector<1x128xf32>
    %427 = arith.divf %425, %426 : vector<1x128xf32>
    %428 = vector.extract_strided_slice %415 {offsets = [0, 128], sizes = [1, 128], strides = [1, 1]} : vector<1x384xf32> to vector<1x128xf32>
    %429 = vector.extract_strided_slice %419 {offsets = [0, 128], sizes = [1, 128], strides = [1, 1]} : vector<1x384xf32> to vector<1x128xf32>
    %430 = arith.addf %428, %429 : vector<1x128xf32>
    %431 = arith.negf %430 : vector<1x128xf32>
    %432 = math.exp %431 : vector<1x128xf32>
    %cst_197 = arith.constant 1.000000e+00 : f32
    %433 = vector.broadcast %cst_197 : f32 to vector<1x128xf32>
    %434 = arith.addf %433, %432 : vector<1x128xf32>
    %435 = arith.divf %433, %434 : vector<1x128xf32>
    %436 = vector.extract_strided_slice %415 {offsets = [0, 256], sizes = [1, 128], strides = [1, 1]} : vector<1x384xf32> to vector<1x128xf32>
    %437 = vector.extract_strided_slice %419 {offsets = [0, 256], sizes = [1, 128], strides = [1, 1]} : vector<1x384xf32> to vector<1x128xf32>
    %438 = arith.mulf %427, %437 : vector<1x128xf32>
    %439 = arith.addf %436, %438 : vector<1x128xf32>
    %440 = math.tanh %439 : vector<1x128xf32>
    %cst_198 = arith.constant 1.000000e+00 : f32
    %441 = vector.broadcast %cst_198 : f32 to vector<1x128xf32>
    %442 = arith.subf %441, %435 : vector<1x128xf32>
    %443 = arith.mulf %442, %440 : vector<1x128xf32>
    %444 = arith.mulf %435, %381 : vector<1x128xf32>
    %445 = arith.addf %443, %444 : vector<1x128xf32>
    %c2_199 = arith.constant 2 : index
    %c0_200 = arith.constant 0 : index
    %446 = vector.load %arg33[%c2_199, %c0_200] : memref<3x128xf32, #tpu.memory_space<vmem>>, vector<1x128xf32>
    tpu.vector_store %arg33[%c2_199, %c0_200], %414 {strides = array<i32>} : memref<3x128xf32, #tpu.memory_space<vmem>>, vector<1x128xf32>,
    %c2_201 = arith.constant 2 : index
    %c0_202 = arith.constant 0 : index
    %447 = vector.load %arg34[%c2_201, %c0_202] : memref<3x128xf32, #tpu.memory_space<vmem>>, vector<1x128xf32>
    tpu.vector_store %arg34[%c2_201, %c0_202], %445 {strides = array<i32>} : memref<3x128xf32, #tpu.memory_space<vmem>>, vector<1x128xf32>,
    %c0_203 = arith.constant 0 : index
    %c0_204 = arith.constant 0 : index
    %448 = vector.load %arg33[%c0_203, %c0_204] : memref<3x128xf32, #tpu.memory_space<vmem>>, vector<3x128xf32>
    %cst_205 = arith.constant 0.000000e+00 : f32
    %449 = vector.broadcast %cst_205 : f32 to vector<3x128xf32>
    %450 = arith.maximumf %448, %449 : vector<3x128xf32>
    %c0_206 = arith.constant 0 : index
    %c0_207 = arith.constant 0 : index
    %451 = vector.load %arg34[%c0_206, %c0_207] : memref<3x128xf32, #tpu.memory_space<vmem>>, vector<3x128xf32>
    %cst_208 = arith.constant 0.000000e+00 : f32
    %452 = vector.broadcast %cst_208 : f32 to vector<3x128xf32>
    %453 = arith.maximumf %451, %452 : vector<3x128xf32>
    %c0_209 = arith.constant 0 : index
    %c0_210 = arith.constant 0 : index
    %454 = vector.load %arg14[%c0_209, %c0_210] : memref<256x64xf32, #tpu.memory_space<vmem>>, vector<128x64xf32>
    %cst_211 = arith.constant dense<0.000000e+00> : vector<3x64xf32>
    %455 = tpu.matmul %450, %454, %cst_211 {dimension_numbers = #tpu.dot_dimension_numbers<[1], [0], [0], [1], [0, 0, 1, 1], [], []>} : vector<3x128xf32>, vector<128x64xf32>, vector<3x64xf32> -> vector<3x64xf32>
    %c128 = arith.constant 128 : index
    %c0_212 = arith.constant 0 : index
    %456 = vector.load %arg14[%c128, %c0_212] : memref<256x64xf32, #tpu.memory_space<vmem>>, vector<128x64xf32>
    %cst_213 = arith.constant dense<0.000000e+00> : vector<3x64xf32>
    %457 = tpu.matmul %453, %456, %cst_213 {dimension_numbers = #tpu.dot_dimension_numbers<[1], [0], [0], [1], [0, 0, 1, 1], [], []>} : vector<3x128xf32>, vector<128x64xf32>, vector<3x64xf32> -> vector<3x64xf32>
    %458 = arith.addf %455, %457 : vector<3x64xf32>
    %c0_214 = arith.constant 0 : index
    %c0_215 = arith.constant 0 : index
    %459 = vector.load %arg15[%c0_214, %c0_215] : memref<1x64xf32, #tpu.memory_space<vmem>>, vector<1x64xf32>
    %460 = vector.broadcast %459 : vector<1x64xf32> to vector<3x64xf32>
    %461 = arith.addf %458, %460 : vector<3x64xf32>
    %c0_216 = arith.constant 0 : index
    %c0_217 = arith.constant 0 : index
    %462 = vector.load %arg35[%c0_216, %c0_217] : memref<3x64xf32, #tpu.memory_space<vmem>>, vector<3x64xf32>
    tpu.vector_store %arg35[%c0_216, %c0_217], %461 {strides = array<i32>} : memref<3x64xf32, #tpu.memory_space<vmem>>, vector<3x64xf32>,
    %c2_218 = arith.constant 2 : index
    %c0_219 = arith.constant 0 : index
    %463 = vector.load %arg35[%c2_218, %c0_219] : memref<3x64xf32, #tpu.memory_space<vmem>>, vector<1x64xf32>
    %c0_220 = arith.constant 0 : index
    %c0_221 = arith.constant 0 : index
    %464 = vector.load %arg35[%c0_220, %c0_221] : memref<3x64xf32, #tpu.memory_space<vmem>>, vector<2x64xf32>
    %c0_222 = arith.constant 0 : index
    %c0_223 = arith.constant 0 : index
    %465 = vector.load %arg16[%c0_222, %c0_223] : memref<128x128xf32, #tpu.memory_space<vmem>>, vector<128x128xf32>
    %c0_224 = arith.constant 0 : index
    %c0_225 = arith.constant 0 : index
    %466 = vector.load %arg17[%c0_224, %c0_225] : memref<128x64xf32, #tpu.memory_space<vmem>>, vector<128x64xf32>
    %cst_226 = arith.constant dense<0.000000e+00> : vector<128x64xf32>
    %467 = tpu.matmul %465, %466, %cst_226 {dimension_numbers = #tpu.dot_dimension_numbers<[1], [0], [0], [1], [0, 0, 1, 1], [], []>} : vector<128x128xf32>, vector<128x64xf32>, vector<128x64xf32> -> vector<128x64xf32>
    %c0_227 = arith.constant 0 : index
    %c0_228 = arith.constant 0 : index
    %468 = vector.load %arg18[%c0_227, %c0_228] : memref<1x64xf32, #tpu.memory_space<vmem>>, vector<1x64xf32>
    %469 = vector.broadcast %468 : vector<1x64xf32> to vector<128x64xf32>
    %470 = arith.addf %467, %469 : vector<128x64xf32>
    %cst_229 = arith.constant 0.000000e+00 : f32
    %471 = vector.broadcast %cst_229 : f32 to vector<128x64xf32>
    %472 = arith.maximumf %470, %471 : vector<128x64xf32>
    %c0_230 = arith.constant 0 : index
    %c0_231 = arith.constant 0 : index
    %473 = vector.load %arg19[%c0_230, %c0_231] : memref<64x64xf32, #tpu.memory_space<vmem>>, vector<64x64xf32>
    %cst_232 = arith.constant dense<0.000000e+00> : vector<128x64xf32>
    %474 = tpu.matmul %472, %473, %cst_232 {dimension_numbers = #tpu.dot_dimension_numbers<[1], [0], [0], [1], [0, 0, 1, 1], [], []>} : vector<128x64xf32>, vector<64x64xf32>, vector<128x64xf32> -> vector<128x64xf32>
    %cst_233 = arith.constant dense<0.000000e+00> : vector<128x64xf32>
    %475 = tpu.matmul %465, %474, %cst_233 {dimension_numbers = #tpu.dot_dimension_numbers<[1], [0], [0], [1], [0, 0, 1, 1], [], []>} : vector<128x128xf32>, vector<128x64xf32>, vector<128x64xf32> -> vector<128x64xf32>
    %c0_234 = arith.constant 0 : index
    %c0_235 = arith.constant 0 : index
    %476 = vector.load %arg20[%c0_234, %c0_235] : memref<1x64xf32, #tpu.memory_space<vmem>>, vector<1x64xf32>
    %477 = vector.broadcast %476 : vector<1x64xf32> to vector<128x64xf32>
    %478 = arith.addf %475, %477 : vector<128x64xf32>
    %c0_236 = arith.constant 0 : index
    %c0_237 = arith.constant 0 : index
    %479 = vector.load %arg21[%c0_236, %c0_237] : memref<128x128xf32, #tpu.memory_space<vmem>>, vector<128x128xf32>
    %c0_238 = arith.constant 0 : index
    %c0_239 = arith.constant 0 : index
    %480 = vector.load %arg22[%c0_238, %c0_239] : memref<128x64xf32, #tpu.memory_space<vmem>>, vector<128x64xf32>
    %cst_240 = arith.constant dense<0.000000e+00> : vector<128x64xf32>
    %481 = tpu.matmul %479, %480, %cst_240 {dimension_numbers = #tpu.dot_dimension_numbers<[1], [0], [0], [1], [0, 0, 1, 1], [], []>} : vector<128x128xf32>, vector<128x64xf32>, vector<128x64xf32> -> vector<128x64xf32>
    %c0_241 = arith.constant 0 : index
    %c0_242 = arith.constant 0 : index
    %482 = vector.load %arg23[%c0_241, %c0_242] : memref<1x64xf32, #tpu.memory_space<vmem>>, vector<1x64xf32>
    %483 = vector.broadcast %482 : vector<1x64xf32> to vector<128x64xf32>
    %484 = arith.addf %481, %483 : vector<128x64xf32>
    %cst_243 = arith.constant 0.000000e+00 : f32
    %485 = vector.broadcast %cst_243 : f32 to vector<128x64xf32>
    %486 = arith.maximumf %484, %485 : vector<128x64xf32>
    %c0_244 = arith.constant 0 : index
    %c0_245 = arith.constant 0 : index
    %487 = vector.load %arg24[%c0_244, %c0_245] : memref<64x64xf32, #tpu.memory_space<vmem>>, vector<64x64xf32>
    %cst_246 = arith.constant dense<0.000000e+00> : vector<128x64xf32>
    %488 = tpu.matmul %486, %487, %cst_246 {dimension_numbers = #tpu.dot_dimension_numbers<[1], [0], [0], [1], [0, 0, 1, 1], [], []>} : vector<128x64xf32>, vector<64x64xf32>, vector<128x64xf32> -> vector<128x64xf32>
    %cst_247 = arith.constant dense<0.000000e+00> : vector<128x64xf32>
    %489 = tpu.matmul %479, %488, %cst_247 {dimension_numbers = #tpu.dot_dimension_numbers<[1], [0], [0], [1], [0, 0, 1, 1], [], []>} : vector<128x128xf32>, vector<128x64xf32>, vector<128x64xf32> -> vector<128x64xf32>
    %c0_248 = arith.constant 0 : index
    %c0_249 = arith.constant 0 : index
    %490 = vector.load %arg25[%c0_248, %c0_249] : memref<1x64xf32, #tpu.memory_space<vmem>>, vector<1x64xf32>
    %491 = vector.broadcast %490 : vector<1x64xf32> to vector<128x64xf32>
    %492 = arith.addf %489, %491 : vector<128x64xf32>
    %c0_250 = arith.constant 0 : index
    %c0_251 = arith.constant 0 : index
    %493 = memref.load %arg3[%c0_250, %c0_251] : memref<1x1xf32, #tpu.memory_space<smem>>
    %494 = vector.broadcast %493 : f32 to vector<128x64xf32>
    %495 = arith.mulf %492, %494 : vector<128x64xf32>
    %496 = arith.subf %478, %495 : vector<128x64xf32>
    %497 = tpu.iota {dimensions = array<i32: 1>} : vector<2x128xi32>
    %498 = tpu.iota {dimensions = array<i32: 0>} : vector<2x128xi32>
    %cst_252 = arith.constant 0.000000e+00 : f32
    %499 = vector.broadcast %cst_252 : f32 to vector<2x128xf32>
    %c0_i32_253 = arith.constant 0 : i32
    %500 = vector.broadcast %c0_i32_253 : i32 to vector<2x128xi32>
    %501 = arith.cmpi eq, %498, %500 : vector<2x128xi32>
    %c0_254 = arith.constant 0 : index
    %c0_255 = arith.constant 0 : index
    %502 = memref.load %arg2[%c0_254, %c0_255] : memref<3x6xi32, #tpu.memory_space<smem>>
    %503 = vector.broadcast %502 : i32 to vector<2x128xi32>
    %504 = arith.cmpi eq, %497, %503 : vector<2x128xi32>
    %505 = arith.andi %501, %504 : vector<2x128xi1>
    %cst_256 = arith.constant 1.000000e+00 : f32
    %cst_257 = arith.constant 0.000000e+00 : f32
    %506 = vector.broadcast %cst_256 : f32 to vector<2x128xf32>
    %507 = vector.broadcast %cst_257 : f32 to vector<2x128xf32>
    %508 = arith.select %505, %506, %507 : vector<2x128xi1>, vector<2x128xf32>
    %509 = arith.maximumf %499, %508 : vector<2x128xf32>
    %c0_258 = arith.constant 0 : index
    %c1_259 = arith.constant 1 : index
    %510 = memref.load %arg2[%c0_258, %c1_259] : memref<3x6xi32, #tpu.memory_space<smem>>
    %511 = vector.broadcast %510 : i32 to vector<2x128xi32>
    %512 = arith.cmpi eq, %497, %511 : vector<2x128xi32>
    %513 = arith.andi %501, %512 : vector<2x128xi1>
    %cst_260 = arith.constant 1.000000e+00 : f32
    %cst_261 = arith.constant 0.000000e+00 : f32
    %514 = vector.broadcast %cst_260 : f32 to vector<2x128xf32>
    %515 = vector.broadcast %cst_261 : f32 to vector<2x128xf32>
    %516 = arith.select %513, %514, %515 : vector<2x128xi1>, vector<2x128xf32>
    %517 = arith.maximumf %509, %516 : vector<2x128xf32>
    %c0_262 = arith.constant 0 : index
    %c2_263 = arith.constant 2 : index
    %518 = memref.load %arg2[%c0_262, %c2_263] : memref<3x6xi32, #tpu.memory_space<smem>>
    %519 = vector.broadcast %518 : i32 to vector<2x128xi32>
    %520 = arith.cmpi eq, %497, %519 : vector<2x128xi32>
    %521 = arith.andi %501, %520 : vector<2x128xi1>
    %cst_264 = arith.constant 1.000000e+00 : f32
    %cst_265 = arith.constant 0.000000e+00 : f32
    %522 = vector.broadcast %cst_264 : f32 to vector<2x128xf32>
    %523 = vector.broadcast %cst_265 : f32 to vector<2x128xf32>
    %524 = arith.select %521, %522, %523 : vector<2x128xi1>, vector<2x128xf32>
    %525 = arith.maximumf %517, %524 : vector<2x128xf32>
    %c0_266 = arith.constant 0 : index
    %c3_267 = arith.constant 3 : index
    %526 = memref.load %arg2[%c0_266, %c3_267] : memref<3x6xi32, #tpu.memory_space<smem>>
    %527 = vector.broadcast %526 : i32 to vector<2x128xi32>
    %528 = arith.cmpi eq, %497, %527 : vector<2x128xi32>
    %529 = arith.andi %501, %528 : vector<2x128xi1>
    %cst_268 = arith.constant 1.000000e+00 : f32
    %cst_269 = arith.constant 0.000000e+00 : f32
    %530 = vector.broadcast %cst_268 : f32 to vector<2x128xf32>
    %531 = vector.broadcast %cst_269 : f32 to vector<2x128xf32>
    %532 = arith.select %529, %530, %531 : vector<2x128xi1>, vector<2x128xf32>
    %533 = arith.maximumf %525, %532 : vector<2x128xf32>
    %c0_270 = arith.constant 0 : index
    %c4_271 = arith.constant 4 : index
    %534 = memref.load %arg2[%c0_270, %c4_271] : memref<3x6xi32, #tpu.memory_space<smem>>
    %535 = vector.broadcast %534 : i32 to vector<2x128xi32>
    %536 = arith.cmpi eq, %497, %535 : vector<2x128xi32>
    %537 = arith.andi %501, %536 : vector<2x128xi1>
    %cst_272 = arith.constant 1.000000e+00 : f32
    %cst_273 = arith.constant 0.000000e+00 : f32
    %538 = vector.broadcast %cst_272 : f32 to vector<2x128xf32>
    %539 = vector.broadcast %cst_273 : f32 to vector<2x128xf32>
    %540 = arith.select %537, %538, %539 : vector<2x128xi1>, vector<2x128xf32>
    %541 = arith.maximumf %533, %540 : vector<2x128xf32>
    %c0_274 = arith.constant 0 : index
    %c5 = arith.constant 5 : index
    %542 = memref.load %arg2[%c0_274, %c5] : memref<3x6xi32, #tpu.memory_space<smem>>
    %543 = vector.broadcast %542 : i32 to vector<2x128xi32>
    %544 = arith.cmpi eq, %497, %543 : vector<2x128xi32>
    %545 = arith.andi %501, %544 : vector<2x128xi1>
    %cst_275 = arith.constant 1.000000e+00 : f32
    %cst_276 = arith.constant 0.000000e+00 : f32
    %546 = vector.broadcast %cst_275 : f32 to vector<2x128xf32>
    %547 = vector.broadcast %cst_276 : f32 to vector<2x128xf32>
    %548 = arith.select %545, %546, %547 : vector<2x128xi1>, vector<2x128xf32>
    %549 = arith.maximumf %541, %548 : vector<2x128xf32>
    %c1_i32_277 = arith.constant 1 : i32
    %550 = vector.broadcast %c1_i32_277 : i32 to vector<2x128xi32>
    %551 = arith.cmpi eq, %498, %550 : vector<2x128xi32>
    %c1_278 = arith.constant 1 : index
    %c0_279 = arith.constant 0 : index
    %552 = memref.load %arg2[%c1_278, %c0_279] : memref<3x6xi32, #tpu.memory_space<smem>>
    %553 = vector.broadcast %552 : i32 to vector<2x128xi32>
    %554 = arith.cmpi eq, %497, %553 : vector<2x128xi32>
    %555 = arith.andi %551, %554 : vector<2x128xi1>
    %cst_280 = arith.constant 1.000000e+00 : f32
    %cst_281 = arith.constant 0.000000e+00 : f32
    %556 = vector.broadcast %cst_280 : f32 to vector<2x128xf32>
    %557 = vector.broadcast %cst_281 : f32 to vector<2x128xf32>
    %558 = arith.select %555, %556, %557 : vector<2x128xi1>, vector<2x128xf32>
    %559 = arith.maximumf %549, %558 : vector<2x128xf32>
    %c1_282 = arith.constant 1 : index
    %c1_283 = arith.constant 1 : index
    %560 = memref.load %arg2[%c1_282, %c1_283] : memref<3x6xi32, #tpu.memory_space<smem>>
    %561 = vector.broadcast %560 : i32 to vector<2x128xi32>
    %562 = arith.cmpi eq, %497, %561 : vector<2x128xi32>
    %563 = arith.andi %551, %562 : vector<2x128xi1>
    %cst_284 = arith.constant 1.000000e+00 : f32
    %cst_285 = arith.constant 0.000000e+00 : f32
    %564 = vector.broadcast %cst_284 : f32 to vector<2x128xf32>
    %565 = vector.broadcast %cst_285 : f32 to vector<2x128xf32>
    %566 = arith.select %563, %564, %565 : vector<2x128xi1>, vector<2x128xf32>
    %567 = arith.maximumf %559, %566 : vector<2x128xf32>
    %c1_286 = arith.constant 1 : index
    %c2_287 = arith.constant 2 : index
    %568 = memref.load %arg2[%c1_286, %c2_287] : memref<3x6xi32, #tpu.memory_space<smem>>
    %569 = vector.broadcast %568 : i32 to vector<2x128xi32>
    %570 = arith.cmpi eq, %497, %569 : vector<2x128xi32>
    %571 = arith.andi %551, %570 : vector<2x128xi1>
    %cst_288 = arith.constant 1.000000e+00 : f32
    %cst_289 = arith.constant 0.000000e+00 : f32
    %572 = vector.broadcast %cst_288 : f32 to vector<2x128xf32>
    %573 = vector.broadcast %cst_289 : f32 to vector<2x128xf32>
    %574 = arith.select %571, %572, %573 : vector<2x128xi1>, vector<2x128xf32>
    %575 = arith.maximumf %567, %574 : vector<2x128xf32>
    %c1_290 = arith.constant 1 : index
    %c3_291 = arith.constant 3 : index
    %576 = memref.load %arg2[%c1_290, %c3_291] : memref<3x6xi32, #tpu.memory_space<smem>>
    %577 = vector.broadcast %576 : i32 to vector<2x128xi32>
    %578 = arith.cmpi eq, %497, %577 : vector<2x128xi32>
    %579 = arith.andi %551, %578 : vector<2x128xi1>
    %cst_292 = arith.constant 1.000000e+00 : f32
    %cst_293 = arith.constant 0.000000e+00 : f32
    %580 = vector.broadcast %cst_292 : f32 to vector<2x128xf32>
    %581 = vector.broadcast %cst_293 : f32 to vector<2x128xf32>
    %582 = arith.select %579, %580, %581 : vector<2x128xi1>, vector<2x128xf32>
    %583 = arith.maximumf %575, %582 : vector<2x128xf32>
    %c1_294 = arith.constant 1 : index
    %c4_295 = arith.constant 4 : index
    %584 = memref.load %arg2[%c1_294, %c4_295] : memref<3x6xi32, #tpu.memory_space<smem>>
    %585 = vector.broadcast %584 : i32 to vector<2x128xi32>
    %586 = arith.cmpi eq, %497, %585 : vector<2x128xi32>
    %587 = arith.andi %551, %586 : vector<2x128xi1>
    %cst_296 = arith.constant 1.000000e+00 : f32
    %cst_297 = arith.constant 0.000000e+00 : f32
    %588 = vector.broadcast %cst_296 : f32 to vector<2x128xf32>
    %589 = vector.broadcast %cst_297 : f32 to vector<2x128xf32>
    %590 = arith.select %587, %588, %589 : vector<2x128xi1>, vector<2x128xf32>
    %591 = arith.maximumf %583, %590 : vector<2x128xf32>
    %c1_298 = arith.constant 1 : index
    %c5_299 = arith.constant 5 : index
    %592 = memref.load %arg2[%c1_298, %c5_299] : memref<3x6xi32, #tpu.memory_space<smem>>
    %593 = vector.broadcast %592 : i32 to vector<2x128xi32>
    %594 = arith.cmpi eq, %497, %593 : vector<2x128xi32>
    %595 = arith.andi %551, %594 : vector<2x128xi1>
    %cst_300 = arith.constant 1.000000e+00 : f32
    %cst_301 = arith.constant 0.000000e+00 : f32
    %596 = vector.broadcast %cst_300 : f32 to vector<2x128xf32>
    %597 = vector.broadcast %cst_301 : f32 to vector<2x128xf32>
    %598 = arith.select %595, %596, %597 : vector<2x128xi1>, vector<2x128xf32>
    %599 = arith.maximumf %591, %598 : vector<2x128xf32>
    %cst_302 = arith.constant dense<0.000000e+00> : vector<1x128xf32>
    %600 = tpu.matmul %463, %496, %cst_302 {dimension_numbers = #tpu.dot_dimension_numbers<[1], [1], [0], [0], [0, 0, 1, 0], [], []>} : vector<1x64xf32>, vector<128x64xf32>, vector<1x128xf32> -> vector<1x128xf32>
    %cst_303 = arith.constant dense<0xFF800000> : vector<1xf32>
    %601 = vector.multi_reduction <maximumf>, %600, %cst_303 [1] : vector<1x128xf32> to vector<1xf32>
    %602 = vector.shape_cast %601 : vector<1xf32> to vector<1x1xf32>
    %603 = vector.broadcast %602 : vector<1x1xf32> to vector<1x128xf32>
    %604 = arith.subf %600, %603 : vector<1x128xf32>
    %605 = math.exp %604 : vector<1x128xf32>
    %cst_304 = arith.constant dense<0.000000e+00> : vector<1xf32>
    %606 = vector.multi_reduction <add>, %605, %cst_304 [1] : vector<1x128xf32> to vector<1xf32>
    %607 = vector.shape_cast %606 : vector<1xf32> to vector<1x1xf32>
    %608 = tpu.reciprocal %607 {approx = true} : vector<1x1xf32> -> vector<1x1xf32>
    %609 = vector.broadcast %608 : vector<1x1xf32> to vector<1x128xf32>
    %610 = arith.mulf %605, %609 : vector<1x128xf32>
    %cst_305 = arith.constant dense<0.000000e+00> : vector<1x64xf32>
    %611 = tpu.matmul %610, %496, %cst_305 {dimension_numbers = #tpu.dot_dimension_numbers<[1], [0], [0], [1], [0, 0, 1, 1], [], []>} : vector<1x128xf32>, vector<128x64xf32>, vector<1x64xf32> -> vector<1x64xf32>
    %cst_306 = arith.constant dense<0.000000e+00> : vector<1x2xf32>
    %612 = tpu.matmul %463, %464, %cst_306 {dimension_numbers = #tpu.dot_dimension_numbers<[1], [1], [0], [0], [0, 0, 1, 0], [], []>} : vector<1x64xf32>, vector<2x64xf32>, vector<1x2xf32> -> vector<1x2xf32>
    %cst_307 = arith.constant dense<0xFF800000> : vector<1xf32>
    %613 = vector.multi_reduction <maximumf>, %612, %cst_307 [1] : vector<1x2xf32> to vector<1xf32>
    %614 = vector.shape_cast %613 : vector<1xf32> to vector<1x1xf32>
    %615 = vector.broadcast %614 : vector<1x1xf32> to vector<1x2xf32>
    %616 = arith.subf %612, %615 : vector<1x2xf32>
    %617 = math.exp %616 : vector<1x2xf32>
    %cst_308 = arith.constant dense<0.000000e+00> : vector<1xf32>
    %618 = vector.multi_reduction <add>, %617, %cst_308 [1] : vector<1x2xf32> to vector<1xf32>
    %619 = vector.shape_cast %618 : vector<1xf32> to vector<1x1xf32>
    %620 = tpu.reciprocal %619 {approx = true} : vector<1x1xf32> -> vector<1x1xf32>
    %621 = vector.broadcast %620 : vector<1x1xf32> to vector<1x2xf32>
    %622 = arith.mulf %617, %621 : vector<1x2xf32>
    %cst_309 = arith.constant dense<0.000000e+00> : vector<1x128xf32>
    %623 = tpu.matmul %622, %599, %cst_309 {dimension_numbers = #tpu.dot_dimension_numbers<[1], [0], [0], [1], [0, 0, 1, 1], [], []>} : vector<1x2xf32>, vector<2x128xf32>, vector<1x128xf32> -> vector<1x128xf32>
    %cst_310 = arith.constant dense<0.000000e+00> : vector<1x64xf32>
    %624 = tpu.matmul %623, %496, %cst_310 {dimension_numbers = #tpu.dot_dimension_numbers<[1], [0], [0], [1], [0, 0, 1, 1], [], []>} : vector<1x128xf32>, vector<128x64xf32>, vector<1x64xf32> -> vector<1x64xf32>
    %cst_311 = arith.constant 0.000000e+00 : f32
    %625 = vector.broadcast %cst_311 : f32 to vector<1x64xf32>
    %626 = arith.maximumf %463, %625 : vector<1x64xf32>
    %cst_312 = arith.constant 0.000000e+00 : f32
    %627 = vector.broadcast %cst_312 : f32 to vector<1x64xf32>
    %628 = arith.maximumf %611, %627 : vector<1x64xf32>
    %cst_313 = arith.constant 0.000000e+00 : f32
    %629 = vector.broadcast %cst_313 : f32 to vector<1x64xf32>
    %630 = arith.maximumf %624, %629 : vector<1x64xf32>
    %c0_314 = arith.constant 0 : index
    %c0_315 = arith.constant 0 : index
    %631 = vector.load %arg26[%c0_314, %c0_315] : memref<192x128xf32, #tpu.memory_space<vmem>>, vector<64x128xf32>
    %cst_316 = arith.constant dense<0.000000e+00> : vector<1x128xf32>
    %632 = tpu.matmul %626, %631, %cst_316 {dimension_numbers = #tpu.dot_dimension_numbers<[1], [0], [0], [1], [0, 0, 1, 1], [], []>} : vector<1x64xf32>, vector<64x128xf32>, vector<1x128xf32> -> vector<1x128xf32>
    %c64 = arith.constant 64 : index
    %c0_317 = arith.constant 0 : index
    %633 = vector.load %arg26[%c64, %c0_317] : memref<192x128xf32, #tpu.memory_space<vmem>>, vector<64x128xf32>
    %cst_318 = arith.constant dense<0.000000e+00> : vector<1x128xf32>
    %634 = tpu.matmul %628, %633, %cst_318 {dimension_numbers = #tpu.dot_dimension_numbers<[1], [0], [0], [1], [0, 0, 1, 1], [], []>} : vector<1x64xf32>, vector<64x128xf32>, vector<1x128xf32> -> vector<1x128xf32>
    %635 = arith.addf %632, %634 : vector<1x128xf32>
    %c128_319 = arith.constant 128 : index
    %c0_320 = arith.constant 0 : index
    %636 = vector.load %arg26[%c128_319, %c0_320] : memref<192x128xf32, #tpu.memory_space<vmem>>, vector<64x128xf32>
    %cst_321 = arith.constant dense<0.000000e+00> : vector<1x128xf32>
    %637 = tpu.matmul %630, %636, %cst_321 {dimension_numbers = #tpu.dot_dimension_numbers<[1], [0], [0], [1], [0, 0, 1, 1], [], []>} : vector<1x64xf32>, vector<64x128xf32>, vector<1x128xf32> -> vector<1x128xf32>
    %638 = arith.addf %635, %637 : vector<1x128xf32>
    %c0_322 = arith.constant 0 : index
    %c0_323 = arith.constant 0 : index
    %639 = vector.load %arg27[%c0_322, %c0_323] : memref<1x128xf32, #tpu.memory_space<vmem>>, vector<1x128xf32>
    %640 = arith.addf %638, %639 : vector<1x128xf32>
    %cst_324 = arith.constant 0.000000e+00 : f32
    %641 = vector.broadcast %cst_324 : f32 to vector<1x128xf32>
    %642 = arith.maximumf %640, %641 : vector<1x128xf32>
    %c0_325 = arith.constant 0 : index
    %c0_326 = arith.constant 0 : index
    %643 = vector.load %arg28[%c0_325, %c0_326] : memref<128x128xf32, #tpu.memory_space<vmem>>, vector<128x128xf32>
    %cst_327 = arith.constant dense<0.000000e+00> : vector<1x128xf32>
    %644 = tpu.matmul %642, %643, %cst_327 {dimension_numbers = #tpu.dot_dimension_numbers<[1], [0], [0], [1], [0, 0, 1, 1], [], []>} : vector<1x128xf32>, vector<128x128xf32>, vector<1x128xf32> -> vector<1x128xf32>
    %c0_328 = arith.constant 0 : index
    %c0_329 = arith.constant 0 : index
    %645 = vector.load %arg29[%c0_328, %c0_329] : memref<1x128xf32, #tpu.memory_space<vmem>>, vector<1x128xf32>
    %646 = arith.addf %644, %645 : vector<1x128xf32>
    %c0_330 = arith.constant 0 : index
    %c0_331 = arith.constant 0 : index
    %647 = vector.load %arg30[%c0_330, %c0_331] : memref<1x128xf32, #tpu.memory_space<vmem>>, vector<1x128xf32>
    tpu.vector_store %arg30[%c0_330, %c0_331], %646 {strides = array<i32>} : memref<1x128xf32, #tpu.memory_space<vmem>>, vector<1x128xf32>,
    return
  }
}

</mosaic_0001>

<bundles_post_ra>
// kernel: tpu_custom_call.1
= control target key start
LH: loop header
LB: loop body
LE: loop exit
PB: predicated region body
PF: predicated region fallthrough
CT: control target
= control target key end

     0   :  { %s3598_s6 = smov 1   ;;  %s3599_s10 = smov 2   ;;  %s5387_s0 = inlined_call_operand.smem [shape: u32[31], index: -1, kind: input, shape index: {}] }
   0x1   :  { %s3657_s5 = sld [smem:[%s5387_s0]]   ;;  %s3600_s14 = smov 3  }
   0x2   :  { %s3662_s9 = sld [smem:[%s5387_s0 + %s3598_s6]]   ;;  %s3601_s18 = smov 4  }
   0x3   :  { %s3667_s13 = sld [smem:[%s5387_s0 + %s3599_s10]]   ;;  %s3602_s22 = smov 5  }
   0x4   :  { %s3672_s17 = sld [smem:[%s5387_s0 + %s3600_s14]]   ;;  %s3603_s26 = smov 6  }
   0x5   :  { %s3677_s21 = sld [smem:[%s5387_s0 + %s3601_s18]]   ;;  %s3604_s30 = smov 7  }
   0x6   :  { %s3682_s25 = sld [smem:[%s5387_s0 + %s3602_s22]]   ;;  %s3605_s4 = smov 8  }
   0x7   :  { %s3687_s29 = sld [smem:[%s5387_s0 + %s3603_s26]]   ;;  %s3606_s10 = smov 9  }
   0x8   :  { %s3692_s3 = sld [smem:[%s5387_s0 + %s3604_s30]]   ;;  %s3607_s15 = smov 10  }
   0x9   :  { %s3697_s8 = sld [smem:[%s5387_s0 + %s3605_s4]]   ;;  %s3608_s20 = smov 11  }
   0xa   :  { %5426 = sst [smem:[#allocation44_spill]] %s3672_s17  ;;  %s3609_s26 = smov 12  }
   0xb   :  { %s3702_s14 = sld [smem:[%s5387_s0 + %s3606_s10]]   ;;  %s3610_s1 = smov 13  }
   0xc   :  { %s3707_s19 = sld [smem:[%s5387_s0 + %s3607_s15]]   ;;  %s3611_s7 = smov 14  }
   0xd   :  { %5427 = sst [smem:[#allocation45_spill]] %s3687_s29  ;;  %s3612_s15 = smov 15  }
   0xe   :  { %5428 = sst [smem:[#allocation46_spill]] %s3692_s3  ;;  %s3613_s22 = smov 16  }
   0xf   :  { %5429 = sst [smem:[#allocation47_spill]] %s3697_s8  ;;  %s3614_s28 = smov 17  }
  0x10   :  { %s3712_s24 = sld [smem:[%s5387_s0 + %s3608_s20]]  }
  0x11   :  { %5430 = sst [smem:[#allocation48_spill]] %s3702_s14 }
  0x12   :  { %s3717_s30 = sld [smem:[%s5387_s0 + %s3609_s26]]  }
  0x13   :  { %s3722_s6 = sld [smem:[%s5387_s0 + %s3610_s1]]  }
  0x14   :  { %s3727_s12 = sld [smem:[%s5387_s0 + %s3611_s7]]   ;;  %s3615_s7 = smov 18  }
  0x15   :  { %s3732_s20 = sld [smem:[%s5387_s0 + %s3612_s15]]   ;;  %s3616_s15 = smov 19  }
  0x16   :  { %s3737_s27 = sld [smem:[%s5387_s0 + %s3613_s22]]   ;;  %s3617_s22 = smov 20  }
  0x17   :  { %s3742_s4 = sld [smem:[%s5387_s0 + %s3614_s28]]   ;;  %s3618_s28 = smov 21  }
  0x18   :  { %s3747_s17 = sld [smem:[%s5387_s0 + %s3615_s7]]   ;;  %s3619_s7 = smov 22  }
  0x1a   :  { %5431 = sst [smem:[#allocation49_spill]] %s3727_s12 }
  0x1b   :  { %5432 = sst [smem:[#allocation50_spill]] %s3732_s20 }
  0x1c   :  { %s3752_s20 = sld [smem:[%s5387_s0 + %s3616_s15]]   ;;  %s3620_s15 = smov 23  }
  0x1d   :  { %5433 = sst [smem:[#allocation51_spill]] %s3742_s4 }
  0x1e   :  { %5434 = sst [smem:[#allocation52_spill]] %s3747_s17 }
  0x1f   :  { %s3757_s12 = sld [smem:[%s5387_s0 + %s3617_s22]]   ;;  %s3621_s22 = smov 24  }
  0x20   :  { %s3762_s4 = sld [smem:[%s5387_s0 + %s3618_s28]]   ;;  %s3622_s28 = smov 25  }
  0x21   :  { %s3767_s17 = sld [smem:[%s5387_s0 + %s3619_s7]]   ;;  %s3623_s7 = smov 26  }
  0x22   :  { %s3772_s14 = sld [smem:[%s5387_s0 + %s3620_s15]]   ;;  %s3624_s15 = smov 27  }
  0x23   :  { %s3782_s8 = sld [smem:[%s5387_s0 + %s3622_s28]]   ;;  %s3626_s28 = smov 29  }
  0x25   :  { %5435 = sst [smem:[#allocation53_spill]] %s3757_s12 }
  0x26   :  { %s3777_s12 = sld [smem:[%s5387_s0 + %s3621_s22]]   ;;  %s3625_s22 = smov 28  }
  0x27   :  { %5436 = sst [smem:[#allocation54_spill]] %s3767_s17 }
  0x28   :  { %5437 = sst [smem:[#allocation55_spill]] %s3772_s14 }
  0x29   :  { %5438 = sst [smem:[#allocation56_spill]] %s3782_s8 }
  0x2a   :  { %s3787_s17 = sld [smem:[%s5387_s0 + %s3623_s7]]   ;;  %s3627_s7 = smov 30  }
  0x2b   :  { %s3792_s14 = sld [smem:[%s5387_s0 + %s3624_s15]]  }
  0x2c   :  { %s3797_s3 = sld [smem:[%s5387_s0 + %s3625_s22]]  }
  0x2d   :  { %s3802_s8 = sld [smem:[%s5387_s0 + %s3626_s28]]  }
  0x2e   :  { %s3807_s29 = sld [smem:[%s5387_s0 + %s3627_s7]]  }
  0x2f   :  { %67 = vsyncpa [#allocation11], 0 }
  0x30   :  { %68 = vsyncpa [#allocation13], 0 }
  0x31   :  { %69 = vsyncpa [#allocation9], 0 }
  0x32   :  { %70 = vsyncpa [#allocation17], 0 }
  0x33   :  { %71 = vsyncpa [#allocation20], 0 }
  0x34   :  { %72 = vsyncpa [#allocation23], 0 }
  0x35   :  { %73 = vsyncpa [#allocation26], 0 }
  0x36   :  { %74 = vsyncpa [#allocation29], 0 }
  0x37   :  { %75 = vsyncpa [#allocation32], 0  ;;  %s91_s15 = sshll.u32 %s3662_s9, 4  ;;  %s92_s15 = int_to_ptr.hbm [resolvable:$true] %s91_s15 }
  0x38   :  { %76 = vsyncpa [#allocation10], 0  ;;  %s3230_s16 = sshra.s32 %s92_s15, 4  ;;  %s3234_s0 = scalar_lea.hbm %s3662_s9, 4  ;;  %s3231_s16 = int_to_ptr.hbm [resolvable:$true] %s3230_s16 }
  0x39   :  { %s3232_s18 = scalar_lea.hbm %s3231_s16, 4  ;;  %p3235_p1 = scmp.lt.s32.totalorder %s3231_s16, %s3662_s9 }
  0x3a   :  { %p3233_p0 = scmp.ne.s32.totalorder %s3231_s16, %s3232_s18  ;;  %p3236_p2 = scmp.lt.s32.totalorder %s3234_s0, %s3232_s18 }
  0x3c   :  { %p3237_p3 = por %p3236_p2, %p3235_p1 }
  0x3e   :  { %p3238_p4 = pnand %p3237_p3, %p3233_p0 }
  0x40   :  { %3241 = shalt.err (!%p3238_p4)
}
  0x41   :  { %s3628_s22 = smov [#allocation12]   ;;  %s123_s23 = sshll.u32 %s3682_s25, 4  ;;  %s124_s23 = int_to_ptr.hbm [resolvable:$true] %s123_s23 }
  0x42   :  { %94 = dma.hbm_to_smem %s92_s15, 64, %s3628_s22, [#allocation13]  }
  0x43   :  { %s3629_s26 = smov [#allocation16]   ;;  %s3242_s1 = sshra.s32 %s124_s23, 4  ;;  %s3243_s1 = int_to_ptr.hbm [resolvable:$true] %s3242_s1 }
  0x44   :  { %s125_s28 = sshll.u32 %s3629_s26, 4  ;;  %s3244_s2 = scalar_lea.hbm %s3243_s1, 64  ;;  %s126_s28 = int_to_ptr.vmem [resolvable:$true] %s125_s28 }
  0x45   :  { %p3245_p5 = scmp.ne.s32.totalorder %s3243_s1, %s3244_s2  ;;  %s3246_s7 = scalar_lea.hbm %s3682_s25, 64 }
  0x46   :  { %p3247_p6 = scmp.lt.s32.totalorder %s3243_s1, %s3682_s25  ;;  %p3248_p7 = scmp.lt.s32.totalorder %s3246_s7, %s3244_s2 }
  0x48   :  { %p3249_p8 = por %p3248_p7, %p3247_p6 }
  0x4a   :  { %p3250_p9 = pnand %p3249_p8, %p3245_p5 }
  0x4c   :  { %3253 = shalt.err (!%p3250_p9)
}
  0x4d   :  { %s3630_s9 = smov 128   ;;  %s3631_s10 = smov 8  }
  0x4e   :  { %131 = dma.hbm_to_vmem [thread:$0]  %s124_s23, 1024, %s126_s28, [#allocation17], %s3630_s9, %s3630_s9, %s3631_s10  }
  0x4f   :  { %s157_s11 = sshll.u32 %s3712_s24, 4  ;;  %s3632_s15 = smov [#allocation19]   ;;  %s158_s11 = int_to_ptr.hbm [resolvable:$true] %s157_s11 }
  0x50   :  { %s159_s16 = sshll.u32 %s3632_s15, 4  ;;  %s182_s25 = sshll.u32 %s3722_s6, 4  ;;  %s160_s16 = int_to_ptr.vmem [resolvable:$true] %s159_s16  ;;  %s183_s25 = int_to_ptr.hbm [resolvable:$true] %s182_s25 }
  0x51   :  { %s3266_s18 = sshra.s32 %s158_s11, 4  ;;  %s3270_s22 = scalar_lea.hbm %s3712_s24, 384  ;;  %s3267_s18 = int_to_ptr.hbm [resolvable:$true] %s3266_s18 }
  0x52   :  { %s3268_s0 = scalar_lea.hbm %s3267_s18, 384  ;;  %p3271_p11 = scmp.lt.s32.totalorder %s3267_s18, %s3712_s24 }
  0x53   :  { %p3269_p10 = scmp.ne.s32.totalorder %s3267_s18, %s3268_s0  ;;  %p3272_p12 = scmp.lt.s32.totalorder %s3270_s22, %s3268_s0 }
  0x55   :  { %p3273_p13 = por %p3272_p12, %p3271_p11 }
  0x57   :  { %p3274_p0 = pnand %p3273_p13, %p3269_p10 }
  0x59   :  { %3277 = shalt.err (!%p3274_p0)
}
  0x5a   :  { %s3633_s26 = smov 384   ;;  %s3634_s23 = smov 24  }
  0x5b   :  { %165 = dma.hbm_to_vmem [thread:$0]  %s158_s11, 6144, %s160_s16, [#allocation20], %s3633_s26, %s3633_s26, %s3634_s23  }
  0x5c   :  { %s3635_s28 = smov [#allocation22]   ;;  %s213_s2 = sshll.u32 %s3752_s20, 4  ;;  %s3826_s2 = int_to_ptr.hbm [resolvable:$true] %s213_s2 }
  0x5d   :  { %s184_s1 = sshll.u32 %s3635_s28, 4  ;;  %s3290_s24 = sshra.s32 %s183_s25, 4  ;;  %s185_s1 = int_to_ptr.vmem [resolvable:$true] %s184_s1  ;;  %s3291_s24 = int_to_ptr.hbm [resolvable:$true] %s3290_s24 }
  0x5e   :  { %s3292_s7 = scalar_lea.hbm %s3291_s24, 3  ;;  %s3294_s15 = scalar_lea.hbm %s3722_s6, 3 }
  0x5f   :  { %p3293_p1 = scmp.ne.s32.totalorder %s3291_s24, %s3292_s7  ;;  %p3295_p2 = scmp.lt.s32.totalorder %s3291_s24, %s3722_s6 }
  0x60   :  { %p3296_p3 = scmp.lt.s32.totalorder %s3294_s15, %s3292_s7 }
  0x62   :  { %p3297_p4 = por %p3296_p3, %p3295_p2 }
  0x64   :  { %p3298_p5 = pnand %p3297_p4, %p3293_p1 }
  0x66   :  { %3301 = shalt.err (!%p3298_p5)
}
  0x67   :  { %187 = dma.hbm_to_vmem [thread:$0]  %s183_s25, 48, %s185_s1, [#allocation23]  }
  0x68   :  { %s245_s11 = sshll.u32 %s3777_s12, 4  ;;  %s3636_s16 = smov [#allocation25]   ;;  %s3831_s11 = int_to_ptr.hbm [resolvable:$true] %s245_s11 }
  0x69   :  { %s215_s18 = sshll.u32 %s3636_s16, 4  ;;  %s3314_s0 = sshra.s32 %s3826_s2, 4  ;;  %s216_s18 = int_to_ptr.vmem [resolvable:$true] %s215_s18  ;;  %s3315_s0 = int_to_ptr.hbm [resolvable:$true] %s3314_s0 }
  0x6a   :  { %s3316_s22 = scalar_lea.hbm %s3315_s0, 64  ;;  %s3318_s6 = scalar_lea.hbm %s3752_s20, 64 }
  0x6b   :  { %p3317_p6 = scmp.ne.s32.totalorder %s3315_s0, %s3316_s22  ;;  %p3319_p7 = scmp.lt.s32.totalorder %s3315_s0, %s3752_s20 }
  0x6c   :  { %p3320_p8 = scmp.lt.s32.totalorder %s3318_s6, %s3316_s22 }
  0x6e   :  { %p3321_p9 = por %p3320_p8, %p3319_p7 }
  0x70   :  { %p3322_p10 = pnand %p3321_p9, %p3317_p6 }
  0x72   :  { %3325 = shalt.err (!%p3322_p10)
}
  0x73   :  { %221 = dma.hbm_to_vmem [thread:$0]  %s3826_s2, 1024, %s216_s18, [#allocation26], %s3630_s9, %s3630_s9, %s3631_s10  }
  0x74   :  { %s3637_s25 = smov [#allocation28]   ;;  %s82_s1 = sshll.u32 %s3657_s5, 4  ;;  %s83_s1 = int_to_ptr.hbm [resolvable:$true] %s82_s1 }
  0x75   :  { %s247_s28 = sshll.u32 %s3637_s25, 4  ;;  %s3338_s24 = sshra.s32 %s3831_s11, 4  ;;  %s248_s28 = int_to_ptr.vmem [resolvable:$true] %s247_s28  ;;  %s3339_s24 = int_to_ptr.hbm [resolvable:$true] %s3338_s24 }
  0x76   :  { %s3340_s20 = scalar_lea.hbm %s3339_s24, 64  ;;  %s3342_s7 = scalar_lea.hbm %s3777_s12, 64 }
  0x77   :  { %p3341_p11 = scmp.ne.s32.totalorder %s3339_s24, %s3340_s20  ;;  %p3343_p12 = scmp.lt.s32.totalorder %s3339_s24, %s3777_s12 }
  0x78   :  { %p3344_p13 = scmp.lt.s32.totalorder %s3342_s7, %s3340_s20 }
  0x7a   :  { %p3345_p0 = por %p3344_p13, %p3343_p12 }
  0x7c   :  { %p3346_p1 = pnand %p3345_p0, %p3341_p11 }
  0x7e   :  { %3349 = shalt.err (!%p3346_p1)
}
  0x7f   :  { %253 = dma.hbm_to_vmem [thread:$0]  %s3831_s11, 1024, %s248_s28, [#allocation29], %s3630_s9, %s3630_s9, %s3631_s10  }
  0x80   :  { %s100_s2 = sshll.u32 %s3667_s13, 4  ;;  %s3362_s15 = sshra.s32 %s83_s1, 4  ;;  %s3363_s15 = int_to_ptr.hbm [resolvable:$true] %s3362_s15  ;;  %s101_s2 = int_to_ptr.hbm [resolvable:$true] %s100_s2 }
  0x81   :  { %s3364_s16 = scalar_lea.hbm %s3363_s15, 4  ;;  %s3366_s18 = scalar_lea.hbm %s3657_s5, 4 }
  0x82   :  { %p3365_p2 = scmp.ne.s32.totalorder %s3363_s15, %s3364_s16  ;;  %p3367_p3 = scmp.lt.s32.totalorder %s3363_s15, %s3657_s5 }
  0x83   :  { %p3368_p4 = scmp.lt.s32.totalorder %s3366_s18, %s3364_s16 }
  0x85   :  { %p3369_p5 = por %p3368_p4, %p3367_p3 }
  0x87   :  { %p3370_p6 = pnand %p3369_p5, %p3365_p2 }
  0x89   :  { %3373 = shalt.err (!%p3370_p6)
}
  0x8a   :  { %s3638_s12 = smov [#allocation8]   ;;  %s3374_s0 = sshra.s32 %s101_s2, 4  ;;  %s3375_s0 = int_to_ptr.hbm [resolvable:$true] %s3374_s0 }
  0x8b   :  { %85 = dma.hbm_to_smem %s83_s1, 64, %s3638_s12, [#allocation11]  }
  0x8c   :  { %s3376_s22 = scalar_lea.hbm %s3375_s0, 4  ;;  %s3378_s11 = scalar_lea.hbm %s3667_s13, 4 }
  0x8d   :  { %p3377_p7 = scmp.ne.s32.totalorder %s3375_s0, %s3376_s22  ;;  %p3379_p8 = scmp.lt.s32.totalorder %s3375_s0, %s3667_s13 }
  0x8e   :  { %p3380_p9 = scmp.lt.s32.totalorder %s3378_s11, %s3376_s22 }
  0x90   :  { %p3381_p10 = por %p3380_p9, %p3379_p8 }
  0x92   :  { %p3382_p11 = pnand %p3381_p10, %p3377_p7 }
  0x94   :  { %3385 = shalt.err (!%p3382_p11)
}
  0x95   :  { %s3639_s5 = smov [#allocation14]   ;;  %s110_s6 = sshll.u32 %s3677_s21, 4  ;;  %s111_s6 = int_to_ptr.hbm [resolvable:$true] %s110_s6 }
  0x96   :  { %103 = dma.hbm_to_smem %s101_s2, 64, %s3639_s5, [#allocation13]  }
  0x97   :  { %s3640_s25 = smov [#allocation15]   ;;  %s144_s1 = sshll.u32 %s3707_s19, 4  ;;  %s145_s1 = int_to_ptr.hbm [resolvable:$true] %s144_s1 }
  0x98   :  { %s112_s28 = sshll.u32 %s3640_s25, 4  ;;  %s3386_s24 = sshra.s32 %s111_s6, 4  ;;  %s113_s28 = int_to_ptr.vmem [resolvable:$true] %s112_s28  ;;  %s3387_s24 = int_to_ptr.hbm [resolvable:$true] %s3386_s24 }
  0x99   :  { %s3388_s20 = scalar_lea.hbm %s3387_s24, 64  ;;  %s3390_s13 = scalar_lea.hbm %s3677_s21, 64 }
  0x9a   :  { %p3389_p12 = scmp.ne.s32.totalorder %s3387_s24, %s3388_s20  ;;  %p3391_p13 = scmp.lt.s32.totalorder %s3387_s24, %s3677_s21 }
  0x9b   :  { %p3392_p0 = scmp.lt.s32.totalorder %s3390_s13, %s3388_s20 }
  0x9d   :  { %p3393_p1 = por %p3392_p0, %p3391_p13 }
  0x9f   :  { %p3394_p2 = pnand %p3393_p1, %p3389_p12 }
  0xa1   :  { %3397 = shalt.err (!%p3394_p2)
}
  0xa2   :  { %118 = dma.hbm_to_vmem [thread:$0]  %s111_s6, 1024, %s113_s28, [#allocation9], %s3630_s9, %s3630_s9, %s3631_s10  }
  0xa3   :  { %s3641_s7 = smov [#allocation18]   ;;  %s171_s15 = sshll.u32 %s3717_s30, 4  ;;  %s172_s15 = int_to_ptr.hbm [resolvable:$true] %s171_s15 }
  0xa4   :  { %s146_s2 = sshll.u32 %s3641_s7, 4  ;;  %s3410_s16 = sshra.s32 %s145_s1, 4  ;;  %s147_s2 = int_to_ptr.vmem [resolvable:$true] %s146_s2  ;;  %s3411_s16 = int_to_ptr.hbm [resolvable:$true] %s3410_s16 }
  0xa5   :  { %s3412_s21 = scalar_lea.hbm %s3411_s16, 192  ;;  %s3414_s18 = scalar_lea.hbm %s3707_s19, 192 }
  0xa6   :  { %p3413_p3 = scmp.ne.s32.totalorder %s3411_s16, %s3412_s21  ;;  %p3415_p4 = scmp.lt.s32.totalorder %s3411_s16, %s3707_s19 }
  0xa7   :  { %p3416_p5 = scmp.lt.s32.totalorder %s3414_s18, %s3412_s21 }
  0xa9   :  { %p3417_p6 = por %p3416_p5, %p3415_p4 }
  0xab   :  { %p3418_p7 = pnand %p3417_p6, %p3413_p3 }
  0xad   :  { %3421 = shalt.err (!%p3418_p7)
}
  0xae   :  { %152 = dma.hbm_to_vmem [thread:$0]  %s145_s1, 3072, %s147_s2, [#allocation17], %s3633_s26, %s3633_s26, %s3634_s23  }
  0xaf   :  { %s196_s12 = sshll.u32 %s3737_s27, 4  ;;  %s3642_s0 = smov [#allocation21]   ;;  %s3867_s12 = int_to_ptr.hbm [resolvable:$true] %s196_s12 }
  0xb0   :  { %s173_s22 = sshll.u32 %s3642_s0, 4  ;;  %s3434_s11 = sshra.s32 %s172_s15, 4  ;;  %s174_s22 = int_to_ptr.vmem [resolvable:$true] %s173_s22  ;;  %s3435_s11 = int_to_ptr.hbm [resolvable:$true] %s3434_s11 }
  0xb1   :  { %s3436_s19 = scalar_lea.hbm %s3435_s11, 3  ;;  %s3438_s5 = scalar_lea.hbm %s3717_s30, 3 }
  0xb2   :  { %p3437_p8 = scmp.ne.s32.totalorder %s3435_s11, %s3436_s19  ;;  %p3439_p9 = scmp.lt.s32.totalorder %s3435_s11, %s3717_s30 }
  0xb3   :  { %p3440_p10 = scmp.lt.s32.totalorder %s3438_s5, %s3436_s19 }
  0xb5   :  { %p3441_p11 = por %p3440_p10, %p3439_p9 }
  0xb7   :  { %p3442_p12 = pnand %p3441_p11, %p3437_p8 }
  0xb9   :  { %3445 = shalt.err (!%p3442_p12)
}
  0xba   :  { %176 = dma.hbm_to_vmem [thread:$0]  %s172_s15, 48, %s174_s22, [#allocation20]  }
  0xbb   :  { %s3643_s26 = smov [#allocation24]   ;;  %s228_s6 = sshll.u32 %s3762_s4, 4  ;;  %s3872_s6 = int_to_ptr.hbm [resolvable:$true] %s228_s6 }
  0xbc   :  { %s198_s23 = sshll.u32 %s3643_s26, 4  ;;  %s3458_s25 = sshra.s32 %s3867_s12, 4  ;;  %s199_s23 = int_to_ptr.vmem [resolvable:$true] %s198_s23  ;;  %s3459_s25 = int_to_ptr.hbm [resolvable:$true] %s3458_s25 }
  0xbd   :  { %s3460_s28 = scalar_lea.hbm %s3459_s25, 128  ;;  %s3462_s30 = scalar_lea.hbm %s3737_s27, 128 }
  0xbe   :  { %p3461_p13 = scmp.ne.s32.totalorder %s3459_s25, %s3460_s28  ;;  %p3463_p0 = scmp.lt.s32.totalorder %s3459_s25, %s3737_s27 }
  0xbf   :  { %p3464_p1 = scmp.lt.s32.totalorder %s3462_s30, %s3460_s28 }
  0xc1   :  { %p3465_p2 = por %p3464_p1, %p3463_p0 }
  0xc3   :  { %p3466_p3 = pnand %p3465_p2, %p3461_p13 }
  0xc5   :  { %3469 = shalt.err (!%p3466_p3)
}
  0xc6   :  { %204 = dma.hbm_to_vmem [thread:$0]  %s3867_s12, 2048, %s199_s23, [#allocation23], %s3630_s9, %s3630_s9, %s3631_s10  }
  0xc7   :  { %s260_s1 = sshll.u32 %s3787_s17, 4  ;;  %s3644_s24 = smov [#allocation27]   ;;  %s3882_s1 = int_to_ptr.hbm [resolvable:$true] %s260_s1 }
  0xc8   :  { %s230_s20 = sshll.u32 %s3644_s24, 4  ;;  %s3482_s27 = sshra.s32 %s3872_s6, 4  ;;  %s231_s20 = int_to_ptr.vmem [resolvable:$true] %s230_s20  ;;  %s3483_s27 = int_to_ptr.hbm [resolvable:$true] %s3482_s27 }
  0xc9   :  { %s3484_s13 = scalar_lea.hbm %s3483_s27, 128  ;;  %s3486_s7 = scalar_lea.hbm %s3762_s4, 128 }
  0xca   :  { %p3485_p4 = scmp.ne.s32.totalorder %s3483_s27, %s3484_s13  ;;  %p3487_p5 = scmp.lt.s32.totalorder %s3483_s27, %s3762_s4 }
  0xcb   :  { %p3488_p6 = scmp.lt.s32.totalorder %s3486_s7, %s3484_s13 }
  0xcd   :  { %p3489_p7 = por %p3488_p6, %p3487_p5 }
  0xcf   :  { %p3490_p8 = pnand %p3489_p7, %p3485_p4 }
  0xd1   :  { %3493 = shalt.err (!%p3490_p8)
}
  0xd2   :  { %236 = dma.hbm_to_vmem [thread:$0]  %s3872_s6, 2048, %s231_s20, [#allocation26], %s3630_s9, %s3630_s9, %s3631_s10  }
  0xd3   :  { %s3645_s2 = smov [#allocation30]   ;;  %s275_s16 = sshll.u32 %s3797_s3, 4  ;;  %s276_s16 = int_to_ptr.hbm [resolvable:$true] %s275_s16 }
  0xd4   :  { %s262_s15 = sshll.u32 %s3645_s2, 4  ;;  %s3506_s21 = sshra.s32 %s3882_s1, 4  ;;  %s263_s15 = int_to_ptr.vmem [resolvable:$true] %s262_s15  ;;  %s3507_s21 = int_to_ptr.hbm [resolvable:$true] %s3506_s21 }
  0xd5   :  { %s3508_s4 = scalar_lea.hbm %s3507_s21, 192  ;;  %s3510_s18 = scalar_lea.hbm %s3787_s17, 192 }
  0xd6   :  { %p3509_p9 = scmp.ne.s32.totalorder %s3507_s21, %s3508_s4  ;;  %p3511_p10 = scmp.lt.s32.totalorder %s3507_s21, %s3787_s17 }
  0xd7   :  { %p3512_p11 = scmp.lt.s32.totalorder %s3510_s18, %s3508_s4 }
  0xd9   :  { %p3513_p12 = por %p3512_p11, %p3511_p10 }
  0xdb   :  { %p3514_p13 = pnand %p3513_p12, %p3509_p9 }
  0xdd   :  { %3517 = shalt.err (!%p3514_p13)
}
  0xde   :  { %268 = dma.hbm_to_vmem [thread:$0]  %s3882_s1, 3072, %s263_s15, [#allocation29], %s3630_s9, %s3630_s9, %s3631_s10  }
  0xdf   :  { %s3646_s12 = smov [#allocation31]   ;;  %s3530_s22 = sshra.s32 %s276_s16, 4  ;;  %s3531_s22 = int_to_ptr.hbm [resolvable:$true] %s3530_s22 }
  0xe0   :  { %s277_s0 = sshll.u32 %s3646_s12, 4  ;;  %s3532_s11 = scalar_lea.hbm %s3531_s22, 128  ;;  %s278_s0 = int_to_ptr.vmem [resolvable:$true] %s277_s0 }
  0xe1   :  { %p3533_p0 = scmp.ne.s32.totalorder %s3531_s22, %s3532_s11  ;;  %s3534_s17 = scalar_lea.hbm %s3797_s3, 128 }
  0xe2   :  { %p3535_p1 = scmp.lt.s32.totalorder %s3531_s22, %s3797_s3  ;;  %p3536_p2 = scmp.lt.s32.totalorder %s3534_s17, %s3532_s11 }
  0xe4   :  { %p3537_p3 = por %p3536_p2, %p3535_p1 }
  0xe6   :  { %p3538_p4 = pnand %p3537_p3, %p3533_p0 }
  0xe8   :  { %3541 = shalt.err (!%p3538_p4)
}
  0xe9   :  { %283 = dma.hbm_to_vmem [thread:$0]  %s276_s16, 2048, %s278_s0, [#allocation32], %s3630_s9, %s3630_s9, %s3631_s10  }
  0xea   :  { %3578 = dma.done.wait [#allocation11], 64  }
  0xeb   :  { %3579 = vsyncadd [#allocation11], 4294967232 }
  0xec   :  { %3580 = dma.done.wait [#allocation13], 128  }
  0xed   :  { %3581 = vsyncadd [#allocation13], 4294967168 }
  0xee   :  { %3582 = dma.done.wait [#allocation9], 1024  }
  0xef   :  { %3583 = vsyncadd [#allocation9], 4294966272 }
  0xf0   :  { %3584 = dma.done.wait [#allocation17], 4096  }
  0xf1   :  { %3585 = vsyncadd [#allocation17], 4294963200 }
  0xf2   :  { %3586 = dma.done.wait [#allocation20], 6192  }
  0xf3   :  { %3587 = vsyncadd [#allocation20], 4294961104 }
  0xf4   :  { %3588 = dma.done.wait [#allocation23], 2096  }
  0xf5   :  { %3589 = vsyncadd [#allocation23], 4294965200 }
  0xf6   :  { %3590 = dma.done.wait [#allocation26], 3072  }
  0xf7   :  { %3591 = vsyncadd [#allocation26], 4294964224 }
  0xf8   :  { %3592 = dma.done.wait [#allocation29], 4096  }
  0xf9   :  { %3593 = vsyncadd [#allocation29], 4294963200 }
  0xfa   :  { %3594 = dma.done.wait [#allocation32], 2048  }
  0xfb   :  { %3595 = vsyncadd [#allocation32], 4294965248 }
  0xfc   :  { %346 = sfence }
  0xfd   :  { %v523_v0 = vld [vmem:[#allocation15 + $0x38] sm:$0xff]  ;;  %v522_v1 = vld [vmem:[#allocation15 + $0x30] sm:$0xff]  ;;  %v347_v3 = vlaneseq  ;;  %s352_s3 = sld [smem:[#allocation8]]  ;;  %v521_v5 = vld [vmem:[#allocation15 + $0x28] sm:$0xff]  ;;  %v5394_v17 = vmov 0.0  }
  0xfe   :  { %v556_v2 = vld [vmem:[#allocation16 + $0x38] sm:$0xff]  ;;  %536 = vmatpush.msra.mxu0 %v523_v0  ;;  %v555_v4 = vld [vmem:[#allocation16 + $0x30] sm:$0xff]  ;;  %s2994_s9 = sld [smem:[#allocation8 + $0x1]]  ;;  %v554_v6 = vld [vmem:[#allocation16 + $0x28] sm:$0xff] }
  0xff   :  { %568 = vmatpush.msra.mxu3 %v556_v2  ;;  %v3904_v7 = vshrl.u32 %v347_v3, 7  ;;  %v3906_v8 = vand.u32 127, %v347_v3  ;;  %s3908_s10 = sld [smem:[#allocation8 + $0x2]]  ;;  %v520_v9 = vld [vmem:[#allocation15 + $0x20] sm:$0xff]  ;;  %v519_v11 = vld [vmem:[#allocation15 + $0x18] sm:$0xff]  ;;  %v518_v14 = vld [vmem:[#allocation15 + $0x10] sm:$0xff] }
 0x100   :  { %537 = vmatpush.msra.mxu0 %v522_v1  ;;  %v553_v10 = vld [vmem:[#allocation16 + $0x20] sm:$0xff]  ;;  %s3910_s19 = sld [smem:[#allocation8 + $0x3]]  ;;  %v552_v12 = vld [vmem:[#allocation16 + $0x18] sm:$0xff]  ;;  %v551_v15 = vld [vmem:[#allocation16 + $0x10] sm:$0xff] }
 0x101   :  { %5439 = vst [vmem:[#allocation57_spill] sm:$0xff] %v3904_v7  ;;  %569 = vmatpush.msra.mxu3 %v555_v4  ;;  %vm351_vm0 = vcmp.eq.s32.totalorder %v3904_v7, 0  ;;  %s3913_s5 = sld [smem:[#allocation8 + $0x4]]  ;;  %v517_v20 = vld [vmem:[#allocation15 + $0x8] sm:$0xff]  ;;  %vm382_vm8 = vcmp.eq.s32.totalorder %v3904_v7, 1  ;;  %v516_v26 = vld [vmem:[#allocation15] sm:$0xff] }
 0x102   :  { %5440 = vst [vmem:[#allocation58_spill] sm:$0xff] %v3906_v8  ;;  %538 = vmatpush.msra.mxu0 %v521_v5  ;;  %s3915_s26 = sld [smem:[#allocation8 + $0x80]]  ;;  %v550_v21 = vld [vmem:[#allocation16 + $0x8] sm:$0xff]  ;;  %v549_v29 = vld [vmem:[#allocation16] sm:$0xff]  ;;  %v702_v60 = vld [vmem:[#allocation18 + $0x90] sm:$0xff] }
 0x103   :  { %570 = vmatpush.msra.mxu3 %v554_v6  ;;  %v353_v13 = vstv %s352_s3  ;;  %s3918_s23 = sld [smem:[#allocation8 + $0x81]]  ;;  %v705_v54 = vld [vmem:[#allocation18 + $0xa8] sm:$0xff]  ;;  %v699_v5 = vld [vmem:[#allocation18 + $0x78] sm:$0xff] }
 0x104   :  { %539 = vmatpush.msra.mxu0 %v520_v9  ;;  %vm354_vm1 = vcmp.eq.s32.totalorder %v3906_v8, %v353_v13  ;;  %v359_v16 = vstv %s2994_s9  ;;  %s3923_s6 = sld [smem:[#allocation8 + $0x82]]  ;;  %727 = vmatpush.msra.mxu1 %v705_v54  ;;  %v4324_v9 = vld [vmem:[#allocation19 + $0x38] sm:$0xff] }
 0x105   :  { %571 = vmatpush.msra.mxu3 %v553_v10  ;;  %vm355_vm2 = vmand %vm351_vm0, %vm354_vm1  ;;  %vm360_vm3 = vcmp.eq.s32.totalorder %v3906_v8, %v359_v16  ;;  %v365_v19 = vstv %s3908_s10  ;;  %s3929_s25 = sld [smem:[#allocation8 + $0x83]]  ;;  %5490 = vst [vmem:[#allocation72_spill] sm:$0xff] %v4324_v9 }
 0x106   :  { %540 = vmatpush.msra.mxu0 %v519_v11  ;;  %v356_v18 = vsel %vm355_vm2, 1.0, %v5394_v17  ;;  %vm361_vm4 = vmand %vm351_vm0, %vm360_vm3  ;;  %vm366_vm5 = vcmp.eq.s32.totalorder %v3906_v8, %v365_v19  ;;  %v371_v23 = vstv %s3910_s19  ;;  %s3934_s28 = sld [smem:[#allocation8 + $0x84]]  ;;  %728 = vmatpush.msra.mxu1 %v702_v60 }
 0x107   :  { %572 = vmatpush.msra.mxu3 %v552_v12  ;;  %v362_v22 = vsel %vm361_vm4, 1.0, %v5394_v17  ;;  %vm367_vm6 = vmand %vm351_vm0, %vm366_vm5  ;;  %vm372_vm7 = vcmp.eq.s32.totalorder %v3906_v8, %v371_v23  ;;  %v377_v25 = vstv %s3913_s5  ;;  %s3941_s30 = sld [smem:[#allocation8 + $0x100]]  ;;  %vm413_vm4 = vcmp.eq.s32.totalorder %v3904_v7, 2 }
 0x108   :  { %541 = vmatpush.msra.mxu0 %v518_v14  ;;  %v363_v24 = vadd.f32 %v362_v22, %v356_v18  ;;  %v368_v27 = vsel %vm367_vm6, 1.0, %v5394_v17  ;;  %vm373_vm9 = vmand %vm351_vm0, %vm372_vm7  ;;  %vm378_vm10 = vcmp.eq.s32.totalorder %v3906_v8, %v377_v25  ;;  %v384_v28 = vstv %s3915_s26  ;;  %s3948_s1 = sld [smem:[#allocation8 + $0x101]]  ;;  %729 = vmatpush.msra.mxu1 %v699_v5  ;;  %v700_v5 = vld [vmem:[#allocation18 + $0x80] sm:$0xff] }
 0x109   :  { %573 = vmatpush.msra.mxu3 %v551_v15  ;;  %v374_v31 = vsel %vm373_vm9, 1.0, %v5394_v17  ;;  %vm379_vm11 = vmand %vm351_vm0, %vm378_vm10  ;;  %vm385_vm12 = vcmp.eq.s32.totalorder %v3906_v8, %v384_v28  ;;  %v390_v32 = vstv %s3918_s23  ;;  %s3955_s24 = sld [smem:[#allocation8 + $0x102]]  ;;  %v696_v15 = vld [vmem:[#allocation18 + $0x60] sm:$0xff] }
 0x10a   :  { %542 = vmatpush.msra.mxu0 %v517_v20  ;;  %v369_v30 = vadd.f32 %v368_v27, %v363_v24  ;;  %v380_v33 = vsel %vm379_vm11, 1.0, %v5394_v17  ;;  %vm386_vm13 = vmand %vm382_vm8, %vm385_vm12  ;;  %vm391_vm14 = vcmp.eq.s32.totalorder %v3906_v8, %v390_v32  ;;  %v396_v34 = vstv %s3923_s6  ;;  %s3962_s20 = sld [smem:[#allocation8 + $0x103]]  ;;  %730 = vmatpush.msra.mxu1 %v696_v15  ;;  %v4330_v15 = vld [vmem:[#allocation19 + $0x168] sm:$0xff] }
 0x10b   :  { %574 = vmatpush.msra.mxu3 %v550_v21  ;;  %vm3966_vm15 = vmand %vm382_vm8, %vm391_vm14  ;;  %s5443_s27 = sld [smem:[#allocation45_spill]]  ;;  %vm397_vm1 = vcmp.eq.s32.totalorder %v3906_v8, %v396_v34  ;;  %v402_v37 = vstv %s3929_s25  ;;  %v387_v38 = vsel %vm386_vm13, 1.0, %v5394_v17 }
 0x10c   :  { %543 = vmatpush.msra.mxu0 %v516_v26  ;;  %v375_v35 = vadd.f32 %v374_v31, %v369_v30  ;;  %s3972_s13 = sld [smem:[#allocation8 + $0x104]]  ;;  %vm3977_vm2 = vmand %vm382_vm8, %vm397_vm1  ;;  %vm403_vm3 = vcmp.eq.s32.totalorder %v3906_v8, %v402_v37  ;;  %v408_v40 = vstv %s3934_s28  ;;  %v393_v46 = vsel %vm3966_vm15, 1.0, %v5394_v17  ;;  %v693_v26 = vld [vmem:[#allocation18 + $0x48] sm:$0xff]  ;;  %v690_v37 = vld [vmem:[#allocation18 + $0x30] sm:$0xff] }
 0x10d   :  { %575 = vmatpush.msra.mxu3 %v549_v29  ;;  %s3984_s7 = sld [smem:[#allocation12]]  ;;  %vm3988_vm5 = vmand %vm382_vm8, %vm403_vm3  ;;  %vm409_vm6 = vcmp.eq.s32.totalorder %v3906_v8, %v408_v40  ;;  %v415_v43 = vstv %s3941_s30  ;;  %v399_v56 = vsel %vm3977_vm2, 1.0, %v5394_v17  ;;  %731 = vmatpush.msra.mxu1 %v693_v26 }
 0x10e   :  { %v381_v41 = vadd.f32 %v380_v33, %v375_v35  ;;  %s3994_s2 = sld [smem:[#allocation12 + $0x1]]  ;;  %vm4003_vm7 = vmand %vm382_vm8, %vm409_vm6  ;;  %vm416_vm9 = vcmp.eq.s32.totalorder %v3906_v8, %v415_v43  ;;  %v421_v48 = vstv %s3948_s1  ;;  %v405_v2 = vsel %vm3988_vm5, 1.0, %v5394_v17 }
 0x10f   :  { %s4009_s15 = sld [smem:[#allocation12 + $0x2]]  ;;  %vm4015_vm10 = vmand %vm413_vm4, %vm416_vm9  ;;  %vm422_vm11 = vcmp.eq.s32.totalorder %v3906_v8, %v421_v48  ;;  %v427_v53 = vstv %s3955_s24  ;;  %v411_v13 = vsel %vm4003_vm7, 1.0, %v5394_v17  ;;  %v687_v48 = vld [vmem:[#allocation18 + $0x18] sm:$0xff]  ;;  %732 = vmatpush.msra.mxu1 %v690_v37 }
 0x110   :  { %v388_v51 = vadd.f32 %v387_v38, %v381_v41  ;;  %s4021_s16 = sld [smem:[#allocation12 + $0x3]]  ;;  %vm4029_vm12 = vmand %vm413_vm4, %vm422_vm11  ;;  %vm428_vm13 = vcmp.eq.s32.totalorder %v3906_v8, %v427_v53  ;;  %v433_v58 = vstv %s3962_s20  ;;  %v418_v23 = vsel %vm4015_vm10, 1.0, %v5394_v17 }
 0x111   :  { %v602_v44 = vld [vmem:[%s5443_s27 + $0xa8] sm:$0xff]  ;;  %v603_v45 = vld [vmem:[%s5443_s27 + $0xb0] sm:$0xff]  ;;  %v600_v50 = vld [vmem:[%s5443_s27 + $0x98] sm:$0xff]  ;;  %s4035_s21 = sld [smem:[#allocation12 + $0x80]]  ;;  %vm434_vm15 = vcmp.eq.s32.totalorder %v3906_v8, %v433_v58  ;;  %v424_v33 = vsel %vm4029_vm12, 1.0, %v5394_v17  ;;  %733 = vmatpush.msra.mxu1 %v687_v48 }
 0x112   :  { %624 = vmatpush.msra.mxu2 %v602_v44  ;;  %644 = vmatpush.msrb.mxu3 %v603_v45  ;;  %v599_v49 = vld [vmem:[%s5443_s27 + $0x90] sm:$0xff]  ;;  %v596_v55 = vld [vmem:[%s5443_s27 + $0x78] sm:$0xff]  ;;  %v597_v59 = vld [vmem:[%s5443_s27 + $0x80] sm:$0xff]  ;;  %v394_v61 = vadd.f32 %v393_v46, %v388_v51  ;;  %v439_v63 = vstv %s3972_s13  ;;  %s4046_s4 = sld [smem:[#allocation12 + $0x81]] }
 0x113   :  { %vm4040_vm14 = vmand %vm413_vm4, %vm428_vm13  ;;  %v593_v0 = vld [vmem:[%s5443_s27 + $0x60] sm:$0xff]  ;;  %v594_v1 = vld [vmem:[%s5443_s27 + $0x68] sm:$0xff]  ;;  %vm440_vm2 = vcmp.eq.s32.totalorder %v3906_v8, %v439_v63  ;;  %v445_v4 = vstv %s3984_s7  ;;  %s4061_s18 = sld [smem:[#allocation12 + $0x82]] }
 0x114   :  { %625 = vmatpush.msra.mxu2 %v599_v49  ;;  %645 = vmatpush.msrb.mxu3 %v600_v50  ;;  %vm4055_vm1 = vmand %vm413_vm4, %vm434_vm15  ;;  %v400_v6 = vadd.f32 %v399_v56, %v394_v61  ;;  %vm446_vm5 = vcmp.eq.s32.totalorder %v3906_v8, %v445_v4  ;;  %v451_v10 = vstv %s3994_s2  ;;  %s4071_s12 = sld [smem:[#allocation12 + $0x83]]  ;;  %v590_v11 = vld [vmem:[%s5443_s27 + $0x48] sm:$0xff]  ;;  %v591_v12 = vld [vmem:[%s5443_s27 + $0x50] sm:$0xff]  ;;  %v430_v39 = vsel %vm4040_vm14, 1.0, %v5394_v17 }
 0x115   :  { %vm4065_vm3 = vmand %vm413_vm4, %vm440_vm2  ;;  %vm452_vm9 = vcmp.eq.s32.totalorder %v3906_v8, %v451_v10  ;;  %v457_v14 = vstv %s4009_s15  ;;  %s4082_s0 = sld [smem:[#allocation12 + $0x100]]  ;;  %v587_v16 = vld [vmem:[%s5443_s27 + $0x30] sm:$0xff]  ;;  %v588_v21 = vld [vmem:[%s5443_s27 + $0x38] sm:$0xff]  ;;  %v436_v54 = vsel %vm4055_vm1, 1.0, %v5394_v17 }
 0x116   :  { %626 = vmatpush.msra.mxu2 %v596_v55  ;;  %646 = vmatpush.msrb.mxu3 %v597_v59  ;;  %vm447_vm6 = vmand %vm351_vm0, %vm446_vm5  ;;  %v406_v18 = vadd.f32 %v405_v2, %v400_v6  ;;  %vm458_vm11 = vcmp.eq.s32.totalorder %v3906_v8, %v457_v14  ;;  %v463_v20 = vstv %s4021_s16  ;;  %s4090_s22 = sld [smem:[#allocation12 + $0x101]]  ;;  %v604_v22 = vld [vmem:[%s5443_s27 + $0xb8] sm:$0xff]  ;;  %v585_v31 = vld [vmem:[%s5443_s27 + $0x20] sm:$0xff]  ;;  %v442_v2 = vsel %vm4065_vm3, 1.0, %v5394_v17 }
 0x117   :  { %v448_v19 = vsel %vm447_vm6, 1.0, %v5394_v17  ;;  %vm453_vm7 = vmand %vm351_vm0, %vm452_vm9  ;;  %vm464_vm15 = vcmp.eq.s32.totalorder %v3906_v8, %v463_v20  ;;  %v469_v25 = vstv %s4035_s21  ;;  %s4102_s11 = sld [smem:[#allocation12 + $0x102]]  ;;  %v584_v27 = vld [vmem:[%s5443_s27 + $0x18] sm:$0xff]  ;;  %664 = vmatpush.msrb.mxu0 %v604_v22  ;;  %v601_v32 = vld [vmem:[%s5443_s27 + $0xa0] sm:$0xff]  ;;  %vm524_vm3 = vcmask 523264  }
 0x118   :  { %627 = vmatpush.msra.mxu2 %v593_v0  ;;  %647 = vmatpush.msrb.mxu3 %v594_v1  ;;  %v454_v24 = vsel %vm453_vm7, 1.0, %v5394_v17  ;;  %vm459_vm13 = vmand %vm351_vm0, %vm458_vm11  ;;  %v412_v28 = vadd.f32 %v411_v13, %v406_v18  ;;  %vm470_vm2 = vcmp.eq.s32.totalorder %v3906_v8, %v469_v25  ;;  %s4109_s17 = sld [smem:[#allocation12 + $0x103]]  ;;  %v475_v35 = vstv %s4046_s4  ;;  %v581_v41 = vld [vmem:[%s5443_s27] sm:$0xff]  ;;  %v582_v42 = vld [vmem:[%s5443_s27 + $0x8] sm:$0xff] }
 0x119   :  { %v455_v29 = vadd.f32 %v454_v24, %v448_v19  ;;  %v460_v30 = vsel %vm459_vm13, 1.0, %v5394_v17  ;;  %vm465_vm10 = vmand %vm351_vm0, %vm464_vm15  ;;  %v481_v36 = vstv %s4061_s18  ;;  %vm476_vm12 = vcmp.eq.s32.totalorder %v3906_v8, %v475_v35  ;;  %665 = vmatpush.msrb.mxu0 %v601_v32  ;;  %v598_v43 = vld [vmem:[%s5443_s27 + $0x88] sm:$0xff]  ;;  %v706_v49 = vld [vmem:[#allocation18 + $0xb0] sm:$0xff]  ;;  %s5464_s3 = sld [smem:[#allocation46_spill]] }
 0x11a   :  { %628 = vmatpush.msra.mxu2 %v590_v11  ;;  %648 = vmatpush.msrb.mxu3 %v591_v12  ;;  %v466_v34 = vsel %vm465_vm10, 1.0, %v5394_v17  ;;  %vm471_vm5 = vmand %vm382_vm8, %vm470_vm2  ;;  %v419_v38 = vadd.f32 %v418_v23, %v412_v28  ;;  %vm482_vm9 = vcmp.eq.s32.totalorder %v3906_v8, %v481_v36  ;;  %v487_v46 = vstv %s4071_s12  ;;  %v595_v53 = vld [vmem:[%s5443_s27 + $0x70] sm:$0xff]  ;;  %v684_v58 = vld [vmem:[#allocation18] sm:$0xff]  ;;  %s5514_s9 = sld [smem:[#allocation47_spill]] }
 0x11b   :  { %v461_v40 = vadd.f32 %v460_v30, %v455_v29  ;;  %v472_v44 = vsel %vm471_vm5, 1.0, %v5394_v17  ;;  %vm4131_vm6 = vmand %vm382_vm8, %vm476_vm12  ;;  %v493_v47 = vstv %s4082_s0  ;;  %vm488_vm7 = vcmp.eq.s32.totalorder %v3906_v8, %v487_v46  ;;  %666 = vmatpush.msrb.mxu0 %v598_v43  ;;  %v703_v59 = vld [vmem:[#allocation18 + $0x98] sm:$0xff]  ;;  %734 = vmatpush.msra.mxu1 %v684_v58  ;;  %v694_v24 = vld [vmem:[#allocation18 + $0x50] sm:$0xff]  ;;  %s5531_s10 = sld [smem:[#allocation48_spill]]  ;;  %s3648_s0 = smov [#allocation33]  }
 0x11c   :  { %629 = vmatpush.msra.mxu2 %v587_v16  ;;  %649 = vmatpush.msrb.mxu3 %v588_v21  ;;  %v425_v50 = vadd.f32 %v424_v33, %v419_v38  ;;  %vm4140_vm14 = vmand %vm382_vm8, %vm482_vm9  ;;  %v478_v55 = vsel %vm4131_vm6, 1.0, %v5394_v17  ;;  %vm4153_vm11 = vcmp.eq.s32.totalorder %v3906_v8, %v493_v47  ;;  %v499_v57 = vstv %s4090_s22  ;;  %v592_v1 = vld [vmem:[%s5443_s27 + $0x58] sm:$0xff]  ;;  %v589_v13 = vld [vmem:[%s5443_s27 + $0x40] sm:$0xff]  ;;  %s5532_s19 = sld [smem:[#allocation51_spill]]  ;;  %s2944_s22 = sshll.u32 %s3648_s0, 4  ;;  %s2945_s22 = int_to_ptr.vmem [resolvable:$true] %s2944_s22 }
 0x11d   :  { %v467_v51 = vadd.f32 %v466_v34, %v461_v40  ;;  %vm4160_vm1 = vmand %vm382_vm8, %vm488_vm7  ;;  %v505_v63 = vstv %s4102_s11  ;;  %v484_v3 = vsel %vm4140_vm14, 1.0, %v5394_v17  ;;  %vm4176_vm13 = vcmp.eq.s32.totalorder %v3906_v8, %v499_v57  ;;  %667 = vmatpush.msrb.mxu0 %v595_v53  ;;  %v697_v16 = vld [vmem:[#allocation18 + $0x68] sm:$0xff]  ;;  %v691_v29 = vld [vmem:[#allocation18 + $0x38] sm:$0xff]  ;;  %s5533_s5 = sld [smem:[#allocation49_spill]]  ;;  %s2946_s11 = sshll.u32 %s3807_s29, 4  ;;  %s2947_s11 = int_to_ptr.hbm [resolvable:$true] %s2946_s11 }
 0x11e   :  { %630 = vmatpush.msra.mxu2 %v584_v27  ;;  %650 = vmatpush.msrb.mxu3 %v585_v31  ;;  %v431_v60 = vadd.f32 %v430_v39, %v425_v50  ;;  %vm4184_vm15 = vmand %vm413_vm4, %vm4153_vm11  ;;  %v511_v11 = vstv %s4109_s17  ;;  %v490_v14 = vsel %vm4160_vm1, 1.0, %v5394_v17  ;;  %vm4197_vm10 = vcmp.eq.s32.totalorder %v3906_v8, %v505_v63  ;;  %v586_v21 = vld [vmem:[%s5443_s27 + $0x28] sm:$0xff]  ;;  %v583_v27 = vld [vmem:[%s5443_s27 + $0x10] sm:$0xff]  ;;  %s5534_s26 = sld [smem:[#allocation54_spill]]  ;;  %s3566_s17 = sshra.s32 %s2947_s11, 4  ;;  %s3567_s17 = int_to_ptr.hbm [resolvable:$true] %s3566_s17 }
 0x11f   :  { %v473_v61 = vadd.f32 %v472_v44, %v467_v51  ;;  %v4166_v0 = vld [vmem:[%s5464_s3 + $0x170] sm:$0xff]  ;;  %v4190_v12 = vld [vmem:[%s5464_s3 + $0x158] sm:$0xff]  ;;  %668 = vmatpush.msrb.mxu0 %v592_v1  ;;  %vm501_vm2 = vmand %vm413_vm4, %vm4176_vm13  ;;  %v496_v22 = vsel %vm4184_vm15, 1.0, %v5394_v17  ;;  %vm4214_vm5 = vcmp.eq.s32.totalorder %v3906_v8, %v511_v11  ;;  %s5535_s23 = sld [smem:[#allocation52_spill]]  ;;  %p3571_p6 = scmp.lt.s32.totalorder %s3567_s17, %s3807_s29 }
 0x120   :  { %631 = vmatpush.msra.mxu2 %v581_v41  ;;  %651 = vmatpush.msrb.mxu3 %v582_v42  ;;  %v437_v6 = vadd.f32 %v436_v54, %v431_v60  ;;  %v4207_v20 = vld [vmem:[%s5464_s3 + $0x140] sm:$0xff]  ;;  %vm507_vm12 = vmand %vm413_vm4, %vm4197_vm10  ;;  %v4225_v26 = vld [vmem:[%s5464_s3 + $0x128] sm:$0xff]  ;;  %v502_v28 = vsel %vm501_vm2, 1.0, %v5394_v17  ;;  %s5538_s6 = sld [smem:[#allocation50_spill]] }
 0x121   :  { %v479_v10 = vadd.f32 %v478_v55, %v473_v61  ;;  %863 = vmatpush.msrb.mxu1 %v4166_v0  ;;  %669 = vmatpush.msrb.mxu0 %v589_v13  ;;  %v4230_v30 = vld [vmem:[#allocation19 + $0x170] sm:$0xff]  ;;  %vm513_vm6 = vmand %vm413_vm4, %vm4214_vm5  ;;  %v508_v33 = vsel %vm507_vm12, 1.0, %v5394_v17  ;;  %v707_v38 = vld [vmem:[#allocation18 + $0xb8] sm:$0xff]  ;;  %vm679_vm4 = vcmask 1043456   ;;  %s5539_s25 = sld [smem:[#allocation55_spill]] }
 0x122   :  { %747 = vmatpush.msrb.mxu2 %v706_v49  ;;  %v443_v18 = vadd.f32 %v442_v2, %v437_v6  ;;  %5477 = vst [vmem:[#allocation59_spill] sm:$0xff] %v4230_v30  ;;  %v4237_v32 = vld [vmem:[%s5464_s3 + $0x110] sm:$0xff]  ;;  %v514_v35 = vsel %vm513_vm6, 1.0, %v5394_v17  ;;  %v704_v39 = vld [vmem:[#allocation18 + $0xa0] sm:$0xff]  ;;  %v695_v42 = vld [vmem:[#allocation18 + $0x58] sm:$0xff]  ;;  %s5540_s28 = sld [smem:[#allocation56_spill]] }
 0x123   :  { %v485_v19 = vadd.f32 %v484_v3, %v479_v10  ;;  %864 = vmatpush.msrb.mxu1 %v4190_v12  ;;  %670 = vmatpush.msrb.mxu0 %v586_v21  ;;  %v701_v40 = vld [vmem:[#allocation18 + $0x88] sm:$0xff]  ;;  %v698_v41 = vld [vmem:[#allocation18 + $0x70] sm:$0xff]  ;;  %v692_v43 = vld [vmem:[#allocation18 + $0x40] sm:$0xff]  ;;  %s5541_s30 = sld [smem:[#allocation53_spill]] }
 0x124   :  { %748 = vmatpush.msrb.mxu2 %v703_v59  ;;  %3019 = vmatmul.msk.f32.vlgmr.msra.gmra.mxu0 %vm524_vm3, %v443_v18  ;;  %v688_v44 = vld [vmem:[#allocation18 + $0x20] sm:$0xff]  ;;  %v689_v45 = vld [vmem:[#allocation18 + $0x28] sm:$0xff]  ;;  %v4246_v46 = vld [vmem:[%s5464_s3 + $0xf8] sm:$0xff]  ;;  %s5542_s1 = sld [smem:[#allocation44_spill]] }
 0x125   :  { %v491_v25 = vadd.f32 %v490_v14, %v485_v19  ;;  %865 = vmatpush.msrb.mxu1 %v4207_v20  ;;  %671 = vmatpush.msrb.mxu0 %v583_v27  ;;  %v4248_v47 = vld [vmem:[#allocation19 + $0x158] sm:$0xff]  ;;  %v685_v48 = vld [vmem:[#allocation18 + $0x8] sm:$0xff]  ;;  %v686_v49 = vld [vmem:[#allocation18 + $0x10] sm:$0xff]  ;;  %s2543_s24 = sld [smem:[#allocation14]] }
 0x126   :  { %749 = vmatpush.msrb.mxu2 %v700_v5  ;;  %5478 = vst [vmem:[#allocation60_spill] sm:$0xff] %v4248_v47  ;;  %v4253_v50 = vld [vmem:[%s5464_s3 + $0xe0] sm:$0xff]  ;;  %v4260_v52 = vld [vmem:[%s5464_s3 + $0xc8] sm:$0xff]  ;;  %v4267_v54 = vld [vmem:[%s5464_s3 + $0xb0] sm:$0xff]  ;;  %s3071_s20 = sld [smem:[#allocation14 + $0x1]] }
 0x127   :  { %v497_v31 = vadd.f32 %v496_v22, %v491_v25  ;;  %866 = vmatpush.msrb.mxu1 %v4225_v26  ;;  %1032 = vmatpush.msra.mxu0 %v4230_v30  ;;  %v4256_v51 = vld [vmem:[#allocation19 + $0x140] sm:$0xff]  ;;  %v4263_v53 = vld [vmem:[#allocation19 + $0x128] sm:$0xff]  ;;  %v4270_v55 = vld [vmem:[#allocation19 + $0x110] sm:$0xff]  ;;  %s3072_s27 = sld [smem:[#allocation14 + $0x2]] }
 0x128   :  { %750 = vmatpush.msrb.mxu2 %v697_v16  ;;  %5479 = vst [vmem:[#allocation61_spill] sm:$0xff] %v4256_v51  ;;  %v4274_v56 = vld [vmem:[%s5464_s3 + $0x98] sm:$0xff]  ;;  %v4281_v58 = vld [vmem:[%s5464_s3 + $0x80] sm:$0xff]  ;;  %v4287_v60 = vld [vmem:[%s5464_s3 + $0x68] sm:$0xff]  ;;  %s3073_s13 = sld [smem:[#allocation14 + $0x3]] }
 0x129   :  { %v503_v34 = vadd.f32 %v502_v28, %v497_v31  ;;  %867 = vmatpush.msrb.mxu1 %v4237_v32  ;;  %1033 = vmatpush.msra.mxu0 %v4248_v47  ;;  %5480 = vst [vmem:[#allocation62_spill] sm:$0xff] %v4263_v53  ;;  %v4277_v57 = vld [vmem:[#allocation19 + $0xf8] sm:$0xff]  ;;  %v4284_v59 = vld [vmem:[#allocation19 + $0xe0] sm:$0xff]  ;;  %v4290_v61 = vld [vmem:[#allocation19 + $0xc8] sm:$0xff]  ;;  %s3074_s7 = sld [smem:[#allocation14 + $0x4]] }
 0x12a   :  { %751 = vmatpush.msrb.mxu2 %v694_v24  ;;  %5481 = vst [vmem:[#allocation63_spill] sm:$0xff] %v4270_v55  ;;  %v4294_v62 = vld [vmem:[%s5464_s3 + $0x50] sm:$0xff]  ;;  %v4300_v1 = vld [vmem:[%s5464_s3 + $0x38] sm:$0xff]  ;;  %v4307_v3 = vld [vmem:[%s5464_s3 + $0x20] sm:$0xff]  ;;  %s3075_s2 = sld [smem:[#allocation14 + $0x5]] }
 0x12b   :  { %v509_v36 = vadd.f32 %v508_v33, %v503_v34  ;;  %868 = vmatpush.msrb.mxu1 %v4246_v46  ;;  %1034 = vmatpush.msra.mxu0 %v4256_v51  ;;  %5482 = vst [vmem:[#allocation64_spill] sm:$0xff] %v4277_v57  ;;  %v4296_v63 = vld [vmem:[#allocation19 + $0xb0] sm:$0xff]  ;;  %v4303_v2 = vld [vmem:[#allocation19 + $0x98] sm:$0xff]  ;;  %v4310_v4 = vld [vmem:[#allocation19 + $0x80] sm:$0xff]  ;;  %s3076_s15 = sld [smem:[#allocation14 + $0x80]] }
 0x12c   :  { %752 = vmatpush.msrb.mxu2 %v691_v29  ;;  %5483 = vst [vmem:[#allocation65_spill] sm:$0xff] %v4284_v59  ;;  %v4314_v5 = vld [vmem:[%s5464_s3 + $0x8] sm:$0xff]  ;;  %v4321_v10 = vld [vmem:[#allocation19 + $0x50] sm:$0xff]  ;;  %v4352_v23 = vld [vmem:[#allocation19 + $0x138] sm:$0xff]  ;;  %s3077_s16 = sld [smem:[#allocation14 + $0x81]] }
 0x12d   :  { %v515_v37 = vadd.f32 %v514_v35, %v509_v36  ;;  %869 = vmatpush.msrb.mxu1 %v4253_v50  ;;  %1035 = vmatpush.msra.mxu0 %v4263_v53  ;;  %5484 = vst [vmem:[#allocation66_spill] sm:$0xff] %v4290_v61  ;;  %v4317_v6 = vld [vmem:[#allocation19 + $0x68] sm:$0xff]  ;;  %v4333_v16 = vld [vmem:[#allocation19 + $0x20] sm:$0xff]  ;;  %v4342_v19 = vld [vmem:[#allocation19 + $0x150] sm:$0xff]  ;;  %s3078_s21 = sld [smem:[#allocation14 + $0x82]] }
 0x12e   :  { %753 = vmatpush.msrb.mxu2 %v688_v44  ;;  %5485 = vst [vmem:[#allocation67_spill] sm:$0xff] %v4296_v63  ;;  %v4328_v14 = vld [vmem:[%s5464_s3 + $0x168] sm:$0xff]  ;;  %v4338_v18 = vld [vmem:[%s5464_s3 + $0x150] sm:$0xff]  ;;  %v4348_v22 = vld [vmem:[%s5464_s3 + $0x138] sm:$0xff]  ;;  %s3079_s4 = sld [smem:[#allocation14 + $0x83]] }
 0x12f   :  { %3020 = vmatmul.msk.f32.vlgmr.msra.gmra.mxu3 %vm524_vm3, %v515_v37  ;;  %870 = vmatpush.msrb.mxu1 %v4260_v52  ;;  %5486 = vst [vmem:[#allocation68_spill] sm:$0xff] %v4303_v2  ;;  %v4344_v21 = vld [vmem:[#allocation19 + $0x8] sm:$0xff]  ;;  %v4356_v24 = vld [vmem:[%s5464_s3 + $0x120] sm:$0xff]  ;;  %v4360_v25 = vld [vmem:[%s5464_s3 + $0x178] sm:$0xff]  ;;  %s3080_s18 = sld [smem:[#allocation14 + $0x84]] }
 0x130   :  { %767 = vmatpush.msra.mxu3 %v707_v38  ;;  %754 = vmatpush.msrb.mxu2 %v685_v48  ;;  %5487 = vst [vmem:[#allocation69_spill] sm:$0xff] %v4310_v4  ;;  %v4363_v27 = vld [vmem:[#allocation19 + $0x120] sm:$0xff]  ;;  %v4374_v31 = vld [vmem:[#allocation19 + $0x108] sm:$0xff]  ;;  %v4382_v34 = vld [vmem:[#allocation19 + $0xf0] sm:$0xff]  ;;  %s3081_s12 = sld [smem:[#allocation14 + $0x85]] }
 0x131   :  { %871 = vmatpush.msrb.mxu1 %v4267_v54  ;;  %1036 = vmatpush.msra.mxu0 %v4270_v55  ;;  %5488 = vst [vmem:[#allocation70_spill] sm:$0xff] %v4317_v6  ;;  %v4368_v28 = vld [vmem:[%s5464_s3 + $0x108] sm:$0xff]  ;;  %v4371_v29 = vld [vmem:[%s5464_s3 + $0x160] sm:$0xff]  ;;  %v4379_v33 = vld [vmem:[%s5464_s3 + $0xf0] sm:$0xff] }
 0x132   :  { %768 = vmatpush.msra.mxu3 %v704_v39  ;;  %5489 = vst [vmem:[#allocation71_spill] sm:$0xff] %v4321_v10  ;;  %v4386_v35 = vld [vmem:[%s5464_s3 + $0x148] sm:$0xff]  ;;  %v4390_v36 = vld [vmem:[%s5464_s3 + $0xd8] sm:$0xff]  ;;  %v4397_v38 = vld [vmem:[%s5464_s3 + $0x130] sm:$0xff] }
 0x133   :  { %872 = vmatpush.msrb.mxu1 %v4274_v56  ;;  %1037 = vmatpush.msra.mxu0 %v4277_v57  ;;  %5491 = vst [vmem:[#allocation73_spill] sm:$0xff] %v4333_v16  ;;  %v4394_v37 = vld [vmem:[#allocation19 + $0xd8] sm:$0xff]  ;;  %v4414_v44 = vld [vmem:[#allocation19 + $0xc0] sm:$0xff]  ;;  %v4421_v48 = vld [vmem:[%s5464_s3 + $0x90] sm:$0xff] }
 0x134   :  { %769 = vmatpush.msra.mxu3 %v701_v40  ;;  %5492 = vst [vmem:[#allocation74_spill] sm:$0xff] %v4344_v21  ;;  %v4401_v39 = vld [vmem:[%s5464_s3 + $0xc0] sm:$0xff]  ;;  %v4449_v8 = vld [vmem:[%s5464_s3 + $0xe8] sm:$0xff]  ;;  %v4485_v57 = vld [vmem:[%s5464_s3 + $0x18] sm:$0xff] }
 0x135   :  { %873 = vmatpush.msrb.mxu1 %v4281_v58  ;;  %1038 = vmatpush.msra.mxu0 %v4284_v59  ;;  %5493 = vst [vmem:[#allocation75_spill] sm:$0xff] %v4421_v48  ;;  %v4445_v7 = vld [vmem:[%s5464_s3 + $0x60] sm:$0xff]  ;;  %v4481_v59 = vld [vmem:[%s5464_s3 + $0xb8] sm:$0xff]  ;;  %v4499_v30 = vld [vmem:[#allocation19 + $0xe8] sm:$0xff] }
 0x136   :  { %770 = vmatpush.msra.mxu3 %v698_v41  ;;  %v4406_v41 = vld [vmem:[%s5464_s3 + $0x118] sm:$0xff]  ;;  %5495 = vst [vmem:[#allocation77_spill] sm:$0xff] %v4445_v7  ;;  %v4487_v55 = vld [vmem:[#allocation19 + $0x100] sm:$0xff] }
 0x137   :  { %874 = vmatpush.msrb.mxu1 %v4287_v60  ;;  %1039 = vmatpush.msra.mxu0 %v4290_v61  ;;  %v4477_v61 = vld [vmem:[#allocation19 + $0x48] sm:$0xff]  ;;  %5499 = vst [vmem:[#allocation80_spill] sm:$0xff] %v4485_v57  ;;  %v4491_v53 = vld [vmem:[#allocation19 + $0x30] sm:$0xff]  ;;  %v807_v51 = vld [vmem:[%s5464_s3 + $0xa0] sm:$0xff] }
 0x138   :  { %771 = vmatpush.msra.mxu3 %v695_v42  ;;  %v4497_v47 = vld [vmem:[%s5464_s3] sm:$0xff] }
 0x139   :  { %875 = vmatpush.msrb.mxu1 %v4294_v62  ;;  %1040 = vmatpush.msra.mxu0 %v4296_v63  ;;  %v4474_v63 = vld [vmem:[#allocation19 + $0x118] sm:$0xff]  ;;  %5500 = vst [vmem:[#allocation81_spill] sm:$0xff] %v4497_v47 }
 0x13a   :  { %772 = vmatpush.msra.mxu3 %v692_v43  ;;  %v4410_v43 = vld [vmem:[%s5464_s3 + $0xa8] sm:$0xff] }
 0x13b   :  { %876 = vmatpush.msrb.mxu1 %v4300_v1  ;;  %1041 = vmatpush.msra.mxu0 %v4303_v2  ;;  %v4472_v2 = vld [vmem:[%s5464_s3 + $0x30] sm:$0xff] }
 0x13c   :  { %773 = vmatpush.msra.mxu3 %v689_v45  ;;  %v4416_v45 = vld [vmem:[#allocation19 + $0x178] sm:$0xff]  ;;  %5498 = vst [vmem:[#allocation79_spill] sm:$0xff] %v4472_v2 }
 0x13d   :  { %877 = vmatpush.msrb.mxu1 %v4307_v3  ;;  %1042 = vmatpush.msra.mxu0 %v4310_v4  ;;  %v5497_v4 = vmov 0.0  }
 0x13e   :  { %774 = vmatpush.msra.mxu3 %v686_v49  ;;  %v4425_v49 = vld [vmem:[#allocation19 + $0xa8] sm:$0xff] }
 0x13f   :  { %878 = vmatpush.msrb.mxu1 %v4314_v5  ;;  %1043 = vmatpush.msra.mxu0 %v4317_v6  ;;  %v4466_v6 = vld [vmem:[#allocation19 + $0x60] sm:$0xff] }
 0x141   :  { %1044 = vmatpush.msra.mxu0 %v4321_v10  ;;  %v4463_v10 = vld [vmem:[%s5464_s3 + $0xd0] sm:$0xff] }
 0x143   :  { %1045 = vmatpush.msra.mxu0 %v4324_v9  ;;  %v4460_v9 = vld [vmem:[#allocation19 + $0x130] sm:$0xff] }
 0x145   :  { %1046 = vmatpush.msra.mxu0 %v4333_v16  ;;  %v4457_v16 = vld [vmem:[%s5464_s3 + $0x48] sm:$0xff] }
 0x146   :  { %5496 = vst [vmem:[#allocation78_spill] sm:$0xff] %v4457_v16 }
 0x147   :  { %1047 = vmatpush.msra.mxu0 %v4344_v21  ;;  %v4452_v21 = vld [vmem:[#allocation19 + $0x78] sm:$0xff] }
 0x1a1   :  { %v545_v11 = vpop.f32.mrf.mxu0 }
 0x1a2   :  { %v548_v13 = vmul.f32 0.2, %v545_v11  ;;  %v4427_v11 = vld [vmem:[#allocation19 + $0x160] sm:$0xff] }
 0x1a4   :  { %3021 = vmatmul.msk.f32.vlgmr.msra.gmra.mxu2 %vm524_vm3, %v548_v13  ;;  %3022 = vmatmul.msk.f32.vlgmr.msrb.gmra.mxu3 %vm524_vm3, %v548_v13 }
 0x1a5   :  { %3023 = vmatmul.msk.f32.vlgmr.msrb.gmra.mxu0 %vm524_vm3, %v548_v13  ;;  %843 = vmatpush.msra.mxu2 %v4328_v14  ;;  %v4431_v13 = vld [vmem:[%s5464_s3 + $0x78] sm:$0xff] }
 0x1a6   :  { %1012 = vmatpush.msrb.mxu3 %v4330_v15  ;;  %1224 = vmatpush.msrb.mxu0 %v4360_v25  ;;  %5494 = vst [vmem:[#allocation76_spill] sm:$0xff] %v4431_v13 }
 0x1a7   :  { %844 = vmatpush.msra.mxu2 %v4338_v18 }
 0x1a8   :  { %1013 = vmatpush.msrb.mxu3 %v4342_v19  ;;  %1225 = vmatpush.msrb.mxu0 %v4371_v29 }
 0x1a9   :  { %845 = vmatpush.msra.mxu2 %v4348_v22 }
 0x1aa   :  { %1014 = vmatpush.msrb.mxu3 %v4352_v23  ;;  %1226 = vmatpush.msrb.mxu0 %v4386_v35 }
 0x1ab   :  { %846 = vmatpush.msra.mxu2 %v4356_v24 }
 0x1ac   :  { %1015 = vmatpush.msrb.mxu3 %v4363_v27  ;;  %1227 = vmatpush.msrb.mxu0 %v4397_v38 }
 0x1ad   :  { %847 = vmatpush.msra.mxu2 %v4368_v28  ;;  %1048 = vmatmul.f32.vlgmr.msra.gmra.mxu0 %v5394_v17  ;;  %v4438_v17 = vld [vmem:[#allocation19 + $0x90] sm:$0xff] }
 0x1ae   :  { %1016 = vmatpush.msrb.mxu3 %v4374_v31  ;;  %1228 = vmatpush.msrb.mxu0 %v4406_v41 }
 0x1af   :  { %848 = vmatpush.msra.mxu2 %v4379_v33 }
 0x1b0   :  { %1017 = vmatpush.msrb.mxu3 %v4382_v34 }
 0x1b1   :  { %849 = vmatpush.msra.mxu2 %v4390_v36 }
 0x1b2   :  { %v577_v40 = vpop.f32.mrf.mxu3  ;;  %1018 = vmatpush.msrb.mxu3 %v4394_v37 }
 0x1b3   :  { %v580_v42 = vmul.f32 0.25, %v577_v40  ;;  %850 = vmatpush.msra.mxu2 %v4401_v39  ;;  %v4435_v40 = vld [vmem:[%s5464_s3 + $0x100] sm:$0xff] }
 0x1b4   :  { %1019 = vmatpush.msrb.mxu3 %v4414_v44  ;;  %1229 = vmatpush.msrb.mxu0 %v4435_v40 }
 0x1b5   :  { %3025 = vmatmul.msk.f32.vlgmr.msrb.gmra.mxu2 %vm524_vm3, %v580_v42  ;;  %3024 = vmatmul.msk.f32.vlgmr.msra.gmra.mxu1 %vm524_vm3, %v580_v42 }
 0x1b6   :  { %3026 = vmatmul.msk.f32.vlgmr.msra.gmra.mxu3 %vm524_vm3, %v580_v42  ;;  %851 = vmatpush.msra.mxu2 %v4410_v43  ;;  %v4440_v42 = vld [vmem:[#allocation19 + $0x148] sm:$0xff] }
 0x1b7   :  { %1052 = vmatpush.msra.mxu1 %v4416_v45  ;;  %1020 = vmatpush.msrb.mxu3 %v4425_v49 }
 0x1b8   :  { %852 = vmatpush.msra.mxu2 %v4421_v48  ;;  %1230 = vmatpush.msrb.mxu0 %v4449_v8  ;;  %v801_v48 = vld [vmem:[%s5464_s3 + $0x70] sm:$0xff] }
 0x1b9   :  { %1053 = vmatpush.msra.mxu1 %v4427_v11  ;;  %1021 = vmatpush.msrb.mxu3 %v4438_v17 }
 0x1ba   :  { %853 = vmatpush.msra.mxu2 %v4431_v13  ;;  %1231 = vmatpush.msrb.mxu0 %v4463_v10  ;;  %v4510_v13 = vld [vmem:[#allocation19] sm:$0xff] }
 0x1bb   :  { %1054 = vmatpush.msra.mxu1 %v4440_v42  ;;  %1022 = vmatpush.msrb.mxu3 %v4452_v21  ;;  %5502 = vst [vmem:[#allocation83_spill] sm:$0xff] %v4510_v13 }
 0x1bc   :  { %854 = vmatpush.msra.mxu2 %v4445_v7  ;;  %1232 = vmatpush.msrb.mxu0 %v4481_v59  ;;  %v4507_v7 = vld [vmem:[#allocation19 + $0xd0] sm:$0xff] }
 0x1bd   :  { %879 = vmatmul.f32.vlgmr.msrb.gmra.mxu1 %v5497_v4  ;;  %1023 = vmatpush.msrb.mxu3 %v4466_v6 }
 0x1be   :  { %855 = vmatpush.msra.mxu2 %v4457_v16  ;;  %1055 = vmatpush.msra.mxu1 %v4460_v9  ;;  %v4502_v16 = vld [vmem:[#allocation19 + $0x18] sm:$0xff] }
 0x1bf   :  { %1024 = vmatpush.msrb.mxu3 %v4477_v61  ;;  %1233 = vmatpush.msrb.mxu0 %v807_v51  ;;  %5501 = vst [vmem:[#allocation82_spill] sm:$0xff] %v4502_v16 }
 0x1c0   :  { %856 = vmatpush.msra.mxu2 %v4472_v2  ;;  %1056 = vmatpush.msra.mxu1 %v4474_v63  ;;  %v804_v2 = vld [vmem:[%s5464_s3 + $0x88] sm:$0xff] }
 0x1c1   :  { %1025 = vmatpush.msrb.mxu3 %v4491_v53  ;;  %1234 = vmatpush.msrb.mxu0 %v804_v2 }
 0x1c2   :  { %857 = vmatpush.msra.mxu2 %v4485_v57  ;;  %1057 = vmatpush.msra.mxu1 %v4487_v55  ;;  %v4517_v57 = vld [vmem:[#allocation19 + $0xb8] sm:$0xff] }
 0x1c3   :  { %1026 = vmatpush.msrb.mxu3 %v4502_v16  ;;  %5503 = vst [vmem:[#allocation84_spill] sm:$0xff] %v4517_v57  ;;  %1235 = vmatpush.msrb.mxu0 %v801_v48  ;;  %v798_v16 = vld [vmem:[%s5464_s3 + $0x58] sm:$0xff] }
 0x1c4   :  { %858 = vmatpush.msra.mxu2 %v4497_v47  ;;  %1058 = vmatpush.msra.mxu1 %v4499_v30  ;;  %v4523_v47 = vld [vmem:[#allocation19 + $0xa0] sm:$0xff] }
 0x1c5   :  { %859 = vmatmul.f32.vlgmr.msra.gmra.mxu2 %v5497_v4  ;;  %1027 = vmatpush.msrb.mxu3 %v4510_v13  ;;  %v795_v13 = vld [vmem:[%s5464_s3 + $0x40] sm:$0xff] }
 0x1c6   :  { %883 = vmatpush.msrb.mxu2 %v4360_v25  ;;  %1059 = vmatpush.msra.mxu1 %v4507_v7  ;;  %v4529_v25 = vld [vmem:[#allocation19 + $0x88] sm:$0xff] }
 0x1c7   :  { %1028 = vmatmul.f32.vlgmr.msrb.gmra.mxu3 %v5497_v4  ;;  %1236 = vmatpush.msrb.mxu0 %v798_v16 }
 0x1c8   :  { %884 = vmatpush.msrb.mxu2 %v4371_v29  ;;  %1060 = vmatpush.msra.mxu1 %v4517_v57  ;;  %v4535_v29 = vld [vmem:[#allocation19 + $0x70] sm:$0xff]  ;;  %v792_v57 = vld [vmem:[%s5464_s3 + $0x28] sm:$0xff] }
 0x1c9   :  { %1204 = vmatpush.msra.mxu3 %v4166_v0  ;;  %1237 = vmatpush.msrb.mxu0 %v795_v13  ;;  %v4541_v0 = vld [vmem:[#allocation19 + $0x58] sm:$0xff] }
 0x1ca   :  { %885 = vmatpush.msrb.mxu2 %v4386_v35  ;;  %1061 = vmatpush.msra.mxu1 %v4523_v47  ;;  %v789_v35 = vld [vmem:[%s5464_s3 + $0x10] sm:$0xff] }
 0x1cb   :  { %1205 = vmatpush.msra.mxu3 %v4190_v12  ;;  %1238 = vmatpush.msrb.mxu0 %v792_v57  ;;  %v4547_v12 = vld [vmem:[#allocation19 + $0x40] sm:$0xff] }
 0x1cc   :  { %886 = vmatpush.msrb.mxu2 %v4397_v38  ;;  %1062 = vmatpush.msra.mxu1 %v4529_v25 }
 0x1cd   :  { %1206 = vmatpush.msra.mxu3 %v4207_v20  ;;  %1239 = vmatpush.msrb.mxu0 %v789_v35  ;;  %v4552_v20 = vld [vmem:[#allocation19 + $0x28] sm:$0xff] }
 0x1ce   :  { %887 = vmatpush.msrb.mxu2 %v4406_v41  ;;  %1063 = vmatpush.msra.mxu1 %v4535_v29 }
 0x1cf   :  { %1207 = vmatpush.msra.mxu3 %v4225_v26  ;;  %v4557_v26 = vld [vmem:[#allocation19 + $0x10] sm:$0xff] }
 0x1d0   :  { %888 = vmatpush.msrb.mxu2 %v4435_v40  ;;  %1064 = vmatpush.msra.mxu1 %v4541_v0 }
 0x1d1   :  { %1208 = vmatpush.msra.mxu3 %v4237_v32  ;;  %v5506_v32 = vld [vmem:[#allocation84_spill] sm:$0xff] }
 0x1d2   :  { %889 = vmatpush.msrb.mxu2 %v4449_v8  ;;  %1065 = vmatpush.msra.mxu1 %v4547_v12  ;;  %v5504_v8 = vld [vmem:[#allocation82_spill] sm:$0xff] }
 0x1d3   :  { %1209 = vmatpush.msra.mxu3 %v4246_v46  ;;  %v5507_v46 = vld [vmem:[#allocation83_spill] sm:$0xff] }
 0x1d4   :  { %890 = vmatpush.msrb.mxu2 %v4463_v10  ;;  %1066 = vmatpush.msra.mxu1 %v4552_v20  ;;  %v5529_v10 = vld [vmem:[#allocation73_spill] sm:$0xff] }
 0x1d5   :  { %1210 = vmatpush.msra.mxu3 %v4253_v50  ;;  %v5508_v50 = vld [vmem:[#allocation76_spill] sm:$0xff] }
 0x1d6   :  { %891 = vmatpush.msrb.mxu2 %v4481_v59  ;;  %1067 = vmatpush.msra.mxu1 %v4557_v26  ;;  %v5521_v59 = vld [vmem:[#allocation65_spill] sm:$0xff] }
 0x1d7   :  { %1211 = vmatpush.msra.mxu3 %v4260_v52  ;;  %1068 = vmatmul.f32.vlgmr.msra.gmra.mxu1 %v5497_v4  ;;  %v5512_v52 = vld [vmem:[#allocation80_spill] sm:$0xff] }
 0x1d8   :  { %892 = vmatpush.msrb.mxu2 %v807_v51  ;;  %1354 = vmatpush.msrb.mxu1 %v4330_v15  ;;  %v5509_v51 = vld [vmem:[#allocation77_spill] sm:$0xff] }
 0x1d9   :  { %1212 = vmatpush.msra.mxu3 %v4267_v54  ;;  %v5516_v54 = vld [vmem:[#allocation60_spill] sm:$0xff] }
 0x1da   :  { %893 = vmatpush.msrb.mxu2 %v804_v2  ;;  %1355 = vmatpush.msrb.mxu1 %v4342_v19  ;;  %v605_v2 = vld [vmem:[%s5514_s9] sm:$0x7] }
 0x1db   :  { %1213 = vmatpush.msra.mxu3 %v4274_v56  ;;  %v5518_v56 = vld [vmem:[#allocation62_spill] sm:$0xff] }
 0x1dc   :  { %894 = vmatpush.msrb.mxu2 %v801_v48  ;;  %1356 = vmatpush.msrb.mxu1 %v4352_v23 }
 0x1dd   :  { %1214 = vmatpush.msra.mxu3 %v4281_v58  ;;  %v5520_v58 = vld [vmem:[#allocation64_spill] sm:$0xff] }
 0x1de   :  { %895 = vmatpush.msrb.mxu2 %v798_v16  ;;  %1357 = vmatpush.msrb.mxu1 %v4363_v27  ;;  %v608_v16 = vperm.slane %v605_v2, 1 }
 0x1df   :  { %1215 = vmatpush.msra.mxu3 %v4287_v60  ;;  %v5522_v60 = vld [vmem:[#allocation66_spill] sm:$0xff] }
 0x1e0   :  { %896 = vmatpush.msrb.mxu2 %v795_v13  ;;  %1358 = vmatpush.msrb.mxu1 %v4374_v31  ;;  %v708_v31 = vld [vmem:[#allocation21] sm:$0x7] }
 0x1e1   :  { %1216 = vmatpush.msra.mxu3 %v4294_v62  ;;  %v5524_v62 = vld [vmem:[#allocation68_spill] sm:$0xff]  ;;  %v710_v38 = vperm.slane %v708_v31, 0  ;;  %v712_v41 = vperm.slane %v708_v31, 2 }
 0x1e2   :  { %897 = vmatpush.msrb.mxu2 %v792_v57  ;;  %1359 = vmatpush.msrb.mxu1 %v4382_v34  ;;  %v5519_v57 = vld [vmem:[#allocation63_spill] sm:$0xff] }
 0x1e3   :  { %1217 = vmatpush.msra.mxu3 %v4300_v1  ;;  %v5526_v1 = vld [vmem:[#allocation70_spill] sm:$0xff] }
 0x1e4   :  { %898 = vmatpush.msrb.mxu2 %v789_v35  ;;  %1360 = vmatpush.msrb.mxu1 %v4394_v37  ;;  %v4641_v37 = vld [vmem:[%s5531_s10] sm:$0x7]  ;;  %v4648_v35 = vld [vmem:[#allocation22] sm:$0x7] }
 0x1e5   :  { %899 = vmatmul.f32.vlgmr.msrb.gmra.mxu2 %v5497_v4  ;;  %1218 = vmatpush.msra.mxu3 %v4307_v3  ;;  %v5527_v3 = vld [vmem:[#allocation71_spill] sm:$0xff] }
 0x1e6   :  { %1184 = vmatpush.msra.mxu2 %v4328_v14  ;;  %1361 = vmatpush.msrb.mxu1 %v4414_v44  ;;  %v5530_v14 = vld [vmem:[#allocation74_spill] sm:$0xff] }
 0x1e7   :  { %1219 = vmatpush.msra.mxu3 %v4314_v5  ;;  %v5528_v5 = vld [vmem:[#allocation72_spill] sm:$0xff] }
 0x1e8   :  { %1185 = vmatpush.msra.mxu2 %v4338_v18  ;;  %1362 = vmatpush.msrb.mxu1 %v4425_v49  ;;  %v607_v18 = vperm.slane %v605_v2, 0 }
 0x1e9   :  { %1394 = vmatpush.msrb.mxu3 %v4416_v45 }
 0x1ea   :  { %1186 = vmatpush.msra.mxu2 %v4348_v22  ;;  %1363 = vmatpush.msrb.mxu1 %v4438_v17  ;;  %v5505_v17 = vld [vmem:[#allocation75_spill] sm:$0xff] }
 0x1eb   :  { %1395 = vmatpush.msrb.mxu3 %v4427_v11 }
 0x1ec   :  { %1187 = vmatpush.msra.mxu2 %v4356_v24  ;;  %1364 = vmatpush.msrb.mxu1 %v4452_v21 }
 0x1ed   :  { %1396 = vmatpush.msrb.mxu3 %v4440_v42 }
 0x1ee   :  { %1188 = vmatpush.msra.mxu2 %v4368_v28  ;;  %1365 = vmatpush.msrb.mxu1 %v4466_v6  ;;  %v609_v6 = vperm.slane %v605_v2, 2 }
 0x1ef   :  { %1397 = vmatpush.msrb.mxu3 %v4460_v9 }
 0x1f0   :  { %1189 = vmatpush.msra.mxu2 %v4379_v33  ;;  %1366 = vmatpush.msrb.mxu1 %v4477_v61  ;;  %v5523_v61 = vld [vmem:[#allocation67_spill] sm:$0xff] }
 0x1f1   :  { %1398 = vmatpush.msrb.mxu3 %v4474_v63  ;;  %v5525_v63 = vld [vmem:[#allocation69_spill] sm:$0xff] }
 0x1f2   :  { %1190 = vmatpush.msra.mxu2 %v4390_v36  ;;  %1367 = vmatpush.msrb.mxu1 %v4491_v53  ;;  %v5513_v53 = vld [vmem:[#allocation81_spill] sm:$0xff] }
 0x1f3   :  { %1399 = vmatpush.msrb.mxu3 %v4487_v55  ;;  %v5517_v55 = vld [vmem:[#allocation61_spill] sm:$0xff] }
 0x1f4   :  { %1191 = vmatpush.msra.mxu2 %v4401_v39  ;;  %1368 = vmatpush.msrb.mxu1 %v5504_v8  ;;  %v711_v39 = vperm.slane %v708_v31, 1 }
 0x1f5   :  { %1400 = vmatpush.msrb.mxu3 %v4499_v30  ;;  %v5510_v30 = vld [vmem:[#allocation78_spill] sm:$0xff] }
 0x1f6   :  { %1192 = vmatpush.msra.mxu2 %v4410_v43  ;;  %1369 = vmatpush.msrb.mxu1 %v5507_v46  ;;  %v838_v43 = vperm.slane %v4641_v37, 1  ;;  %v837_v46 = vperm.slane %v4641_v37, 0 }
 0x1f7   :  { %1401 = vmatpush.msrb.mxu3 %v4507_v7  ;;  %v5511_v7 = vld [vmem:[#allocation79_spill] sm:$0xff] }
 0x1f8   :  { %1193 = vmatpush.msra.mxu2 %v5505_v17 }
 0x1f9   :  { %1402 = vmatpush.msrb.mxu3 %v5506_v32 }
 0x1fa   :  { %1194 = vmatpush.msra.mxu2 %v5508_v50 }
 0x1fb   :  { %1403 = vmatpush.msrb.mxu3 %v4523_v47  ;;  %v5515_v47 = vld [vmem:[#allocation59_spill] sm:$0xff] }
 0x1fc   :  { %1195 = vmatpush.msra.mxu2 %v5509_v51 }
 0x1fd   :  { %1404 = vmatpush.msrb.mxu3 %v4529_v25 }
 0x1fe   :  { %1196 = vmatpush.msra.mxu2 %v5510_v30 }
 0x1ff   :  { %1405 = vmatpush.msrb.mxu3 %v4535_v29 }
 0x200   :  { %1197 = vmatpush.msra.mxu2 %v5511_v7  ;;  %v1006_v7 = vperm.slane %v4648_v35, 0 }
 0x201   :  { %1406 = vmatpush.msrb.mxu3 %v4541_v0 }
 0x202   :  { %1198 = vmatpush.msra.mxu2 %v5512_v52 }
 0x203   :  { %1407 = vmatpush.msrb.mxu3 %v4547_v12 }
 0x204   :  { %1199 = vmatpush.msra.mxu2 %v5513_v53 }
 0x205   :  { %1408 = vmatpush.msrb.mxu3 %v4552_v20  ;;  %v1007_v20 = vperm.slane %v4648_v35, 1 }
 0x206   :  { %1374 = vmatpush.msrb.mxu2 %v5515_v47 }
 0x207   :  { %1409 = vmatpush.msrb.mxu3 %v4557_v26 }
 0x208   :  { %1375 = vmatpush.msrb.mxu2 %v5516_v54 }
 0x20a   :  { %1376 = vmatpush.msrb.mxu2 %v5517_v55 }
 0x20c   :  { %1377 = vmatpush.msrb.mxu2 %v5518_v56 }
 0x20e   :  { %1378 = vmatpush.msrb.mxu2 %v5519_v57 }
 0x210   :  { %1379 = vmatpush.msrb.mxu2 %v5520_v58 }
 0x212   :  { %1380 = vmatpush.msrb.mxu2 %v5521_v59 }
 0x214   :  { %1381 = vmatpush.msrb.mxu2 %v5522_v60 }
 0x216   :  { %1382 = vmatpush.msrb.mxu2 %v5523_v61 }
 0x218   :  { %1383 = vmatpush.msrb.mxu2 %v5524_v62 }
 0x21a   :  { %1384 = vmatpush.msrb.mxu2 %v5525_v63 }
 0x21c   :  { %1385 = vmatpush.msrb.mxu2 %v5526_v1 }
 0x21e   :  { %1386 = vmatpush.msrb.mxu2 %v5527_v3 }
 0x220   :  { %1387 = vmatpush.msrb.mxu2 %v5528_v5 }
 0x222   :  { %1388 = vmatpush.msrb.mxu2 %v5529_v10  ;;  %v673_v9 = vpop.f32.mrf.mxu0 }
 0x223   :  { %v674_v15 = vadd.f32 %v673_v9, %v609_v6 }
 0x224   :  { %1389 = vmatpush.msrb.mxu2 %v5530_v14 }
 0x225   :  { %683 = vst [vmem:[#allocation2 + $0x8] sm:$0x7] %v674_v15 }
 0x227   :  { %v633_v19 = vpop.f32.mrf.mxu2  ;;  %v653_v21 = vpop.f32.mrf.mxu3 }
 0x228   :  { %v654_v22 = vadd.f32 %v653_v21, %v608_v16  ;;  %v634_v23 = vadd.f32 %v633_v19, %v607_v18 }
 0x22a   :  { %v678_v27 = vrot.slane %v654_v22, 4  ;;  %v1049_v26 = vpop.f32.mrf.mxu0 }
 0x22b   :  { %v1050_v17 = vadd.f32 %v1049_v26, %v1007_v20 }
 0x22c   :  { %v680_v28 = vsel %vm679_vm4, %v634_v23, %v678_v27  ;;  %v1515_v23 = vld [vmem:[%s5464_s3 + $0x168] sm:$0xff]  ;;  %v1512_v27 = vld [vmem:[%s5464_s3 + $0x150] sm:$0xff] }
 0x22d   :  { %682 = vst [vmem:[#allocation2] sm:$0x77] %v680_v28  ;;  %1526 = vmatpush.msra.mxu0 %v1515_v23  ;;  %v1504_v23 = vld [vmem:[%s5464_s3 + $0x110] sm:$0xff] }
 0x22f   :  { %1527 = vmatpush.msra.mxu0 %v1512_v27  ;;  %v1501_v27 = vld [vmem:[%s5464_s3 + $0xf8] sm:$0xff] }
 0x232   :  { %v736_v34 = vpop.f32.mrf.mxu1 }
 0x233   :  { %v737_v48 = vadd.f32 %v736_v34, %v710_v38  ;;  %v1008_v38 = vperm.slane %v4648_v35, 2 }
 0x234   :  { %v4644_v45 = vld [vmem:[#allocation2] ss:$4 sm:$0x7] }
 0x235   :  { %v924_v29 = vrot.slane %v4644_v45, 1 }
 0x238   :  { %v756_v44 = vpop.f32.mrf.mxu2 }
 0x239   :  { %v757_v49 = vadd.f32 %v756_v44, %v711_v39  ;;  %v776_v11 = vpop.f32.mrf.mxu3  ;;  %v1509_v44 = vld [vmem:[%s5464_s3 + $0x138] sm:$0xff] }
 0x23a   :  { %v777_v13 = vadd.f32 %v776_v11, %v712_v41  ;;  %v880_v40 = vpop.f32.mrf.mxu1  ;;  %v839_v41 = vperm.slane %v4641_v37, 2  ;;  %1528 = vmatpush.msra.mxu0 %v1509_v44  ;;  %v1473_v44 = vld [vmem:[%s5464_s3 + $0x18] sm:$0xff] }
 0x23b   :  { %v781_v42 = vrot.slane %v757_v49, 4  ;;  %v881_v25 = vadd.f32 %v880_v40, %v838_v43  ;;  %v947_v43 = vrot.slane %v4644_v45, 2 }
 0x23c   :  { %785 = vst [vmem:[#allocation3 + $0x8] sm:$0x7] %v777_v13  ;;  %1529 = vmatpush.msra.mxu0 %v4356_v24 }
 0x23d   :  { %v782_v0 = vsel %vm679_vm4, %v737_v48, %v781_v42  ;;  %v926_v12 = vadd.f32 %v924_v29, %v881_v25 }
 0x23e   :  { %784 = vst [vmem:[#allocation3] sm:$0x77] %v782_v0 }
 0x23f   :  { %v3028_v8 = vmul.f32 -1.442695, %v926_v12 }
 0x241   :  { %3162 = vpow2.f32 %v3028_v8 }
 0x245   :  { %v4651_v32 = vld [vmem:[#allocation3] ss:$4 sm:$0x7] }
 0x246   :  { %v1093_v50 = vrot.slane %v4651_v32, 1  ;;  %v1116_v37 = vrot.slane %v4651_v32, 2 }
 0x247   :  { %v3163_v56 = vpop.eup %3162 }
 0x248   :  { %v1095_v51 = vadd.f32 %v1093_v50, %v1050_v17  ;;  %v860_v30 = vpop.f32.mrf.mxu2  ;;  %v4658_v59 = vadd.f32 1.0, %v3163_v56 }
 0x249   :  { %v861_v52 = vadd.f32 %v860_v30, %v837_v46 }
 0x24a   :  { %v3030_v53 = vmul.f32 -1.442695, %v1095_v51  ;;  %v1029_v54 = vpop.f32.mrf.mxu3  ;;  %v942_v26 = vand.u32 2147483648, %v4658_v59  ;;  %vm936_vm6 = vweird.f32 %v4658_v59 }
 0x24b   :  { %v903_v47 = vadd.f32 %v861_v52, %v4644_v45  ;;  %v1030_v55 = vadd.f32 %v1029_v54, %v1006_v7 }
 0x24c   :  { %3164 = vpow2.f32 %v3030_v53  ;;  %v940_v53 = vand.u32 2147483647, %v4658_v59  ;;  %v943_v56 = vor.u32 1.1754944e-38, %v942_v26  ;;  %v1511_v26 = vld [vmem:[%s5464_s3 + $0x148] sm:$0xff] }
 0x24d   :  { %v3027_v57 = vmul.f32 -1.442695, %v903_v47  ;;  %v1072_v58 = vadd.f32 %v1030_v55, %v4651_v32 }
 0x24f   :  { %3166 = vpow2.f32 %v3027_v57  ;;  %v3029_v60 = vmul.f32 -1.442695, %v1072_v58 }
 0x251   :  { %3168 = vpow2.f32 %v3029_v60 }
 0x252   :  { %v3165_v61 = vpop.eup %3164  ;;  %3170 = vrcp.f32 %v4658_v59 }
 0x253   :  { %v4660_v62 = vadd.f32 1.0, %v3165_v61 }
 0x254   :  { %v1069_v49 = vpop.f32.mrf.mxu1 }
 0x255   :  { %v3167_v63 = vpop.eup %3166  ;;  %3172 = vrcp.f32 %v4660_v62  ;;  %v1070_v45 = vadd.f32 %v1069_v49, %v1008_v38  ;;  %vm1105_vm2 = vweird.f32 %v4660_v62  ;;  %v1111_v7 = vand.u32 2147483648, %v4660_v62  ;;  %v1479_v38 = vld [vmem:[%s5464_s3 + $0x48] sm:$0xff] }
 0x256   :  { %v907_v1 = vadd.f32 1.0, %v3167_v63  ;;  %v1109_v24 = vand.u32 2147483647, %v4660_v62  ;;  %v4734_v49 = vld [vmem:[#allocation22] sm:$0x7] }
 0x257   :  { %v3169_v2 = vpop.eup %3168  ;;  %v1112_v58 = vor.u32 1.1754944e-38, %v1111_v7  ;;  %v4750_v7 = vld [vmem:[#allocation2 + $0x1] ss:$4 sm:$0x7] }
 0x258   :  { %3174 = vrcp.f32 %v907_v1  ;;  %v1076_v3 = vadd.f32 1.0, %v3169_v2  ;;  %v4664_v5 = vpop.eup %3170  ;;  %v919_v22 = vand.u32 2147483648, %v907_v1  ;;  %v917_v34 = vand.u32 2147483647, %v907_v1 }
 0x259   :  { %v932_v10 = vmul.f32 %v4664_v5, %v4658_v59  ;;  %vm913_vm14 = vweird.f32 %v907_v1  ;;  %vm937_vm15 = vweird.f32 %v4664_v5 }
 0x25a   :  { %3176 = vrcp.f32 %v1076_v3  ;;  %v1088_v11 = vand.u32 2147483648, %v1076_v3  ;;  %v1086_v42 = vand.u32 2147483647, %v1076_v3  ;;  %v920_v25 = vor.u32 1.1754944e-38, %v919_v22  ;;  %vm938_vm4 = vmor %vm936_vm6, %vm937_vm15  ;;  %v1491_v22 = vld [vmem:[%s5464_s3 + $0xa8] sm:$0xff] }
 0x25b   :  { %v4666_v6 = vpop.eup %3172  ;;  %v933_v18 = vsub.f32 1.0, %v932_v10  ;;  %vm918_vm1 = vcmp.eq.f32.partialorder %v917_v34, 8.507059e+37  ;;  %vm1082_vm13 = vweird.f32 %v1076_v3  ;;  %v1495_v34 = vld [vmem:[%s5464_s3 + $0xc8] sm:$0xff] }
 0x25c   :  { %v1101_v14 = vmul.f32 %v4666_v6, %v4660_v62  ;;  %v1089_v8 = vor.u32 1.1754944e-38, %v1088_v11  ;;  %vm1087_vm5 = vcmp.eq.f32.partialorder %v1086_v42, 8.507059e+37  ;;  %vm1106_vm12 = vweird.f32 %v4666_v6  ;;  %v1470_v11 = vld [vmem:[%s5464_s3] sm:$0xff]  ;;  %v1517_v42 = vld [vmem:[%s5464_s3 + $0x178] sm:$0xff] }
 0x25d   :  { %v934_v48 = vmul.f32 %v4664_v5, %v933_v18  ;;  %v1510_v18 = vld [vmem:[%s5464_s3 + $0x140] sm:$0xff] }
 0x25e   :  { %v3175_v9 = vpop.eup %3174  ;;  %v1102_v28 = vsub.f32 1.0, %v1101_v14  ;;  %v1503_v14 = vld [vmem:[%s5464_s3 + $0x108] sm:$0xff] }
 0x25f   :  { %v909_v15 = vmul.f32 %v3175_v9, %v907_v1  ;;  %vm914_vm9 = vweird.f32 %v3175_v9  ;;  %v935_v46 = vadd.f32 %v4664_v5, %v934_v48  ;;  %1530 = vmatpush.msra.mxu0 %v1503_v14  ;;  %v1486_v48 = vld [vmem:[%s5464_s3 + $0x80] sm:$0xff]  ;;  %v1265_v14 = vrot.slane %v4750_v7, 1 }
 0x260   :  { %v3177_v16 = vpop.eup %3176  ;;  %vm915_vm11 = vmor %vm913_vm14, %vm914_vm9  ;;  %v1103_v29 = vmul.f32 %v4666_v6, %v1102_v28  ;;  %vm941_vm14 = vcmp.eq.f32.partialorder %v940_v53, 8.507059e+37  ;;  %v1498_v28 = vld [vmem:[%s5464_s3 + $0xe0] sm:$0xff]  ;;  %v1677_v53 = vld [vmem:[#allocation19 + $0x128] sm:$0xff] }
 0x261   :  { %v910_v19 = vsub.f32 1.0, %v909_v15  ;;  %v1078_v21 = vmul.f32 %v3177_v16, %v1076_v3  ;;  %vm1083_vm7 = vweird.f32 %v3177_v16  ;;  %vm1107_vm9 = vmor %vm1105_vm2, %vm1106_vm12  ;;  %v939_v55 = vsel %vm938_vm4, %v4664_v5, %v935_v46  ;;  %v1516_v15 = vld [vmem:[%s5464_s3 + $0x170] sm:$0xff]  ;;  %1531 = vmatpush.msra.mxu0 %v4379_v33  ;;  %v1474_v46 = vld [vmem:[%s5464_s3 + $0x20] sm:$0xff] }
 0x262   :  { %vm1084_vm10 = vmor %vm1082_vm13, %vm1083_vm7  ;;  %v1104_v51 = vadd.f32 %v4666_v6, %v1103_v29  ;;  %vm1110_vm7 = vcmp.eq.f32.partialorder %v1109_v24, 8.507059e+37  ;;  %v944_v59 = vsel %vm941_vm14, %v943_v56, %v939_v55  ;;  %1546 = vmatpush.msra.mxu1 %v1516_v15  ;;  %v1488_v33 = vld [vmem:[%s5464_s3 + $0x90] sm:$0xff]  ;;  %v1667_v15 = vld [vmem:[#allocation19 + $0xd8] sm:$0xff] }
 0x263   :  { %v911_v31 = vmul.f32 %v3175_v9, %v910_v19  ;;  %v1079_v39 = vsub.f32 1.0, %v1078_v21  ;;  %v951_v61 = vsub.f32 1.0, %v944_v59  ;;  %v953_v3 = vmul.f32 0.0, %v944_v59  ;;  %1532 = vmatpush.msra.mxu0 %v4390_v36  ;;  %v1494_v19 = vld [vmem:[%s5464_s3 + $0xc0] sm:$0xff]  ;;  %v1507_v21 = vld [vmem:[%s5464_s3 + $0x128] sm:$0xff]  ;;  %v1485_v36 = vld [vmem:[%s5464_s3 + $0x78] sm:$0xff] }
 0x264   :  { %v1108_v57 = vsel %vm1107_vm9, %v4666_v6, %v1104_v51  ;;  %v1480_v29 = vld [vmem:[%s5464_s3 + $0x50] sm:$0xff]  ;;  %v1687_v59 = vld [vmem:[#allocation19 + $0x178] sm:$0xff] }
 0x265   :  { %v912_v13 = vadd.f32 %v3175_v9, %v911_v31  ;;  %v1080_v40 = vmul.f32 %v3177_v16, %v1079_v39  ;;  %v1113_v60 = vsel %vm1110_vm7, %v1112_v58, %v1108_v57  ;;  %1533 = vmatpush.msra.mxu0 %v1494_v19  ;;  %v1482_v31 = vld [vmem:[%s5464_s3 + $0x60] sm:$0xff]  ;;  %v1492_v39 = vld [vmem:[%s5464_s3 + $0xb0] sm:$0xff]  ;;  %v1505_v57 = vld [vmem:[%s5464_s3 + $0x118] sm:$0xff] }
 0x266   :  { %v1120_v1 = vsub.f32 1.0, %v1113_v60  ;;  %v1122_v5 = vmul.f32 0.0, %v1113_v60  ;;  %v1673_v55 = vld [vmem:[#allocation19 + $0x108] sm:$0xff]  ;;  %v1674_v58 = vld [vmem:[#allocation19 + $0x110] sm:$0xff] }
 0x267   :  { %v916_v0 = vsel %vm915_vm11, %v3175_v9, %v912_v13  ;;  %v1081_v35 = vadd.f32 %v3177_v16, %v1080_v40  ;;  %1534 = vmatpush.msra.mxu0 %v1491_v22  ;;  %v1483_v13 = vld [vmem:[%s5464_s3 + $0x68] sm:$0xff]  ;;  %v1670_v60 = vld [vmem:[#allocation19 + $0xf0] sm:$0xff] }
 0x268   :  { %v900_v12 = vpop.f32.mrf.mxu2  ;;  %v921_v20 = vsel %vm918_vm1, %v920_v25, %v916_v0  ;;  %v1685_v40 = vld [vmem:[#allocation19 + $0x168] sm:$0xff]  ;;  %v1686_v25 = vld [vmem:[#allocation19 + $0x170] sm:$0xff]  ;;  %v1348_v0 = vperm.slane %v4734_v49, 0 }
 0x269   :  { %v901_v17 = vadd.f32 %v900_v12, %v839_v41  ;;  %v1085_v32 = vsel %vm1084_vm10, %v3177_v16, %v1081_v35  ;;  %v1513_v16 = vld [vmem:[%s5464_s3 + $0x158] sm:$0xff]  ;;  %1535 = vmatpush.msra.mxu0 %v1488_v33  ;;  %v1476_v41 = vld [vmem:[%s5464_s3 + $0x30] sm:$0xff] }
 0x26a   :  { %v1090_v50 = vsel %vm1087_vm5, %v1089_v8, %v1085_v32  ;;  %1547 = vmatpush.msra.mxu1 %v1513_v16  ;;  %v1683_v35 = vld [vmem:[#allocation19 + $0x158] sm:$0xff]  ;;  %v1680_v8 = vld [vmem:[#allocation19 + $0x140] sm:$0xff]  ;;  %v1681_v19 = vld [vmem:[#allocation19 + $0x148] sm:$0xff] }
 0x26b   :  { %v946_v30 = vmul.f32 %v921_v20, %v901_v17  ;;  %v1115_v52 = vmul.f32 %v1090_v50, %v1070_v45  ;;  %1536 = vmatpush.msra.mxu0 %v1485_v36  ;;  %v1514_v45 = vld [vmem:[%s5464_s3 + $0x160] sm:$0xff]  ;;  %v1477_v12 = vld [vmem:[%s5464_s3 + $0x38] sm:$0xff]  ;;  %v4744_v17 = vld [vmem:[#allocation3 + $0x1] ss:$4 sm:$0x7] }
 0x26c   :  { %1548 = vmatpush.msra.mxu1 %v1510_v18  ;;  %v1679_v20 = vld [vmem:[#allocation19 + $0x138] sm:$0xff]  ;;  %v1676_v50 = vld [vmem:[#allocation19 + $0x120] sm:$0xff]  ;;  %v1496_v33 = vld [vmem:[%s5464_s3 + $0xd0] sm:$0xff] }
 0x26d   :  { %v949_v47 = vadd.f32 %v947_v43, %v946_v30  ;;  %v1118_v54 = vadd.f32 %v1116_v37, %v1115_v52  ;;  %1537 = vmatpush.msra.mxu0 %v1482_v31  ;;  %v1489_v43 = vld [vmem:[%s5464_s3 + $0x98] sm:$0xff]  ;;  %v4748_v30 = vld [vmem:[%s5531_s10] sm:$0x7]  ;;  %v1508_v52 = vld [vmem:[%s5464_s3 + $0x130] sm:$0xff] }
 0x26e   :  { %1549 = vmatpush.msra.mxu1 %v1507_v21  ;;  %v1682_v37 = vld [vmem:[#allocation19 + $0x150] sm:$0xff]  ;;  %v1178_v24 = vperm.slane %v4748_v30, 0  ;;  %v1499_v16 = vld [vmem:[%s5464_s3 + $0xe8] sm:$0xff] }
 0x26f   :  { %3178 = vtanh.f32 %v949_v47  ;;  %1538 = vmatpush.msra.mxu0 %v1479_v38  ;;  %v1179_v47 = vperm.slane %v4748_v30, 1  ;;  %v1668_v18 = vld [vmem:[#allocation19 + $0xe0] sm:$0xff]  ;;  %v1678_v36 = vld [vmem:[#allocation19 + $0x130] sm:$0xff]  ;;  %v1661_v38 = vld [vmem:[#allocation19 + $0xa8] sm:$0xff] }
 0x270   :  { %3180 = vtanh.f32 %v1118_v54  ;;  %1550 = vmatpush.msra.mxu1 %v1504_v23  ;;  %v1471_v54 = vld [vmem:[%s5464_s3 + $0x8] sm:$0xff] }
 0x271   :  { %1539 = vmatpush.msra.mxu0 %v1476_v41  ;;  %v1664_v23 = vld [vmem:[#allocation19 + $0xc0] sm:$0xff]  ;;  %v1662_v41 = vld [vmem:[#allocation19 + $0xb0] sm:$0xff] }
 0x272   :  { %1551 = vmatpush.msra.mxu1 %v1501_v27  ;;  %v1665_v27 = vld [vmem:[#allocation19 + $0xc8] sm:$0xff] }
 0x273   :  { %1540 = vmatpush.msra.mxu0 %v1473_v44  ;;  %v1658_v44 = vld [vmem:[#allocation19 + $0x90] sm:$0xff] }
 0x274   :  { %1552 = vmatpush.msra.mxu1 %v1498_v28 }
 0x275   :  { %v3179_v63 = vpop.eup %3178  ;;  %1541 = vmatpush.msra.mxu0 %v1470_v11 }
 0x276   :  { %v3181_v2 = vpop.eup %3180  ;;  %v952_v62 = vmul.f32 %v3179_v63, %v951_v61  ;;  %1553 = vmatpush.msra.mxu1 %v1495_v34  ;;  %v1349_v34 = vperm.slane %v4734_v49, 1 }
 0x277   :  { %v1121_v10 = vmul.f32 %v3181_v2, %v1120_v1  ;;  %v1502_v2 = vld [vmem:[%s5464_s3 + $0x100] sm:$0xff] }
 0x278   :  { %v4700_v9 = vadd.f32 %v953_v3, %v952_v62  ;;  %1554 = vmatpush.msra.mxu1 %v1492_v39  ;;  %v1671_v62 = vld [vmem:[#allocation19 + $0xf8] sm:$0xff]  ;;  %v1684_v3 = vld [vmem:[#allocation19 + $0x160] sm:$0xff] }
 0x279   :  { %v4702_v6 = vadd.f32 %v1122_v5, %v1121_v10  ;;  %v1493_v39 = vld [vmem:[%s5464_s3 + $0xb8] sm:$0xff] }
 0x27a   :  { %1124 = vst [vmem:[#allocation4] sm:$0x1] %v4700_v9  ;;  %1200 = vmatmul.f32.vlgmr.msra.gmra.mxu2 %v4700_v9  ;;  %1220 = vmatmul.f32.vlgmr.msra.gmra.mxu3 %v4700_v9 }
 0x27b   :  { %1125 = vst [vmem:[#allocation5] sm:$0x1] %v4702_v6  ;;  %1370 = vmatmul.f32.vlgmr.msrb.gmra.mxu1 %v4702_v6  ;;  %1240 = vmatmul.f32.vlgmr.msrb.gmra.mxu0 %v4700_v9 }
 0x27c   :  { %1555 = vmatpush.msra.mxu1 %v1489_v43  ;;  %1696 = vmatpush.msra.mxu3 %v1685_v40  ;;  %v1675_v43 = vld [vmem:[#allocation19 + $0x118] sm:$0xff] }
 0x27d   :  { %1566 = vmatpush.msra.mxu2 %v1517_v42  ;;  %1716 = vmatpush.msrb.mxu0 %v1686_v25  ;;  %v1659_v40 = vld [vmem:[#allocation19 + $0x98] sm:$0xff]  ;;  %v1672_v42 = vld [vmem:[#allocation19 + $0x100] sm:$0xff] }
 0x27e   :  { %1556 = vmatpush.msra.mxu1 %v1486_v48  ;;  %1697 = vmatpush.msra.mxu3 %v1682_v37  ;;  %v1435_v37 = vrot.slane %v4744_v17, 1 }
 0x27f   :  { %1567 = vmatpush.msra.mxu2 %v1514_v45  ;;  %1717 = vmatpush.msrb.mxu0 %v1683_v35  ;;  %v1487_v45 = vld [vmem:[%s5464_s3 + $0x88] sm:$0xff] }
 0x280   :  { %1557 = vmatpush.msra.mxu1 %v1483_v13  ;;  %1698 = vmatpush.msra.mxu3 %v1679_v20  ;;  %v1490_v13 = vld [vmem:[%s5464_s3 + $0xa0] sm:$0xff] }
 0x281   :  { %1568 = vmatpush.msra.mxu2 %v1511_v26  ;;  %1718 = vmatpush.msrb.mxu0 %v1680_v8  ;;  %v1656_v35 = vld [vmem:[#allocation19 + $0x80] sm:$0xff]  ;;  %v1484_v8 = vld [vmem:[%s5464_s3 + $0x70] sm:$0xff] }
 0x282   :  { %1390 = vmatmul.f32.vlgmr.msrb.gmra.mxu2 %v4702_v6  ;;  %1410 = vmatmul.f32.vlgmr.msrb.gmra.mxu3 %v4702_v6  ;;  %v1652_v26 = vld [vmem:[#allocation19 + $0x60] sm:$0xff] }
 0x283   :  { %1558 = vmatpush.msra.mxu1 %v1480_v29  ;;  %1699 = vmatpush.msra.mxu3 %v1676_v50  ;;  %v1649_v50 = vld [vmem:[#allocation19 + $0x48] sm:$0xff] }
 0x284   :  { %1569 = vmatpush.msra.mxu2 %v1508_v52  ;;  %1719 = vmatpush.msrb.mxu0 %v1677_v53 }
 0x285   :  { %1559 = vmatpush.msra.mxu1 %v1477_v12  ;;  %1700 = vmatpush.msra.mxu3 %v1673_v55  ;;  %v1669_v12 = vld [vmem:[#allocation19 + $0xe8] sm:$0xff] }
 0x286   :  { %1570 = vmatpush.msra.mxu2 %v1505_v57  ;;  %1720 = vmatpush.msrb.mxu0 %v1674_v58  ;;  %v1478_v57 = vld [vmem:[%s5464_s3 + $0x40] sm:$0xff] }
 0x287   :  { %1560 = vmatpush.msra.mxu1 %v1474_v46  ;;  %1701 = vmatpush.msra.mxu3 %v1670_v60  ;;  %v1666_v46 = vld [vmem:[#allocation19 + $0xd0] sm:$0xff]  ;;  %v1660_v60 = vld [vmem:[#allocation19 + $0xa0] sm:$0xff] }
 0x288   :  { %1571 = vmatpush.msra.mxu2 %v1502_v2  ;;  %1721 = vmatpush.msrb.mxu0 %v1671_v62  ;;  %v1644_v2 = vld [vmem:[#allocation19 + $0x20] sm:$0xff]  ;;  %v1657_v62 = vld [vmem:[#allocation19 + $0x88] sm:$0xff] }
 0x289   :  { %1561 = vmatpush.msra.mxu1 %v1471_v54  ;;  %1702 = vmatpush.msra.mxu3 %v1667_v15  ;;  %v1654_v15 = vld [vmem:[#allocation19 + $0x70] sm:$0xff] }
 0x28a   :  { %1572 = vmatpush.msra.mxu2 %v1499_v16  ;;  %1722 = vmatpush.msrb.mxu0 %v1668_v18 }
 0x28b   :  { %1736 = vmatpush.msrb.mxu1 %v1687_v59  ;;  %1703 = vmatpush.msra.mxu3 %v1664_v23  ;;  %v1647_v59 = vld [vmem:[#allocation19 + $0x38] sm:$0xff] }
 0x28c   :  { %1573 = vmatpush.msra.mxu2 %v1496_v33  ;;  %1723 = vmatpush.msrb.mxu0 %v1665_v27 }
 0x28d   :  { %1737 = vmatpush.msrb.mxu1 %v1684_v3  ;;  %1704 = vmatpush.msra.mxu3 %v1661_v38  ;;  %v1180_v38 = vperm.slane %v4748_v30, 2 }
 0x28e   :  { %1574 = vmatpush.msra.mxu2 %v1493_v39  ;;  %1724 = vmatpush.msrb.mxu0 %v1662_v41 }
 0x28f   :  { %1738 = vmatpush.msrb.mxu1 %v1681_v19  ;;  %1705 = vmatpush.msra.mxu3 %v1658_v44  ;;  %v1350_v19 = vperm.slane %v4734_v49, 2  ;;  %v1648_v49 = vld [vmem:[#allocation19 + $0x40] sm:$0xff] }
 0x290   :  { %1575 = vmatpush.msra.mxu2 %v1490_v13  ;;  %1725 = vmatpush.msrb.mxu0 %v1659_v40 }
 0x291   :  { %1739 = vmatpush.msrb.mxu1 %v1678_v36 }
 0x292   :  { %1576 = vmatpush.msra.mxu2 %v1487_v45  ;;  %1726 = vmatpush.msrb.mxu0 %v1656_v35 }
 0x293   :  { %1740 = vmatpush.msrb.mxu1 %v1675_v43 }
 0x294   :  { %1577 = vmatpush.msra.mxu2 %v1484_v8  ;;  %v1458_v8 = vrot.slane %v4744_v17, 2 }
 0x295   :  { %1741 = vmatpush.msrb.mxu1 %v1672_v42 }
 0x297   :  { %1742 = vmatpush.msrb.mxu1 %v1669_v12 }
 0x299   :  { %1743 = vmatpush.msrb.mxu1 %v1666_v46 }
 0x2f8   :  { %v1371_v32 = vpop.f32.mrf.mxu1 }
 0x2f9   :  { %v1372_v51 = vadd.f32 %v1371_v32, %v1348_v0  ;;  %v1655_v0 = vld [vmem:[#allocation19 + $0x78] sm:$0xff]  ;;  %v1653_v32 = vld [vmem:[#allocation19 + $0x68] sm:$0xff] }
 0x2fa   :  { %1706 = vmatpush.msra.mxu3 %v1655_v0  ;;  %1727 = vmatpush.msrb.mxu0 %v1653_v32  ;;  %v1241_v0 = vpop.f32.mrf.mxu0 }
 0x2fb   :  { %v1414_v56 = vadd.f32 %v1372_v51, %v4744_v17  ;;  %v1481_v51 = vld [vmem:[%s5464_s3 + $0x58] sm:$0xff]  ;;  %v1242_v32 = vadd.f32 %v1241_v0, %v1180_v38  ;;  %v1916_v38 = vld [vmem:[%s5532_s19 + $0x28] sm:$0xff] }
 0x2fc   :  { %1707 = vmatpush.msra.mxu3 %v1652_v26  ;;  %1578 = vmatpush.msra.mxu2 %v1481_v51  ;;  %v4863_v0 = vld [vmem:[#allocation24 + $0x38] sm:$0xff] }
 0x2fd   :  { %v3033_v61 = vmul.f32 -1.442695, %v1414_v56  ;;  %v1201_v63 = vpop.f32.mrf.mxu2  ;;  %v1221_v1 = vpop.f32.mrf.mxu3  ;;  %v1646_v56 = vld [vmem:[#allocation19 + $0x30] sm:$0xff] }
 0x2fe   :  { %v1202_v10 = vadd.f32 %v1201_v63, %v1178_v24  ;;  %v1222_v5 = vadd.f32 %v1221_v1, %v1179_v47  ;;  %v1650_v24 = vld [vmem:[#allocation19 + $0x50] sm:$0xff]  ;;  %v1663_v47 = vld [vmem:[#allocation19 + $0xb8] sm:$0xff]  ;;  %1708 = vmatpush.msra.mxu3 %v1649_v50  ;;  %v1475_v63 = vld [vmem:[%s5464_s3 + $0x28] sm:$0xff]  ;;  %1579 = vmatpush.msra.mxu2 %v1478_v57 }
 0x2ff   :  { %3182 = vpow2.f32 %v3033_v61  ;;  %1728 = vmatpush.msrb.mxu0 %v1650_v24  ;;  %1744 = vmatpush.msrb.mxu1 %v1663_v47  ;;  %v1643_v61 = vld [vmem:[#allocation19 + $0x18] sm:$0xff]  ;;  %v1288_v47 = vrot.slane %v4750_v7, 2 }
 0x300   :  { %v1244_v21 = vadd.f32 %v1202_v10, %v4750_v7  ;;  %v1267_v22 = vadd.f32 %v1265_v14, %v1222_v5  ;;  %1709 = vmatpush.msra.mxu3 %v1646_v56  ;;  %v1640_v10 = vld [vmem:[#allocation19] sm:$0xff]  ;;  %v1472_v5 = vld [vmem:[%s5464_s3 + $0x10] sm:$0xff]  ;;  %1580 = vmatpush.msra.mxu2 %v1475_v63  ;;  %s3568_s3 = scalar_lea.hbm %s3567_s17, 1 }
 0x301   :  { %1729 = vmatpush.msrb.mxu0 %v1647_v59  ;;  %1745 = vmatpush.msrb.mxu1 %v1660_v60  ;;  %v1641_v14 = vld [vmem:[#allocation19 + $0x8] sm:$0xff]  ;;  %p3569_p5 = scmp.ne.s32.totalorder %s3567_s17, %s3568_s3 }
 0x302   :  { %v3031_v28 = vmul.f32 -1.442695, %v1244_v21  ;;  %v3032_v31 = vmul.f32 -1.442695, %v1267_v22  ;;  %1710 = vmatpush.msra.mxu3 %v1643_v61  ;;  %1581 = vmatpush.msra.mxu2 %v1472_v5  ;;  %v1651_v21 = vld [vmem:[#allocation19 + $0x58] sm:$0xff] }
 0x303   :  { %1730 = vmatpush.msrb.mxu0 %v1644_v2  ;;  %1746 = vmatpush.msrb.mxu1 %v1657_v62 }
 0x304   :  { %3184 = vpow2.f32 %v3031_v28  ;;  %1711 = vmatpush.msra.mxu3 %v1640_v10 }
 0x305   :  { %v3183_v48 = vpop.eup %3182  ;;  %3186 = vpow2.f32 %v3032_v31  ;;  %v1391_v11 = vpop.f32.mrf.mxu2  ;;  %1731 = vmatpush.msrb.mxu0 %v1641_v14  ;;  %1747 = vmatpush.msrb.mxu1 %v1654_v15 }
 0x306   :  { %v4766_v25 = vadd.f32 1.0, %v3183_v48  ;;  %v1392_v29 = vadd.f32 %v1391_v11, %v1349_v34  ;;  %v1411_v33 = vpop.f32.mrf.mxu3  ;;  %v1645_v48 = vld [vmem:[#allocation19 + $0x28] sm:$0xff] }
 0x307   :  { %1748 = vmatpush.msrb.mxu1 %v1651_v21  ;;  %v1412_v43 = vadd.f32 %v1411_v33, %v1350_v19  ;;  %v1923_v33 = vld [vmem:[%s5532_s19 + $0x60] sm:$0xff] }
 0x308   :  { %3188 = vrcp.f32 %v4766_v25  ;;  %v1437_v20 = vadd.f32 %v1435_v37, %v1392_v29  ;;  %v1428_v36 = vand.u32 2147483647, %v4766_v25  ;;  %v1430_v28 = vand.u32 2147483648, %v4766_v25  ;;  %v1642_v37 = vld [vmem:[#allocation19 + $0x10] sm:$0xff] }
 0x309   :  { %vm1424_vm1 = vweird.f32 %v4766_v25  ;;  %1749 = vmatpush.msrb.mxu1 %v1648_v49  ;;  %v1917_v49 = vld [vmem:[%s5532_s19 + $0x30] sm:$0xff] }
 0x30a   :  { %v3185_v52 = vpop.eup %3184  ;;  %v3034_v53 = vmul.f32 -1.442695, %v1437_v20  ;;  %vm1429_vm15 = vcmp.eq.f32.partialorder %v1428_v36, 8.507059e+37  ;;  %v1431_v40 = vor.u32 1.1754944e-38, %v1430_v28  ;;  %v1921_v36 = vld [vmem:[%s5532_s19 + $0x50] sm:$0xff]  ;;  %v1920_v28 = vld [vmem:[%s5532_s19 + $0x48] sm:$0xff] }
 0x30b   :  { %v3187_v54 = vpop.eup %3186  ;;  %v4773_v55 = vadd.f32 1.0, %v3185_v52  ;;  %1750 = vmatpush.msrb.mxu1 %v1645_v48  ;;  %v1911_v48 = vld [vmem:[%s5532_s19] sm:$0xff] }
 0x30c   :  { %v4776_v58 = vadd.f32 1.0, %v3187_v54  ;;  %3190 = vpow2.f32 %v3034_v53 }
 0x30d   :  { %3192 = vrcp.f32 %v4773_v55  ;;  %v1260_v11 = vand.u32 2147483648, %v4773_v55  ;;  %v1258_v42 = vand.u32 2147483647, %v4773_v55  ;;  %vm1254_vm2 = vweird.f32 %v4773_v55  ;;  %1751 = vmatpush.msrb.mxu1 %v1642_v37  ;;  %v4860_v37 = vld [vmem:[#allocation24 + $0x30] sm:$0xff] }
 0x30e   :  { %v3189_v1 = vpop.eup %3188  ;;  %3194 = vrcp.f32 %v4776_v58  ;;  %v1283_v54 = vand.u32 2147483648, %v4776_v58  ;;  %vm1277_vm4 = vweird.f32 %v4776_v58  ;;  %v1281_v56 = vand.u32 2147483647, %v4776_v58 }
 0x30f   :  { %v1420_v3 = vmul.f32 %v3189_v1, %v4766_v25  ;;  %vm1425_vm11 = vweird.f32 %v3189_v1  ;;  %v1261_v26 = vor.u32 1.1754944e-38, %v1260_v11  ;;  %vm1259_vm12 = vcmp.eq.f32.partialorder %v1258_v42, 8.507059e+37  ;;  %v4842_v11 = vld [vmem:[#allocation24] sm:$0xff] }
 0x310   :  { %vm1426_vm13 = vmor %vm1424_vm1, %vm1425_vm11  ;;  %v1284_v63 = vor.u32 1.1754944e-38, %v1283_v54  ;;  %vm1282_vm1 = vcmp.eq.f32.partialorder %v1281_v56, 8.507059e+37  ;;  %v4854_v42 = vld [vmem:[#allocation24 + $0x20] sm:$0xff] }
 0x311   :  { %v1421_v16 = vsub.f32 1.0, %v1420_v3  ;;  %v1820_v54 = vld [vmem:[%s5533_s5 + $0x30] sm:$0xff] }
 0x312   :  { %v3191_v18 = vpop.eup %3190 }
 0x313   :  { %v3193_v22 = vpop.eup %3192  ;;  %v4784_v23 = vadd.f32 1.0, %v3191_v18  ;;  %v1422_v27 = vmul.f32 %v3189_v1, %v1421_v16 }
 0x314   :  { %v4788_v31 = vpop.eup %3194  ;;  %v1250_v34 = vmul.f32 %v3193_v22, %v4773_v55  ;;  %vm1255_vm10 = vweird.f32 %v3193_v22 }
 0x315   :  { %v1273_v39 = vmul.f32 %v4788_v31, %v4776_v58  ;;  %3196 = vrcp.f32 %v4784_v23  ;;  %v1423_v44 = vadd.f32 %v3189_v1, %v1422_v27  ;;  %vm1256_vm5 = vmor %vm1254_vm2, %vm1255_vm10  ;;  %vm1278_vm6 = vweird.f32 %v4788_v31  ;;  %v1922_v27 = vld [vmem:[%s5532_s19 + $0x58] sm:$0xff] }
 0x316   :  { %v1251_v41 = vsub.f32 1.0, %v1250_v34  ;;  %v1453_v17 = vand.u32 2147483648, %v4784_v23  ;;  %v1451_v60 = vand.u32 2147483647, %v4784_v23  ;;  %vm1279_vm14 = vmor %vm1277_vm4, %vm1278_vm6  ;;  %vm1447_vm7 = vweird.f32 %v4784_v23  ;;  %v1918_v34 = vld [vmem:[%s5532_s19 + $0x38] sm:$0xff] }
 0x317   :  { %v1274_v13 = vsub.f32 1.0, %v1273_v39  ;;  %v1427_v29 = vsel %vm1426_vm13, %v3189_v1, %v1423_v44  ;;  %v1915_v39 = vld [vmem:[%s5532_s19 + $0x20] sm:$0xff]  ;;  %v1912_v44 = vld [vmem:[%s5532_s19 + $0x8] sm:$0xff] }
 0x318   :  { %v1252_v30 = vmul.f32 %v3193_v22, %v1251_v41  ;;  %v1432_v35 = vsel %vm1429_vm15, %v1431_v40, %v1427_v29  ;;  %v1454_v1 = vor.u32 1.1754944e-38, %v1453_v17  ;;  %vm1452_vm13 = vcmp.eq.f32.partialorder %v1451_v60, 8.507059e+37  ;;  %v1914_v41 = vld [vmem:[%s5532_s19 + $0x18] sm:$0xff] }
 0x319   :  { %v1275_v45 = vmul.f32 %v4788_v31, %v1274_v13  ;;  %v1457_v12 = vmul.f32 %v1432_v35, %v1412_v43  ;;  %v1913_v43 = vld [vmem:[%s5532_s19 + $0x10] sm:$0xff]  ;;  %v4848_v40 = vld [vmem:[#allocation24 + $0x10] sm:$0xff] }
 0x31a   :  { %v1253_v25 = vadd.f32 %v3193_v22, %v1252_v30  ;;  %v4845_v13 = vld [vmem:[#allocation24 + $0x8] sm:$0xff]  ;;  %v4851_v30 = vld [vmem:[#allocation24 + $0x18] sm:$0xff] }
 0x31b   :  { %v3197_v20 = vpop.eup %3196  ;;  %v1460_v52 = vadd.f32 %v1458_v8, %v1457_v12  ;;  %v1276_v53 = vadd.f32 %v4788_v31, %v1275_v45  ;;  %v4857_v29 = vld [vmem:[#allocation24 + $0x28] sm:$0xff]  ;;  %v4866_v45 = vld [vmem:[#allocation24 + $0x40] sm:$0xff]  ;;  %v4876_v8 = vld [vmem:[#allocation24 + $0x50] sm:$0xff] }
 0x31c   :  { %v1257_v46 = vsel %vm1256_vm5, %v3193_v22, %v1253_v25  ;;  %v1443_v50 = vmul.f32 %v3197_v20, %v4784_v23  ;;  %vm1448_vm9 = vweird.f32 %v3197_v20  ;;  %v1926_v23 = vld [vmem:[%s5532_s19 + $0x78] sm:$0xff]  ;;  %v1828_v12 = vld [vmem:[%s5533_s5 + $0x70] sm:$0xff] }
 0x31d   :  { %v1262_v51 = vsel %vm1259_vm12, %v1261_v26, %v1257_v46  ;;  %3198 = vtanh.f32 %v1460_v52  ;;  %v1280_v61 = vsel %vm1279_vm14, %v4788_v31, %v1276_v53  ;;  %vm1449_vm11 = vmor %vm1447_vm7, %vm1448_vm9  ;;  %v1919_v31 = vld [vmem:[%s5532_s19 + $0x40] sm:$0xff]  ;;  %v4869_v35 = vld [vmem:[#allocation24 + $0x48] sm:$0xff] }
 0x31e   :  { %v1287_v24 = vmul.f32 %v1262_v51, %v1242_v32  ;;  %v1444_v55 = vsub.f32 1.0, %v1443_v50  ;;  %v1285_v58 = vsel %vm1282_vm1, %v1284_v63, %v1280_v61  ;;  %v1829_v25 = vld [vmem:[%s5533_s5 + $0x78] sm:$0xff]  ;;  %v1826_v26 = vld [vmem:[%s5533_s5 + $0x60] sm:$0xff]  ;;  %v1824_v46 = vld [vmem:[%s5533_s5 + $0x50] sm:$0xff] }
 0x31f   :  { %v1292_v5 = vsub.f32 1.0, %v1285_v58  ;;  %v1294_v19 = vmul.f32 %v1285_v58, %v4700_v9  ;;  %v1925_v9 = vld [vmem:[%s5532_s19 + $0x70] sm:$0xff]  ;;  %1866 = vmatpush.msrb.mxu3 %v1829_v25  ;;  %v1825_v32 = vld [vmem:[%s5533_s5 + $0x58] sm:$0xff]  ;;  %v1823_v50 = vld [vmem:[%s5533_s5 + $0x48] sm:$0xff] }
 0x320   :  { %v1290_v57 = vadd.f32 %v1288_v47, %v1287_v24  ;;  %v1445_v59 = vmul.f32 %v3197_v20, %v1444_v55  ;;  %v1822_v51 = vld [vmem:[%s5533_s5 + $0x40] sm:$0xff]  ;;  %v1821_v53 = vld [vmem:[%s5533_s5 + $0x38] sm:$0xff]  ;;  %v4896_v61 = vld [vmem:[#allocation22] sm:$0x7] }
 0x321   :  { %1867 = vmatpush.msrb.mxu3 %v1828_v12  ;;  %v4883_v52 = vld [vmem:[#allocation24 + $0x58] sm:$0xff]  ;;  %v4887_v24 = vld [vmem:[%s5531_s10] sm:$0x7]  ;;  %v2017_v60 = vld [vmem:[#allocation25 + $0x28] sm:$0xff] }
 0x322   :  { %3200 = vtanh.f32 %v1290_v57  ;;  %v1446_v7 = vadd.f32 %v3197_v20, %v1445_v59  ;;  %v2019_v47 = vld [vmem:[#allocation25 + $0x38] sm:$0xff]  ;;  %v2018_v55 = vld [vmem:[#allocation25 + $0x30] sm:$0xff]  ;;  %v1520_v17 = vperm.slane %v4887_v24, 0  ;;  %v1521_v56 = vperm.slane %v4887_v24, 1  ;;  %v2016_v58 = vld [vmem:[#allocation25 + $0x20] sm:$0xff] }
 0x323   :  { %v3199_v10 = vpop.eup %3198  ;;  %v1819_v57 = vld [vmem:[%s5533_s5 + $0x28] sm:$0xff]  ;;  %v2233_v25 = vld [vmem:[%s5534_s26 + $0x78] sm:$0xff] }
 0x324   :  { %v1450_v2 = vsel %vm1449_vm11, %v3197_v20, %v1446_v7  ;;  %v1827_v20 = vld [vmem:[%s5533_s5 + $0x68] sm:$0xff]  ;;  %v1818_v7 = vld [vmem:[%s5533_s5 + $0x20] sm:$0xff] }
 0x325   :  { %v1455_v62 = vsel %vm1452_vm13, %v1454_v1, %v1450_v2  ;;  %1868 = vmatpush.msrb.mxu3 %v1827_v20  ;;  %v4894_v59 = vld [vmem:[#allocation2 + $0x2] ss:$4 sm:$0x7]  ;;  %v4899_v2 = vld [vmem:[#allocation24 + $0x60] sm:$0xff] }
 0x326   :  { %v1462_v3 = vsub.f32 1.0, %v1455_v62  ;;  %v1464_v16 = vmul.f32 %v1455_v62, %v4702_v6  ;;  %v1924_v6 = vld [vmem:[%s5532_s19 + $0x68] sm:$0xff] }
 0x327   :  { %1869 = vmatpush.msrb.mxu3 %v1826_v26  ;;  %v1843_v26 = vld [vmem:[%s5533_s5 + $0xe8] sm:$0xff] }
 0x328   :  { %v3201_v14 = vpop.eup %3200  ;;  %v1463_v15 = vmul.f32 %v3199_v10, %v1462_v3  ;;  %v1607_v10 = vrot.slane %v4894_v59, 1 }
 0x329   :  { %v1293_v18 = vmul.f32 %v3201_v14, %v1292_v5  ;;  %1870 = vmatpush.msrb.mxu3 %v1825_v32  ;;  %v1817_v5 = vld [vmem:[%s5533_s5 + $0x18] sm:$0xff]  ;;  %v1690_v14 = vperm.slane %v4896_v61, 0 }
 0x32a   :  { %v4814_v21 = vadd.f32 %v1464_v16, %v1463_v15  ;;  %v2015_v15 = vld [vmem:[#allocation25 + $0x18] sm:$0xff] }
 0x32b   :  { %v4816_v22 = vadd.f32 %v1294_v19, %v1293_v18  ;;  %1871 = vmatpush.msrb.mxu3 %v1824_v46  ;;  %v1816_v19 = vld [vmem:[%s5533_s5 + $0x10] sm:$0xff] }
 0x32c   :  { %1467 = vst [vmem:[#allocation5 + $0x1] sm:$0x1] %v4814_v21  ;;  %1712 = vmatmul.f32.vlgmr.msra.gmra.mxu3 %v4814_v21  ;;  %v2232_v46 = vld [vmem:[%s5534_s26 + $0x70] sm:$0xff] }
 0x32d   :  { %1466 = vst [vmem:[#allocation4 + $0x1] sm:$0x1] %v4816_v22  ;;  %1542 = vmatmul.f32.vlgmr.msra.gmra.mxu0 %v4816_v22  ;;  %1562 = vmatmul.f32.vlgmr.msra.gmra.mxu1 %v4816_v22 }
 0x32e   :  { %1582 = vmatmul.f32.vlgmr.msra.gmra.mxu2 %v4816_v22  ;;  %1931 = vmatpush.msra.mxu0 %v1926_v23  ;;  %v1691_v23 = vperm.slane %v4896_v61, 1 }
 0x32f   :  { %1872 = vmatpush.msrb.mxu3 %v1823_v50  ;;  %2076 = vmatpush.msra.mxu1 %v2019_v47 }
 0x330   :  { %1932 = vmatpush.msra.mxu0 %v1925_v9  ;;  %v2014_v9 = vld [vmem:[#allocation25 + $0x10] sm:$0xff] }
 0x331   :  { %1873 = vmatpush.msrb.mxu3 %v1822_v51  ;;  %2077 = vmatpush.msra.mxu1 %v2018_v55  ;;  %v1842_v51 = vld [vmem:[%s5533_s5 + $0xe0] sm:$0xff]  ;;  %v1841_v55 = vld [vmem:[%s5533_s5 + $0xd8] sm:$0xff] }
 0x332   :  { %1933 = vmatpush.msra.mxu0 %v1924_v6 }
 0x333   :  { %1874 = vmatpush.msrb.mxu3 %v1821_v53  ;;  %2078 = vmatpush.msra.mxu1 %v2017_v60  ;;  %v2231_v53 = vld [vmem:[%s5534_s26 + $0x68] sm:$0xff] }
 0x334   :  { %1934 = vmatpush.msra.mxu0 %v1923_v33 }
 0x335   :  { %1732 = vmatmul.f32.vlgmr.msrb.gmra.mxu0 %v4814_v21  ;;  %1752 = vmatmul.f32.vlgmr.msrb.gmra.mxu1 %v4814_v21 }
 0x336   :  { %1935 = vmatpush.msra.mxu0 %v1922_v27  ;;  %1875 = vmatpush.msrb.mxu3 %v1820_v54 }
 0x337   :  { %2079 = vmatpush.msra.mxu1 %v2016_v58  ;;  %v1839_v58 = vld [vmem:[%s5533_s5 + $0xc8] sm:$0xff] }
 0x338   :  { %1936 = vmatpush.msra.mxu0 %v1921_v36  ;;  %1876 = vmatpush.msrb.mxu3 %v1819_v57  ;;  %v1845_v36 = vld [vmem:[%s5533_s5 + $0xf8] sm:$0xff]  ;;  %v2230_v57 = vld [vmem:[%s5534_s26 + $0x60] sm:$0xff] }
 0x339   :  { %2080 = vmatpush.msra.mxu1 %v2015_v15  ;;  %1846 = vmatpush.msrb.mxu2 %v1845_v36  ;;  %v1835_v36 = vld [vmem:[%s5533_s5 + $0xa8] sm:$0xff] }
 0x33a   :  { %1937 = vmatpush.msra.mxu0 %v1920_v28  ;;  %1877 = vmatpush.msrb.mxu3 %v1818_v7  ;;  %v1815_v28 = vld [vmem:[%s5533_s5 + $0x8] sm:$0xff]  ;;  %v1840_v7 = vld [vmem:[%s5533_s5 + $0xd0] sm:$0xff] }
 0x33b   :  { %2081 = vmatpush.msra.mxu1 %v2014_v9 }
 0x33c   :  { %1938 = vmatpush.msra.mxu0 %v1919_v31  ;;  %1878 = vmatpush.msrb.mxu3 %v1817_v5  ;;  %v4910_v31 = vld [vmem:[#allocation3 + $0x2] ss:$4 sm:$0x7]  ;;  %v1838_v5 = vld [vmem:[%s5533_s5 + $0xc0] sm:$0xff] }
 0x33d   :  { %v1777_v20 = vrot.slane %v4910_v31, 1 }
 0x33e   :  { %1939 = vmatpush.msra.mxu0 %v1918_v34  ;;  %1879 = vmatpush.msrb.mxu3 %v1816_v19  ;;  %v1836_v19 = vld [vmem:[%s5533_s5 + $0xb0] sm:$0xff] }
 0x340   :  { %1940 = vmatpush.msra.mxu0 %v1917_v49  ;;  %1880 = vmatpush.msrb.mxu3 %v1815_v28  ;;  %v2013_v49 = vld [vmem:[#allocation25 + $0x8] sm:$0xff] }
 0x341   :  { %2082 = vmatpush.msra.mxu1 %v2013_v49  ;;  %v2224_v49 = vld [vmem:[%s5534_s26 + $0x30] sm:$0xff] }
 0x342   :  { %1941 = vmatpush.msra.mxu0 %v1916_v38  ;;  %v1844_v38 = vld [vmem:[%s5533_s5 + $0xf0] sm:$0xff] }
 0x343   :  { %1847 = vmatpush.msrb.mxu2 %v1844_v38  ;;  %v1522_v38 = vperm.slane %v4887_v24, 2  ;;  %v2223_v24 = vld [vmem:[%s5534_s26 + $0x28] sm:$0xff] }
 0x344   :  { %1942 = vmatpush.msra.mxu0 %v1915_v39  ;;  %v1814_v39 = vld [vmem:[%s5533_s5] sm:$0xff] }
 0x345   :  { %1881 = vmatpush.msrb.mxu3 %v1814_v39  ;;  %1848 = vmatpush.msrb.mxu2 %v1843_v26 }
 0x346   :  { %1943 = vmatpush.msra.mxu0 %v1914_v41 }
 0x347   :  { %2238 = vmatpush.msra.mxu3 %v2233_v25  ;;  %1849 = vmatpush.msrb.mxu2 %v1842_v51  ;;  %v1692_v51 = vperm.slane %v4896_v61, 2 }
 0x348   :  { %1944 = vmatpush.msra.mxu0 %v1913_v43 }
 0x349   :  { %2239 = vmatpush.msra.mxu3 %v2232_v46  ;;  %1850 = vmatpush.msrb.mxu2 %v1841_v55 }
 0x34a   :  { %1945 = vmatpush.msra.mxu0 %v1912_v44  ;;  %v4915_v44 = vld [vmem:[#allocation24 + $0x68] sm:$0xff] }
 0x34b   :  { %2240 = vmatpush.msra.mxu3 %v2231_v53  ;;  %1851 = vmatpush.msrb.mxu2 %v1840_v7  ;;  %v1832_v7 = vld [vmem:[%s5533_s5 + $0x90] sm:$0xff] }
 0x34c   :  { %1946 = vmatpush.msra.mxu0 %v1911_v48  ;;  %v2012_v48 = vld [vmem:[#allocation25] sm:$0xff] }
 0x34d   :  { %1947 = vmatmul.f32.vlgmr.msra.gmra.mxu0 %v4842_v11  ;;  %2083 = vmatpush.msra.mxu1 %v2012_v48 }
 0x34e   :  { %2241 = vmatpush.msra.mxu3 %v2230_v57  ;;  %1852 = vmatpush.msrb.mxu2 %v1839_v58  ;;  %v4978_v57 = vld [vmem:[%s5535_s23] ss:$0 sm:$0xff] }
 0x350   :  { %1853 = vmatpush.msrb.mxu2 %v1838_v5 }
 0x355   :  { %1950 = vmatmul.f32.gmra.mxu0 %v4845_v13 }
 0x35d   :  { %1953 = vmatmul.f32.gmra.mxu0 %v4848_v40 }
 0x365   :  { %1956 = vmatmul.f32.gmra.mxu0 %v4851_v30 }
 0x36d   :  { %1959 = vmatmul.f32.gmra.mxu0 %v4854_v42 }
 0x375   :  { %1962 = vmatmul.f32.gmra.mxu0 %v4857_v29 }
 0x37d   :  { %1965 = vmatmul.f32.gmra.mxu0 %v4860_v37 }
 0x385   :  { %1968 = vmatmul.f32.gmra.mxu0 %v4863_v0 }
 0x38d   :  { %1971 = vmatmul.f32.gmra.mxu0 %v4866_v45 }
 0x395   :  { %1974 = vmatmul.f32.gmra.mxu0 %v4869_v35 }
 0x39d   :  { %1977 = vmatmul.f32.gmra.mxu0 %v4876_v8 }
 0x3a5   :  { %1980 = vmatmul.f32.gmra.mxu0 %v4883_v52 }
 0x3aa   :  { %v1543_v63 = vpop.f32.mrf.mxu0  ;;  %v1563_v1 = vpop.f32.mrf.mxu1 }
 0x3ab   :  { %v1544_v62 = vadd.f32 %v1543_v63, %v1520_v17  ;;  %v1564_v3 = vadd.f32 %v1563_v1, %v1521_v56  ;;  %v4932_v63 = vld [vmem:[#allocation24 + $0x70] sm:$0xff] }
 0x3ac   :  { %v2229_v1 = vld [vmem:[%s5534_s26 + $0x58] sm:$0xff] }
 0x3ad   :  { %v1586_v16 = vadd.f32 %v1544_v62, %v4894_v59  ;;  %v1609_v18 = vadd.f32 %v1607_v10, %v1564_v3  ;;  %1983 = vmatmul.f32.gmra.mxu0 %v4899_v2  ;;  %2242 = vmatpush.msra.mxu3 %v2229_v1  ;;  %v2228_v3 = vld [vmem:[%s5534_s26 + $0x50] sm:$0xff] }
 0x3af   :  { %v3035_v6 = vmul.f32 -1.442695, %v1586_v16  ;;  %v3036_v33 = vmul.f32 -1.442695, %v1609_v18  ;;  %v1713_v27 = vpop.f32.mrf.mxu3  ;;  %2243 = vmatpush.msra.mxu3 %v2228_v3  ;;  %v1837_v16 = vld [vmem:[%s5533_s5 + $0xb8] sm:$0xff]  ;;  %v2226_v18 = vld [vmem:[%s5534_s26 + $0x40] sm:$0xff] }
 0x3b0   :  { %v1714_v34 = vadd.f32 %v1713_v27, %v1690_v14  ;;  %v2227_v14 = vld [vmem:[%s5534_s26 + $0x48] sm:$0xff]  ;;  %1854 = vmatpush.msrb.mxu2 %v1837_v16 }
 0x3b1   :  { %3202 = vpow2.f32 %v3035_v6  ;;  %2244 = vmatpush.msra.mxu3 %v2227_v14  ;;  %v2225_v6 = vld [vmem:[%s5534_s26 + $0x38] sm:$0xff]  ;;  %v1583_v48 = vpop.f32.mrf.mxu2 }
 0x3b2   :  { %3204 = vpow2.f32 %v3036_v33  ;;  %v1756_v41 = vadd.f32 %v1714_v34, %v4910_v31  ;;  %v1733_v43 = vpop.f32.mrf.mxu0  ;;  %v4957_v34 = vld [vmem:[#allocation24 + $0x78] sm:$0xff]  ;;  %1855 = vmatpush.msrb.mxu2 %v1836_v19  ;;  %v1584_v55 = vadd.f32 %v1583_v48, %v1522_v38  ;;  %v1753_v5 = vpop.f32.mrf.mxu1 }
 0x3b3   :  { %v1734_v12 = vadd.f32 %v1733_v43, %v1691_v23  ;;  %2245 = vmatpush.msra.mxu3 %v2226_v18 }
 0x3b4   :  { %v3037_v32 = vmul.f32 -1.442695, %v1756_v41  ;;  %v1834_v41 = vld [vmem:[%s5533_s5 + $0xa0] sm:$0xff]  ;;  %1856 = vmatpush.msrb.mxu2 %v1835_v36 }
 0x3b5   :  { %v1779_v50 = vadd.f32 %v1777_v20, %v1734_v12  ;;  %1986 = vmatmul.f32.gmra.mxu0 %v4915_v44  ;;  %2246 = vmatpush.msra.mxu3 %v2225_v6 }
 0x3b6   :  { %3206 = vpow2.f32 %v3037_v32  ;;  %v1833_v32 = vld [vmem:[%s5533_s5 + $0x98] sm:$0xff]  ;;  %1857 = vmatpush.msrb.mxu2 %v1834_v41  ;;  %v1754_v41 = vadd.f32 %v1753_v5, %v1692_v51 }
 0x3b7   :  { %v3203_v47 = vpop.eup %3202  ;;  %v3038_v54 = vmul.f32 -1.442695, %v1779_v50  ;;  %2247 = vmatpush.msra.mxu3 %v2224_v49  ;;  %v1630_v50 = vrot.slane %v4894_v59, 2  ;;  %v1830_v49 = vld [vmem:[%s5533_s5 + $0x80] sm:$0xff] }
 0x3b8   :  { %v3205_v17 = vpop.eup %3204  ;;  %v4925_v56 = vadd.f32 1.0, %v3203_v47  ;;  %v2222_v47 = vld [vmem:[%s5534_s26 + $0x20] sm:$0xff]  ;;  %1858 = vmatpush.msrb.mxu2 %v1833_v32 }
 0x3b9   :  { %v4928_v60 = vadd.f32 1.0, %v3205_v17  ;;  %3208 = vpow2.f32 %v3038_v54  ;;  %2248 = vmatpush.msra.mxu3 %v2223_v24  ;;  %v2219_v24 = vld [vmem:[%s5534_s26 + $0x8] sm:$0xff] }
 0x3ba   :  { %3210 = vrcp.f32 %v4925_v56  ;;  %v1600_v25 = vand.u32 2147483647, %v4925_v56  ;;  %v1602_v12 = vand.u32 2147483648, %v4925_v56  ;;  %vm1596_vm10 = vweird.f32 %v4925_v56  ;;  %1859 = vmatpush.msrb.mxu2 %v1832_v7 }
 0x3bb   :  { %3212 = vrcp.f32 %v4928_v60  ;;  %v1625_v54 = vand.u32 2147483648, %v4928_v60  ;;  %2249 = vmatpush.msra.mxu3 %v2222_v47  ;;  %vm1619_vm4 = vweird.f32 %v4928_v60 }
 0x3bc   :  { %v3207_v62 = vpop.eup %3206  ;;  %vm1601_vm5 = vcmp.eq.f32.partialorder %v1600_v25, 8.507059e+37  ;;  %v1603_v61 = vor.u32 1.1754944e-38, %v1602_v12 }
 0x3bd   :  { %v4938_v10 = vadd.f32 1.0, %v3207_v62  ;;  %1989 = vmatmul.f32.gmra.mxu0 %v4932_v63  ;;  %v2221_v62 = vld [vmem:[%s5534_s26 + $0x18] sm:$0xff]  ;;  %v1626_v32 = vor.u32 1.1754944e-38, %v1625_v54 }
 0x3be   :  { %2250 = vmatpush.msra.mxu3 %v2221_v62 }
 0x3bf   :  { %v3209_v15 = vpop.eup %3208  ;;  %3214 = vrcp.f32 %v4938_v10  ;;  %v1770_v58 = vand.u32 2147483647, %v4938_v10  ;;  %v1772_v14 = vand.u32 2147483648, %v4938_v10  ;;  %vm1766_vm14 = vweird.f32 %v4938_v10 }
 0x3c0   :  { %v3211_v23 = vpop.eup %3210  ;;  %v4947_v9 = vadd.f32 1.0, %v3209_v15  ;;  %v1831_v15 = vld [vmem:[%s5533_s5 + $0x88] sm:$0xff] }
 0x3c1   :  { %v4950_v33 = vpop.eup %3212  ;;  %v1592_v27 = vmul.f32 %v3211_v23, %v4925_v56  ;;  %vm1597_vm15 = vweird.f32 %v3211_v23  ;;  %1860 = vmatpush.msrb.mxu2 %v1831_v15  ;;  %v1773_v12 = vor.u32 1.1754944e-38, %v1772_v14  ;;  %vm1771_vm11 = vcmp.eq.f32.partialorder %v1770_v58, 8.507059e+37 }
 0x3c2   :  { %v1615_v28 = vmul.f32 %v4950_v33, %v4928_v60  ;;  %3216 = vrcp.f32 %v4947_v9  ;;  %vm1598_vm2 = vmor %vm1596_vm10, %vm1597_vm15  ;;  %vm1620_vm12 = vweird.f32 %v4950_v33  ;;  %vm1789_vm15 = vweird.f32 %v4947_v9 }
 0x3c3   :  { %v1593_v39 = vsub.f32 1.0, %v1592_v27  ;;  %vm5000_vm9 = vmor %vm1619_vm4, %vm1620_vm12  ;;  %1861 = vmatpush.msrb.mxu2 %v1830_v49  ;;  %vm2686_vm12 = vcmask 1040384  }
 0x3c4   :  { %v1616_v43 = vsub.f32 1.0, %v1615_v28 }
 0x3c5   :  { %v4964_v20 = vpop.eup %3214  ;;  %v1594_v26 = vmul.f32 %v3211_v23, %v1593_v39  ;;  %1992 = vmatmul.f32.gmra.mxu0 %v4957_v34  ;;  %v1623_v39 = vand.u32 2147483647, %v4928_v60 }
 0x3c6   :  { %v1617_v46 = vmul.f32 %v4950_v33, %v1616_v43  ;;  %v1762_v53 = vmul.f32 %v4964_v20, %v4938_v10  ;;  %vm1767_vm6 = vweird.f32 %v4964_v20  ;;  %v2218_v10 = vld [vmem:[%s5534_s26] sm:$0xff] }
 0x3c7   :  { %v1595_v17 = vadd.f32 %v3211_v23, %v1594_v26  ;;  %vm1768_vm7 = vmor %vm1766_vm14, %vm1767_vm6  ;;  %vm1624_vm13 = vcmp.eq.f32.partialorder %v1623_v39, 8.507059e+37  ;;  %vm2741_vm6 = vcmask 8192  }
 0x3c8   :  { %v4981_v59 = vpop.eup %3216  ;;  %v1763_v1 = vsub.f32 1.0, %v1762_v53  ;;  %v1618_v18 = vadd.f32 %v4950_v33, %v1617_v46  ;;  %v1800_v53 = vrot.slane %v4910_v31, 2 }
 0x3c9   :  { %v1599_v3 = vsel %vm1598_vm2, %v3211_v23, %v1595_v17  ;;  %v1785_v56 = vmul.f32 %v4981_v59, %v4947_v9  ;;  %v2220_v23 = vld [vmem:[%s5534_s26 + $0x10] sm:$0xff]  ;;  %vm1790_vm1 = vweird.f32 %v4981_v59 }
 0x3ca   :  { %v1604_v16 = vsel %vm1601_vm5, %v1603_v61, %v1599_v3  ;;  %v1764_v19 = vmul.f32 %v4964_v20, %v1763_v1  ;;  %v1948_v6 = vpop.f32.mrf.mxu0  ;;  %2251 = vmatpush.msra.mxu3 %v2220_v23  ;;  %v1622_v60 = vsel %vm5000_vm9, %v4950_v33, %v1618_v18  ;;  %v1795_v33 = vand.u32 2147483648, %v4947_v9  ;;  %vm1791_vm10 = vmor %vm1789_vm15, %vm1790_vm1 }
 0x3cb   :  { %v1629_v27 = vmul.f32 %v1604_v16, %v1584_v55  ;;  %v1786_v36 = vsub.f32 1.0, %v1785_v56  ;;  %v1949_v28 = vadd.f32 %v4978_v57, %v1948_v6  ;;  %v1627_v54 = vsel %vm1624_vm13, %v1626_v32, %v1622_v60  ;;  %v5042_v60 = vld [vmem:[#allocation27 + $0x10] sm:$0xff] }
 0x3cc   :  { %v1765_v43 = vadd.f32 %v4964_v20, %v1764_v19  ;;  %2252 = vmatpush.msra.mxu3 %v2219_v24  ;;  %v1634_v1 = vsub.f32 1.0, %v1627_v54  ;;  %v1796_v58 = vor.u32 1.1754944e-38, %v1795_v33  ;;  %v1636_v56 = vmul.f32 %v1627_v54, %v4816_v22 }
 0x3cd   :  { %v1632_v48 = vadd.f32 %v1630_v50, %v1629_v27  ;;  %v1787_v25 = vmul.f32 %v4981_v59, %v1786_v36  ;;  %v1996_v26 = vmax.f32 %v1949_v28, 0.0  ;;  %vm1891_vm5 = vcmask 518144  }
 0x3ce   :  { %v1769_v46 = vsel %vm1768_vm7, %v4964_v20, %v1765_v43  ;;  %v1793_v20 = vand.u32 2147483647, %v4947_v9  ;;  %2253 = vmatpush.msra.mxu3 %v2218_v10 }
 0x3cf   :  { %3218 = vtanh.f32 %v1632_v48  ;;  %v1774_v50 = vsel %vm1771_vm11, %v1773_v12, %v1769_v46  ;;  %v1788_v51 = vadd.f32 %v4981_v59, %v1787_v25  ;;  %3039 = vmatmul.msk.f32.vlgmr.msra.gmra.mxu1 %vm524_vm3, %v1996_v26  ;;  %v5037_v25 = vld [vmem:[#allocation27 + $0x8] sm:$0xff] }
 0x3d0   :  { %v1799_v47 = vmul.f32 %v1774_v50, %v1754_v41  ;;  %vm1794_vm2 = vcmp.eq.f32.partialorder %v1793_v20, 8.507059e+37  ;;  %v5047_v50 = vld [vmem:[#allocation27 + $0x18] sm:$0xff] }
 0x3d1   :  { %v1792_v7 = vsel %vm1791_vm10, %v4981_v59, %v1788_v51 }
 0x3d2   :  { %v1802_v55 = vadd.f32 %v1800_v53, %v1799_v47  ;;  %v1951_v17 = vpop.f32.mrf.mxu0  ;;  %v1797_v5 = vsel %vm1794_vm2, %v1796_v58, %v1792_v7  ;;  %v5052_v47 = vld [vmem:[#allocation27 + $0x20] sm:$0xff]  ;;  %v5062_v58 = vld [vmem:[#allocation27 + $0x30] sm:$0xff] }
 0x3d3   :  { %v1952_v61 = vadd.f32 %v4978_v57, %v1951_v17  ;;  %v1804_v14 = vsub.f32 1.0, %v1797_v5  ;;  %v1806_v18 = vmul.f32 %v1797_v5, %v4814_v21  ;;  %v5032_v21 = vld [vmem:[#allocation27] sm:$0xff]  ;;  %v5057_v17 = vld [vmem:[#allocation27 + $0x28] sm:$0xff] }
 0x3d4   :  { %3220 = vtanh.f32 %v1802_v55 }
 0x3d5   :  { %v3219_v31 = vpop.eup %3218  ;;  %v1997_v62 = vmax.f32 %v1952_v61, 0.0 }
 0x3d6   :  { %v1635_v3 = vmul.f32 %v3219_v31, %v1634_v1 }
 0x3d7   :  { %3040 = vmatmul.msk.f32.gmra.mxu1 %vm524_vm3, %v1997_v62 }
 0x3d8   :  { %v1637_v9 = vadd.f32 %v1636_v56, %v1635_v3  ;;  %v5067_v56 = vld [vmem:[#allocation27 + $0x38] sm:$0xff] }
 0x3da   :  { %v3221_v15 = vpop.eup %3220  ;;  %1808 = vst [vmem:[#allocation4 + $0x2] sm:$0x1] %v1637_v9  ;;  %v1954_v16 = vpop.f32.mrf.mxu0 }
 0x3db   :  { %v1805_v59 = vmul.f32 %v3221_v15, %v1804_v14  ;;  %v1955_v19 = vadd.f32 %v4978_v57, %v1954_v16  ;;  %v5072_v15 = vld [vmem:[#allocation27 + $0x40] sm:$0xff] }
 0x3dd   :  { %v1807_v6 = vadd.f32 %v1806_v18, %v1805_v59  ;;  %v1998_v23 = vmax.f32 %v1955_v19, 0.0  ;;  %v5077_v19 = vld [vmem:[#allocation27 + $0x48] sm:$0xff] }
 0x3df   :  { %1809 = vst [vmem:[#allocation5 + $0x2] sm:$0x1] %v1807_v6  ;;  %3041 = vmatmul.msk.f32.gmra.mxu1 %vm524_vm3, %v1998_v23 }
 0x3e1   :  { %v1810_v27 = vld [vmem:[#allocation4] sm:$0x7] }
 0x3e2   :  { %v1957_v22 = vpop.f32.mrf.mxu0  ;;  %v1811_v36 = vmax.f32 %v1810_v27, 0.0  ;;  %v2326_v27 = vld [vmem:[#allocation28 + $0x38] sm:$0xff] }
 0x3e3   :  { %v1958_v28 = vadd.f32 %v4978_v57, %v1957_v22  ;;  %2383 = vmatpush.msrb.mxu1 %v2326_v27 }
 0x3e4   :  { %1882 = vmatmul.f32.vlgmr.msrb.gmra.mxu3 %v1811_v36  ;;  %v5082_v36 = vld [vmem:[#allocation27 + $0x50] sm:$0xff] }
 0x3e5   :  { %v1999_v49 = vmax.f32 %v1958_v28, 0.0 }
 0x3e6   :  { %v1812_v38 = vld [vmem:[#allocation5] sm:$0x7] }
 0x3e7   :  { %3042 = vmatmul.msk.f32.gmra.mxu1 %vm524_vm3, %v1999_v49  ;;  %v1813_v39 = vmax.f32 %v1812_v38, 0.0 }
 0x3e9   :  { %1862 = vmatmul.f32.vlgmr.msrb.gmra.mxu2 %v1813_v39  ;;  %v5087_v39 = vld [vmem:[#allocation27 + $0x58] sm:$0xff] }
 0x3ea   :  { %v1960_v41 = vpop.f32.mrf.mxu0 }
 0x3eb   :  { %v1961_v43 = vadd.f32 %v4978_v57, %v1960_v41 }
 0x3ec   :  { %2254 = vmatmul.f32.vlgmr.msra.gmra.mxu3 %v5032_v21 }
 0x3ed   :  { %v2000_v48 = vmax.f32 %v1961_v43, 0.0 }
 0x3ef   :  { %3043 = vmatmul.msk.f32.gmra.mxu1 %vm524_vm3, %v2000_v48  ;;  %v2325_v48 = vld [vmem:[#allocation28 + $0x30] sm:$0xff] }
 0x3f0   :  { %2384 = vmatpush.msrb.mxu1 %v2325_v48 }
 0x3f2   :  { %v1963_v12 = vpop.f32.mrf.mxu0 }
 0x3f3   :  { %v1964_v26 = vadd.f32 %v4978_v57, %v1963_v12 }
 0x3f4   :  { %2257 = vmatmul.f32.gmra.mxu3 %v5037_v25 }
 0x3f5   :  { %v2001_v24 = vmax.f32 %v1964_v26, 0.0  ;;  %v2324_v26 = vld [vmem:[#allocation28 + $0x28] sm:$0xff] }
 0x3f6   :  { %2385 = vmatpush.msrb.mxu1 %v2324_v26 }
 0x3f7   :  { %3044 = vmatmul.msk.f32.gmra.mxu1 %vm524_vm3, %v2001_v24  ;;  %v5092_v24 = vld [vmem:[#allocation27 + $0x60] sm:$0xff] }
 0x3fa   :  { %v1966_v32 = vpop.f32.mrf.mxu0 }
 0x3fb   :  { %v1967_v46 = vadd.f32 %v4978_v57, %v1966_v32 }
 0x3fc   :  { %2260 = vmatmul.f32.gmra.mxu3 %v5042_v60 }
 0x3fd   :  { %v2002_v10 = vmax.f32 %v1967_v46, 0.0  ;;  %v2323_v46 = vld [vmem:[#allocation28 + $0x20] sm:$0xff] }
 0x3fe   :  { %2386 = vmatpush.msrb.mxu1 %v2323_v46 }
 0x3ff   :  { %3045 = vmatmul.msk.f32.gmra.mxu1 %vm524_vm3, %v2002_v10  ;;  %v5097_v10 = vld [vmem:[#allocation27 + $0x68] sm:$0xff] }
 0x402   :  { %v1969_v51 = vpop.f32.mrf.mxu0 }
 0x403   :  { %v1970_v53 = vadd.f32 %v4978_v57, %v1969_v51  ;;  %v2321_v51 = vld [vmem:[#allocation28 + $0x10] sm:$0xff] }
 0x404   :  { %2263 = vmatmul.f32.gmra.mxu3 %v5047_v50 }
 0x405   :  { %v2003_v33 = vmax.f32 %v1970_v53, 0.0  ;;  %v2320_v53 = vld [vmem:[#allocation28 + $0x8] sm:$0xff] }
 0x407   :  { %3046 = vmatmul.msk.f32.gmra.mxu1 %vm524_vm3, %v2003_v33 }
 0x40a   :  { %v1972_v54 = vpop.f32.mrf.mxu0 }
 0x40b   :  { %v1973_v20 = vadd.f32 %v4978_v57, %v1972_v54  ;;  %v2319_v54 = vld [vmem:[#allocation28] sm:$0xff] }
 0x40c   :  { %2266 = vmatmul.f32.gmra.mxu3 %v5052_v47 }
 0x40d   :  { %v2004_v55 = vmax.f32 %v1973_v20, 0.0  ;;  %v5102_v20 = vld [vmem:[#allocation27 + $0x70] sm:$0xff] }
 0x40f   :  { %3047 = vmatmul.msk.f32.gmra.mxu1 %vm524_vm3, %v2004_v55 }
 0x412   :  { %v1975_v7 = vpop.f32.mrf.mxu0 }
 0x413   :  { %v1976_v61 = vadd.f32 %v4978_v57, %v1975_v7  ;;  %v5107_v7 = vld [vmem:[#allocation27 + $0x78] sm:$0xff] }
 0x414   :  { %2269 = vmatmul.f32.gmra.mxu3 %v5057_v17 }
 0x415   :  { %v2005_v1 = vmax.f32 %v1976_v61, 0.0 }
 0x417   :  { %3048 = vmatmul.msk.f32.gmra.mxu1 %vm524_vm3, %v2005_v1 }
 0x41a   :  { %v1978_v31 = vpop.f32.mrf.mxu0 }
 0x41b   :  { %v1979_v62 = vadd.f32 %v4978_v57, %v1978_v31  ;;  %v3158_v31 = vld [vmem:[%s5538_s6] ss:$0 sm:$0xff] }
 0x41c   :  { %2272 = vmatmul.f32.gmra.mxu3 %v5062_v58 }
 0x41d   :  { %v2006_v3 = vmax.f32 %v1979_v62, 0.0 }
 0x41f   :  { %3049 = vmatmul.msk.f32.gmra.mxu1 %vm524_vm3, %v2006_v3 }
 0x422   :  { %v1981_v5 = vpop.f32.mrf.mxu0 }
 0x423   :  { %v1982_v9 = vadd.f32 %v4978_v57, %v1981_v5  ;;  %v5116_v5 = vld [vmem:[%s5539_s25] ss:$0 sm:$0xff] }
 0x424   :  { %2275 = vmatmul.f32.gmra.mxu3 %v5067_v56 }
 0x425   :  { %v2007_v14 = vmax.f32 %v1982_v9, 0.0 }
 0x427   :  { %3050 = vmatmul.msk.f32.gmra.mxu1 %vm524_vm3, %v2007_v14 }
 0x42a   :  { %v1984_v16 = vpop.f32.mrf.mxu0 }
 0x42b   :  { %v1985_v59 = vadd.f32 %v4978_v57, %v1984_v16 }
 0x42c   :  { %2278 = vmatmul.f32.gmra.mxu3 %v5072_v15 }
 0x42d   :  { %v2008_v18 = vmax.f32 %v1985_v59, 0.0 }
 0x42f   :  { %3051 = vmatmul.msk.f32.gmra.mxu1 %vm524_vm3, %v2008_v18 }
 0x432   :  { %v1987_v6 = vpop.f32.mrf.mxu0 }
 0x433   :  { %v1988_v23 = vadd.f32 %v4978_v57, %v1987_v6 }
 0x434   :  { %2281 = vmatmul.f32.gmra.mxu3 %v5077_v19 }
 0x435   :  { %v2009_v22 = vmax.f32 %v1988_v23, 0.0 }
 0x437   :  { %3052 = vmatmul.msk.f32.gmra.mxu1 %vm524_vm3, %v2009_v22 }
 0x43a   :  { %v1990_v28 = vpop.f32.mrf.mxu0 }
 0x43b   :  { %v1991_v49 = vadd.f32 %v4978_v57, %v1990_v28 }
 0x43c   :  { %2284 = vmatmul.f32.gmra.mxu3 %v5082_v36 }
 0x43d   :  { %v2010_v38 = vmax.f32 %v1991_v49, 0.0 }
 0x43f   :  { %3053 = vmatmul.msk.f32.gmra.mxu1 %vm524_vm3, %v2010_v38 }
 0x442   :  { %v1993_v41 = vpop.f32.mrf.mxu0 }
 0x443   :  { %v1994_v43 = vadd.f32 %v4978_v57, %v1993_v41  ;;  %v2322_v57 = vld [vmem:[#allocation28 + $0x18] sm:$0xff] }
 0x444   :  { %2287 = vmatmul.f32.gmra.mxu3 %v5087_v39  ;;  %2387 = vmatpush.msrb.mxu1 %v2322_v57 }
 0x445   :  { %v2011_v12 = vmax.f32 %v1994_v43, 0.0 }
 0x446   :  { %2388 = vmatpush.msrb.mxu1 %v2321_v51 }
 0x447   :  { %3054 = vmatmul.msk.f32.gmra.mxu1 %vm524_vm3, %v2011_v12 }
 0x448   :  { %2389 = vmatpush.msrb.mxu1 %v2320_v53 }
 0x44a   :  { %2390 = vmatpush.msrb.mxu1 %v2319_v54 }
 0x44c   :  { %v5094_v32 = vpop.f32.mrf.mxu1  ;;  %2290 = vmatmul.f32.gmra.mxu3 %v5092_v24 }
 0x454   :  { %v5099_v33 = vpop.f32.mrf.mxu1  ;;  %2293 = vmatmul.f32.gmra.mxu3 %v5097_v10 }
 0x45c   :  { %v5104_v55 = vpop.f32.mrf.mxu1  ;;  %2296 = vmatmul.f32.gmra.mxu3 %v5102_v20 }
 0x464   :  { %v5109_v61 = vpop.f32.mrf.mxu1  ;;  %2299 = vmatmul.f32.gmra.mxu3 %v5107_v7 }
 0x467   :  { %v1883_v1 = vpop.f32.mrf.mxu3 }
 0x46c   :  { %v5113_v62 = vpop.f32.mrf.mxu1  ;;  %v1863_v3 = vpop.f32.mrf.mxu2 }
 0x46d   :  { %v1884_v9 = vadd.f32 %v1883_v1, %v1863_v3 }
 0x46f   :  { %v1890_v14 = vadd.f32 %v3158_v31, %v1884_v9  ;;  %v2255_v16 = vpop.f32.mrf.mxu3 }
 0x470   :  { %v2256_v59 = vadd.f32 %v5116_v5, %v2255_v16 }
 0x471   :  { %1892 = vst.msk [vmem:[#allocation6] sm:$0x7] %vm1891_vm5, %v1890_v14 }
 0x472   :  { %v2303_v18 = vmax.f32 %v2256_v59, 0.0 }
 0x474   :  { %v5119_v6 = vpop.f32.mrf.mxu1  ;;  %3055 = vmatmul.msk.f32.vlgmr.msrb.gmra.mxu1 %vm524_vm3, %v2303_v18 }
 0x477   :  { %v2258_v23 = vpop.f32.mrf.mxu3 }
 0x478   :  { %v2259_v27 = vadd.f32 %v5116_v5, %v2258_v23 }
 0x47a   :  { %v2304_v22 = vmax.f32 %v2259_v27, 0.0 }
 0x47c   :  { %v5123_v28 = vpop.f32.mrf.mxu1  ;;  %3056 = vmatmul.msk.f32.gmra.mxu1 %vm524_vm3, %v2304_v22 }
 0x47f   :  { %v2261_v49 = vpop.f32.mrf.mxu3 }
 0x480   :  { %v2262_v38 = vadd.f32 %v5116_v5, %v2261_v49 }
 0x482   :  { %v2305_v41 = vmax.f32 %v2262_v38, 0.0 }
 0x484   :  { %v2106_v43 = vpop.f32.mrf.mxu1  ;;  %3057 = vmatmul.msk.f32.gmra.mxu1 %vm524_vm3, %v2305_v41 }
 0x487   :  { %v2264_v48 = vpop.f32.mrf.mxu3 }
 0x488   :  { %v2265_v12 = vadd.f32 %v5116_v5, %v2264_v48 }
 0x48a   :  { %v2306_v26 = vmax.f32 %v2265_v12, 0.0 }
 0x48c   :  { %v2109_v46 = vpop.f32.mrf.mxu1  ;;  %3058 = vmatmul.msk.f32.gmra.mxu1 %vm524_vm3, %v2306_v26 }
 0x48f   :  { %v2267_v57 = vpop.f32.mrf.mxu3 }
 0x490   :  { %v2268_v51 = vadd.f32 %v5116_v5, %v2267_v57 }
 0x492   :  { %v2307_v53 = vmax.f32 %v2268_v51, 0.0 }
 0x494   :  { %v2112_v54 = vpop.f32.mrf.mxu1  ;;  %3059 = vmatmul.msk.f32.gmra.mxu1 %vm524_vm3, %v2307_v53 }
 0x497   :  { %v2270_v1 = vpop.f32.mrf.mxu3 }
 0x498   :  { %v2271_v31 = vadd.f32 %v5116_v5, %v2270_v1 }
 0x49a   :  { %v2308_v3 = vmax.f32 %v2271_v31, 0.0 }
 0x49c   :  { %v2115_v9 = vpop.f32.mrf.mxu1  ;;  %3060 = vmatmul.msk.f32.gmra.mxu1 %vm524_vm3, %v2308_v3 }
 0x49f   :  { %v2273_v14 = vpop.f32.mrf.mxu3 }
 0x4a0   :  { %v2274_v16 = vadd.f32 %v5116_v5, %v2273_v14 }
 0x4a2   :  { %v2309_v59 = vmax.f32 %v2274_v16, 0.0 }
 0x4a4   :  { %v2118_v18 = vpop.f32.mrf.mxu1  ;;  %3061 = vmatmul.msk.f32.gmra.mxu1 %vm524_vm3, %v2309_v59 }
 0x4a7   :  { %v2276_v23 = vpop.f32.mrf.mxu3 }
 0x4a8   :  { %v2277_v27 = vadd.f32 %v5116_v5, %v2276_v23 }
 0x4aa   :  { %v2310_v22 = vmax.f32 %v2277_v27, 0.0 }
 0x4ac   :  { %v2121_v49 = vpop.f32.mrf.mxu1  ;;  %3062 = vmatmul.msk.f32.gmra.mxu1 %vm524_vm3, %v2310_v22 }
 0x4af   :  { %v2279_v38 = vpop.f32.mrf.mxu3 }
 0x4b0   :  { %v2280_v41 = vadd.f32 %v5116_v5, %v2279_v38 }
 0x4b2   :  { %v2311_v48 = vmax.f32 %v2280_v41, 0.0 }
 0x4b4   :  { %v2124_v12 = vpop.f32.mrf.mxu1  ;;  %3063 = vmatmul.msk.f32.gmra.mxu1 %vm524_vm3, %v2311_v48 }
 0x4b7   :  { %v2282_v26 = vpop.f32.mrf.mxu3 }
 0x4b8   :  { %v2283_v57 = vadd.f32 %v5116_v5, %v2282_v26 }
 0x4ba   :  { %v2312_v51 = vmax.f32 %v2283_v57, 0.0 }
 0x4bc   :  { %v2127_v53 = vpop.f32.mrf.mxu1  ;;  %3064 = vmatmul.msk.f32.gmra.mxu1 %vm524_vm3, %v2312_v51 }
 0x4bf   :  { %v2285_v1 = vpop.f32.mrf.mxu3 }
 0x4c0   :  { %v2286_v31 = vadd.f32 %v5116_v5, %v2285_v1 }
 0x4c2   :  { %v2313_v3 = vmax.f32 %v2286_v31, 0.0 }
 0x4c4   :  { %v2130_v14 = vpop.f32.mrf.mxu1  ;;  %3065 = vmatmul.msk.f32.gmra.mxu1 %vm524_vm3, %v2313_v3 }
 0x4c5   :  { %2137 = vmatpush.msra.mxu2 %v2130_v14 }
 0x4c7   :  { %2138 = vmatpush.msra.mxu2 %v2127_v53  ;;  %v2288_v16 = vpop.f32.mrf.mxu3 }
 0x4c8   :  { %v2289_v59 = vadd.f32 %v5116_v5, %v2288_v16 }
 0x4c9   :  { %2139 = vmatpush.msra.mxu2 %v2124_v12 }
 0x4ca   :  { %v2314_v23 = vmax.f32 %v2289_v59, 0.0 }
 0x4cb   :  { %2140 = vmatpush.msra.mxu2 %v2121_v49 }
 0x4cc   :  { %3066 = vmatmul.msk.f32.gmra.mxu1 %vm524_vm3, %v2314_v23 }
 0x4cd   :  { %2141 = vmatpush.msra.mxu2 %v2118_v18 }
 0x4cf   :  { %2142 = vmatpush.msra.mxu2 %v2115_v9  ;;  %v2291_v27 = vpop.f32.mrf.mxu3 }
 0x4d0   :  { %v2292_v22 = vadd.f32 %v5116_v5, %v2291_v27 }
 0x4d1   :  { %2143 = vmatpush.msra.mxu2 %v2112_v54 }
 0x4d2   :  { %v2315_v38 = vmax.f32 %v2292_v22, 0.0 }
 0x4d3   :  { %2144 = vmatpush.msra.mxu2 %v2109_v46 }
 0x4d4   :  { %3067 = vmatmul.msk.f32.gmra.mxu1 %vm524_vm3, %v2315_v38 }
 0x4d5   :  { %2145 = vmatpush.msra.mxu2 %v2106_v43 }
 0x4d7   :  { %2146 = vmatpush.msra.mxu2 %v5123_v28  ;;  %v2294_v41 = vpop.f32.mrf.mxu3 }
 0x4d8   :  { %v2295_v48 = vadd.f32 %v5116_v5, %v2294_v41 }
 0x4d9   :  { %2147 = vmatpush.msra.mxu2 %v5119_v6 }
 0x4da   :  { %v2316_v49 = vmax.f32 %v2295_v48, 0.0 }
 0x4db   :  { %2148 = vmatpush.msra.mxu2 %v5113_v62 }
 0x4dc   :  { %3068 = vmatmul.msk.f32.gmra.mxu1 %vm524_vm3, %v2316_v49 }
 0x4dd   :  { %2149 = vmatpush.msra.mxu2 %v5109_v61 }
 0x4df   :  { %2150 = vmatpush.msra.mxu2 %v5104_v55  ;;  %v2297_v46 = vpop.f32.mrf.mxu3 }
 0x4e0   :  { %v2298_v54 = vadd.f32 %v5116_v5, %v2297_v46 }
 0x4e1   :  { %2151 = vmatpush.msra.mxu2 %v5099_v33 }
 0x4e2   :  { %v2317_v28 = vmax.f32 %v2298_v54, 0.0 }
 0x4e3   :  { %2152 = vmatpush.msra.mxu2 %v5094_v32 }
 0x4e4   :  { %3069 = vmatmul.msk.f32.gmra.mxu1 %vm524_vm3, %v2317_v28  ;;  %2153 = vmatmul.f32.vlgmr.msra.gmra.mxu2 %v4842_v11 }
 0x4e7   :  { %v2300_v6 = vpop.f32.mrf.mxu3 }
 0x4e8   :  { %v2301_v62 = vadd.f32 %v5116_v5, %v2300_v6 }
 0x4ea   :  { %v2318_v43 = vmax.f32 %v2301_v62, 0.0 }
 0x4ec   :  { %3070 = vmatmul.msk.f32.gmra.mxu1 %vm524_vm3, %v2318_v43  ;;  %2156 = vmatmul.f32.gmra.mxu2 %v4845_v13 }
 0x4f1   :  { %v2392_v55 = vpop.f32.mrf.mxu1 }
 0x4f4   :  { %2159 = vmatmul.f32.gmra.mxu2 %v4848_v40 }
 0x4f9   :  { %v2395_v61 = vpop.f32.mrf.mxu1 }
 0x4fc   :  { %2162 = vmatmul.f32.gmra.mxu2 %v4851_v30 }
 0x501   :  { %v2398_v33 = vpop.f32.mrf.mxu1 }
 0x504   :  { %2165 = vmatmul.f32.gmra.mxu2 %v4854_v42 }
 0x509   :  { %v2401_v32 = vpop.f32.mrf.mxu1 }
 0x50c   :  { %2168 = vmatmul.f32.gmra.mxu2 %v4857_v29 }
 0x511   :  { %v2404_v11 = vpop.f32.mrf.mxu1 }
 0x514   :  { %2171 = vmatmul.f32.gmra.mxu2 %v4860_v37 }
 0x519   :  { %v2407_v5 = vpop.f32.mrf.mxu1 }
 0x51c   :  { %2174 = vmatmul.f32.gmra.mxu2 %v4863_v0 }
 0x521   :  { %v2410_v9 = vpop.f32.mrf.mxu1 }
 0x524   :  { %2177 = vmatmul.f32.gmra.mxu2 %v4866_v45 }
 0x529   :  { %v2413_v13 = vpop.f32.mrf.mxu1 }
 0x52c   :  { %2180 = vmatmul.f32.gmra.mxu2 %v4869_v35 }
 0x531   :  { %v2416_v40 = vpop.f32.mrf.mxu1 }
 0x534   :  { %2183 = vmatmul.f32.gmra.mxu2 %v4876_v8 }
 0x539   :  { %v2419_v30 = vpop.f32.mrf.mxu1 }
 0x53c   :  { %2186 = vmatmul.f32.gmra.mxu2 %v4883_v52 }
 0x541   :  { %v2422_v42 = vpop.f32.mrf.mxu1 }
 0x544   :  { %2189 = vmatmul.f32.gmra.mxu2 %v4899_v2 }
 0x549   :  { %v2425_v29 = vpop.f32.mrf.mxu1 }
 0x54c   :  { %2192 = vmatmul.f32.gmra.mxu2 %v4915_v44  ;;  %v5194_v44 = vld [vmem:[%s5540_s28] ss:$0 sm:$0xff] }
 0x551   :  { %v2428_v37 = vpop.f32.mrf.mxu1 }
 0x554   :  { %2195 = vmatmul.f32.gmra.mxu2 %v4932_v63  ;;  %v5197_v63 = vld [vmem:[%s5541_s30] ss:$0 sm:$0xff] }
 0x559   :  { %v2431_v0 = vpop.f32.mrf.mxu1 }
 0x55c   :  { %2198 = vmatmul.f32.gmra.mxu2 %v4957_v34 }
 0x561   :  { %v2434_v45 = vpop.f32.mrf.mxu1 }
 0x567   :  { %v2154_v8 = vpop.f32.mrf.mxu2 }
 0x569   :  { %v2437_v35 = vpop.f32.mrf.mxu1 }
 0x56a   :  { %2444 = vmatpush.msrb.mxu0 %v2437_v35 }
 0x56c   :  { %2445 = vmatpush.msrb.mxu0 %v2434_v45 }
 0x56e   :  { %2446 = vmatpush.msrb.mxu0 %v2431_v0 }
 0x56f   :  { %v2157_v52 = vpop.f32.mrf.mxu2 }
 0x570   :  { %2447 = vmatpush.msrb.mxu0 %v2428_v37 }
 0x572   :  { %2448 = vmatpush.msrb.mxu0 %v2425_v29 }
 0x574   :  { %2449 = vmatpush.msrb.mxu0 %v2422_v42 }
 0x576   :  { %2450 = vmatpush.msrb.mxu0 %v2419_v30 }
 0x577   :  { %v2160_v2 = vpop.f32.mrf.mxu2 }
 0x578   :  { %2451 = vmatpush.msrb.mxu0 %v2416_v40 }
 0x57a   :  { %2452 = vmatpush.msrb.mxu0 %v2413_v13 }
 0x57c   :  { %2453 = vmatpush.msrb.mxu0 %v2410_v9 }
 0x57e   :  { %2454 = vmatpush.msrb.mxu0 %v2407_v5 }
 0x57f   :  { %v2163_v34 = vpop.f32.mrf.mxu2 }
 0x580   :  { %2455 = vmatpush.msrb.mxu0 %v2404_v11  ;;  %v2164_v51 = vadd.f32 %v5197_v63, %v2163_v34 }
 0x582   :  { %2456 = vmatpush.msrb.mxu0 %v2401_v32 }
 0x584   :  { %2457 = vmatpush.msrb.mxu0 %v2398_v33 }
 0x586   :  { %2458 = vmatpush.msrb.mxu0 %v2395_v61 }
 0x588   :  { %2459 = vmatpush.msrb.mxu0 %v2392_v55 }
 0x589   :  { %2460 = vmatmul.f32.vlgmr.msrb.gmra.mxu0 %v5032_v21 }
 0x591   :  { %2463 = vmatmul.f32.gmra.mxu0 %v5037_v25  ;;  %v5200_v25 = vstv %s5542_s1 }
 0x599   :  { %2466 = vmatmul.f32.gmra.mxu0 %v5042_v60 }
 0x5a1   :  { %2469 = vmatmul.f32.gmra.mxu0 %v5047_v50  ;;  %v2155_v50 = vadd.f32 %v5197_v63, %v2154_v8 }
 0x5a9   :  { %2472 = vmatmul.f32.gmra.mxu0 %v5052_v47 }
 0x5b1   :  { %2475 = vmatmul.f32.gmra.mxu0 %v5057_v17 }
 0x5b9   :  { %2478 = vmatmul.f32.gmra.mxu0 %v5062_v58 }
 0x5c1   :  { %2481 = vmatmul.f32.gmra.mxu0 %v5067_v56  ;;  %v2166_v56 = vpop.f32.mrf.mxu2 }
 0x5c2   :  { %v2167_v16 = vadd.f32 %v5197_v63, %v2166_v56 }
 0x5c9   :  { %2484 = vmatmul.f32.gmra.mxu0 %v5072_v15 }
 0x5d1   :  { %2487 = vmatmul.f32.gmra.mxu0 %v5077_v19  ;;  %v2158_v19 = vadd.f32 %v5197_v63, %v2157_v52 }
 0x5d9   :  { %2490 = vmatmul.f32.gmra.mxu0 %v5082_v36 }
 0x5e1   :  { %2493 = vmatmul.f32.gmra.mxu0 %v5087_v39 }
 0x5e9   :  { %2496 = vmatmul.f32.gmra.mxu0 %v5092_v24 }
 0x5f1   :  { %2499 = vmatmul.f32.gmra.mxu0 %v5097_v10 }
 0x5f9   :  { %2502 = vmatmul.f32.gmra.mxu0 %v5102_v20  ;;  %v2161_v20 = vadd.f32 %v5197_v63, %v2160_v2 }
 0x601   :  { %2505 = vmatmul.f32.gmra.mxu0 %v5107_v7  ;;  %v2169_v7 = vpop.f32.mrf.mxu2 }
 0x602   :  { %v2170_v41 = vadd.f32 %v5197_v63, %v2169_v7 }
 0x606   :  { %v2461_v21 = vpop.f32.mrf.mxu0 }
 0x607   :  { %v2462_v60 = vadd.f32 %v5194_v44, %v2461_v21 }
 0x609   :  { %v2511_v47 = vmul.f32 %v5200_v25, %v2462_v60  ;;  %v2172_v1 = vpop.f32.mrf.mxu2 }
 0x60a   :  { %v2173_v6 = vadd.f32 %v5197_v63, %v2172_v1 }
 0x60b   :  { %v5205_v17 = vsub.f32 %v2155_v50, %v2511_v47 }
 0x60e   :  { %v2464_v58 = vpop.f32.mrf.mxu0 }
 0x60f   :  { %v2465_v15 = vadd.f32 %v5194_v44, %v2464_v58 }
 0x611   :  { %v2512_v36 = vmul.f32 %v5200_v25, %v2465_v15  ;;  %v2175_v27 = vpop.f32.mrf.mxu2 }
 0x612   :  { %v2176_v33 = vadd.f32 %v5197_v63, %v2175_v27 }
 0x613   :  { %v5210_v39 = vsub.f32 %v2158_v19, %v2512_v36 }
 0x616   :  { %v2467_v24 = vpop.f32.mrf.mxu0 }
 0x617   :  { %v2468_v10 = vadd.f32 %v5194_v44, %v2467_v24 }
 0x619   :  { %v2513_v18 = vmul.f32 %v5200_v25, %v2468_v10  ;;  %v2178_v54 = vpop.f32.mrf.mxu2 }
 0x61a   :  { %v2179_v40 = vadd.f32 %v5197_v63, %v2178_v54 }
 0x61b   :  { %v5215_v12 = vsub.f32 %v2161_v20, %v2513_v18 }
 0x61e   :  { %v2470_v26 = vpop.f32.mrf.mxu0 }
 0x61f   :  { %v2471_v57 = vadd.f32 %v5194_v44, %v2470_v26 }
 0x621   :  { %v2514_v53 = vmul.f32 %v5200_v25, %v2471_v57  ;;  %v2181_v32 = vpop.f32.mrf.mxu2 }
 0x623   :  { %v5220_v31 = vsub.f32 %v2164_v51, %v2514_v53 }
 0x626   :  { %v2473_v3 = vpop.f32.mrf.mxu0 }
 0x627   :  { %v2474_v14 = vadd.f32 %v5194_v44, %v2473_v3 }
 0x629   :  { %v2515_v59 = vmul.f32 %v5200_v25, %v2474_v14  ;;  %v2184_v42 = vpop.f32.mrf.mxu2 }
 0x62b   :  { %v5225_v23 = vsub.f32 %v2167_v16, %v2515_v59 }
 0x62e   :  { %v2476_v22 = vpop.f32.mrf.mxu0 }
 0x62f   :  { %v2477_v38 = vadd.f32 %v5194_v44, %v2476_v22 }
 0x631   :  { %v2516_v48 = vmul.f32 %v5200_v25, %v2477_v38  ;;  %v2187_v0 = vpop.f32.mrf.mxu2  ;;  %v2185_v38 = vadd.f32 %v5197_v63, %v2184_v42 }
 0x632   :  { %v2188_v59 = vadd.f32 %v5197_v63, %v2187_v0 }
 0x633   :  { %v5230_v49 = vsub.f32 %v2170_v41, %v2516_v48 }
 0x636   :  { %v2479_v46 = vpop.f32.mrf.mxu0 }
 0x637   :  { %v2480_v28 = vadd.f32 %v5194_v44, %v2479_v46  ;;  %v2182_v46 = vadd.f32 %v5197_v63, %v2181_v32 }
 0x639   :  { %v2517_v62 = vmul.f32 %v5200_v25, %v2480_v28  ;;  %v2190_v8 = vpop.f32.mrf.mxu2 }
 0x63a   :  { %v2191_v51 = vadd.f32 %v5197_v63, %v2190_v8 }
 0x63b   :  { %v5235_v43 = vsub.f32 %v2173_v6, %v2517_v62 }
 0x63e   :  { %v2482_v55 = vpop.f32.mrf.mxu0 }
 0x63f   :  { %v2483_v61 = vadd.f32 %v5194_v44, %v2482_v55 }
 0x641   :  { %v2518_v11 = vmul.f32 %v5200_v25, %v2483_v61  ;;  %v2193_v2 = vpop.f32.mrf.mxu2 }
 0x642   :  { %v2194_v26 = vadd.f32 %v5197_v63, %v2193_v2 }
 0x643   :  { %v5240_v5 = vsub.f32 %v2176_v33, %v2518_v11 }
 0x646   :  { %v2485_v9 = vpop.f32.mrf.mxu0 }
 0x647   :  { %v2486_v13 = vadd.f32 %v5194_v44, %v2485_v9  ;;  %v5543_v9 = vld [vmem:[#allocation58_spill] sm:$0xff] }
 0x649   :  { %v2519_v30 = vmul.f32 %v5200_v25, %v2486_v13  ;;  %v2196_v21 = vpop.f32.mrf.mxu2 }
 0x64a   :  { %v2197_v10 = vadd.f32 %v5197_v63, %v2196_v21  ;;  %v2574_v21 = vstv %s3075_s2 }
 0x64b   :  { %v5245_v29 = vsub.f32 %v2179_v40, %v2519_v30  ;;  %v2550_v40 = vstv %s3071_s20  ;;  %vm2575_vm5 = vcmp.eq.s32.totalorder %v5543_v9, %v2574_v21  ;;  %v2909_v21 = vld [vmem:[#allocation31 + $0x40] sm:$0xff] }
 0x64c   :  { %vm2551_vm14 = vcmp.eq.s32.totalorder %v5543_v9, %v2550_v40 }
 0x64d   :  { %vm2552_vm7 = vmand %vm351_vm0, %vm2551_vm14 }
 0x64e   :  { %v2488_v37 = vpop.f32.mrf.mxu0 }
 0x64f   :  { %v2489_v14 = vadd.f32 %v5194_v44, %v2488_v37  ;;  %v2553_v37 = vsel %vm2552_vm7, 1.0, %v5497_v4 }
 0x651   :  { %v2199_v50 = vpop.f32.mrf.mxu2  ;;  %v2520_v48 = vmul.f32 %v5200_v25, %v2489_v14 }
 0x652   :  { %v2200_v19 = vadd.f32 %v5197_v63, %v2199_v50  ;;  %v1894_v63 = vld [vmem:[#allocation6] sm:$0x3] }
 0x653   :  { %v2536_v28 = vsub.f32 %v2182_v46, %v2520_v48  ;;  %v2819_v48 = vld [vmem:[#allocation30 + $0x78] sm:$0xff]  ;;  %v2818_v46 = vld [vmem:[#allocation30 + $0x70] sm:$0xff] }
 0x656   :  { %v2491_v45 = vpop.f32.mrf.mxu0 }
 0x657   :  { %v2492_v53 = vadd.f32 %v5194_v44, %v2491_v45  ;;  %v2562_v45 = vstv %s3073_s13 }
 0x658   :  { %vm2563_vm13 = vcmp.eq.s32.totalorder %v5543_v9, %v2562_v45  ;;  %v2916_v45 = vld [vmem:[#allocation31 + $0x78] sm:$0xff] }
 0x659   :  { %v2521_v22 = vmul.f32 %v5200_v25, %v2492_v53  ;;  %vm2564_vm15 = vmand %vm351_vm0, %vm2563_vm13  ;;  %v2610_v53 = vstv %s3081_s12 }
 0x65a   :  { %v2565_v2 = vsel %vm2564_vm15, 1.0, %v5497_v4 }
 0x65e   :  { %v2494_v35 = vpop.f32.mrf.mxu0 }
 0x65f   :  { %v2495_v7 = vadd.f32 %v5194_v44, %v2494_v35 }
 0x661   :  { %v2522_v16 = vmul.f32 %v5200_v25, %v2495_v7  ;;  %v2598_v7 = vstv %s3079_s4 }
 0x663   :  { %v2538_v54 = vsub.f32 %v2188_v59, %v2522_v16 }
 0x666   :  { %v2497_v52 = vpop.f32.mrf.mxu0 }
 0x667   :  { %v2498_v36 = vadd.f32 %v5194_v44, %v2497_v52  ;;  %v2568_v52 = vstv %s3074_s7 }
 0x668   :  { %vm2569_vm10 = vcmp.eq.s32.totalorder %v5543_v9, %v2568_v52  ;;  %v2913_v52 = vld [vmem:[#allocation31 + $0x60] sm:$0xff] }
 0x669   :  { %v2523_v1 = vmul.f32 %v5200_v25, %v2498_v36  ;;  %vm2570_vm2 = vmand %vm351_vm0, %vm2569_vm10  ;;  %vm2611_vm10 = vcmp.eq.s32.totalorder %v5543_v9, %v2610_v53 }
 0x66b   :  { %v2539_v41 = vsub.f32 %v2191_v51, %v2523_v1 }
 0x66e   :  { %v2500_v34 = vpop.f32.mrf.mxu0 }
 0x66f   :  { %v2501_v56 = vadd.f32 %v5194_v44, %v2500_v34 }
 0x671   :  { %v2524_v18 = vmul.f32 %v5200_v25, %v2501_v56 }
 0x673   :  { %v2540_v27 = vsub.f32 %v2194_v26, %v2524_v18 }
 0x676   :  { %v2503_v60 = vpop.f32.mrf.mxu0 }
 0x677   :  { %v2504_v47 = vadd.f32 %v5194_v44, %v2503_v60  ;;  %v2571_v60 = vsel %vm2570_vm2, 1.0, %v5497_v4  ;;  %vm2612_vm2 = vmand %vm382_vm8, %vm2611_vm10 }
 0x678   :  { %v2613_v16 = vsel %vm2612_vm2, 1.0, %v5497_v4 }
 0x679   :  { %v2525_v24 = vmul.f32 %v5200_v25, %v2504_v47  ;;  %v2580_v47 = vstv %s3076_s15 }
 0x67b   :  { %v2541_v3 = vsub.f32 %v2197_v10, %v2525_v24  ;;  %v2592_v24 = vstv %s3078_s21 }
 0x67c   :  { %vm2593_vm14 = vcmp.eq.s32.totalorder %v5543_v9, %v2592_v24  ;;  %v2902_v24 = vld [vmem:[#allocation31 + $0x8] sm:$0xff] }
 0x67d   :  { %vm2594_vm7 = vmand %vm382_vm8, %vm2593_vm14 }
 0x67e   :  { %v2506_v58 = vpop.f32.mrf.mxu0  ;;  %v2595_v18 = vsel %vm2594_vm7, 1.0, %v5497_v4 }
 0x67f   :  { %v2507_v15 = vadd.f32 %v5194_v44, %v2506_v58  ;;  %v2537_v44 = vsub.f32 %v2185_v38, %v2521_v22 }
 0x681   :  { %v2526_v20 = vmul.f32 %v5200_v25, %v2507_v15  ;;  %v5303_v25 = vld [vmem:[#allocation6 + $0x2] sm:$0x1]  ;;  %v2586_v15 = vstv %s3077_s16 }
 0x682   :  { %v2801_v40 = vmax.f32 %v5303_v25, 0.0 }
 0x683   :  { %v2542_v57 = vsub.f32 %v2200_v19, %v2526_v20 }
 0x685   :  { %3082 = vmatpush.xpose.msk.msrb.mxu2 %vm524_vm3, %v2542_v57  ;;  %2698 = vmatpush.msrb.mxu3 %v2542_v57 }
 0x687   :  { %2699 = vmatpush.msrb.mxu3 %v2541_v3 }
 0x689   :  { %3083 = vmatpush.xpose.msk.msrb.mxu2 %vm524_vm3, %v2541_v3  ;;  %2700 = vmatpush.msrb.mxu3 %v2540_v27 }
 0x68b   :  { %2701 = vmatpush.msrb.mxu3 %v2539_v41 }
 0x68d   :  { %3084 = vmatpush.xpose.msk.msrb.mxu2 %vm524_vm3, %v2540_v27  ;;  %2702 = vmatpush.msrb.mxu3 %v2538_v54 }
 0x68f   :  { %2703 = vmatpush.msrb.mxu3 %v2537_v44 }
 0x691   :  { %3085 = vmatpush.xpose.msk.msrb.mxu2 %vm524_vm3, %v2539_v41  ;;  %2704 = vmatpush.msrb.mxu3 %v2536_v28 }
 0x693   :  { %2705 = vmatpush.msrb.mxu3 %v5245_v29 }
 0x695   :  { %3086 = vmatpush.xpose.msk.msrb.mxu2 %vm524_vm3, %v2538_v54  ;;  %2706 = vmatpush.msrb.mxu3 %v5240_v5 }
 0x697   :  { %2707 = vmatpush.msrb.mxu3 %v5235_v43 }
 0x699   :  { %3087 = vmatpush.xpose.msk.msrb.mxu2 %vm524_vm3, %v2537_v44  ;;  %2708 = vmatpush.msrb.mxu3 %v5230_v49 }
 0x69b   :  { %2709 = vmatpush.msrb.mxu3 %v5225_v23 }
 0x69d   :  { %3088 = vmatpush.xpose.msk.msrb.mxu2 %vm524_vm3, %v2536_v28  ;;  %2710 = vmatpush.msrb.mxu3 %v5220_v31 }
 0x69f   :  { %2711 = vmatpush.msrb.mxu3 %v5215_v12 }
 0x6a1   :  { %3089 = vmatpush.xpose.msk.msrb.mxu2 %vm524_vm3, %v5245_v29  ;;  %2712 = vmatpush.msrb.mxu3 %v5210_v39 }
 0x6a3   :  { %2713 = vmatpush.msrb.mxu3 %v5205_v17 }
 0x6a5   :  { %3090 = vmatpush.xpose.msk.msrb.mxu2 %vm524_vm3, %v5240_v5 }
 0x6a9   :  { %3091 = vmatpush.xpose.msk.msrb.mxu2 %vm524_vm3, %v5235_v43 }
 0x6ad   :  { %3092 = vmatpush.xpose.msk.msrb.mxu2 %vm524_vm3, %v5230_v49 }
 0x6b1   :  { %3093 = vmatpush.xpose.msk.msrb.mxu2 %vm524_vm3, %v5225_v23 }
 0x6b5   :  { %3094 = vmatpush.xpose.msk.msrb.mxu2 %vm524_vm3, %v5220_v31 }
 0x6b9   :  { %3095 = vmatpush.xpose.msk.msrb.mxu2 %vm524_vm3, %v5215_v12 }
 0x6bd   :  { %3096 = vmatpush.xpose.msk.msrb.mxu2 %vm524_vm3, %v5210_v39 }
 0x6c1   :  { %3097 = vmatpush.xpose.msk.msrb.mxu2 %vm524_vm3, %v5205_v17 }
 0x6c4   :  { %3098 = vmatmul.msk.f32.vlgmr.msrb.gmra.mxu2 %vm524_vm3, %v5303_v25 }
 0x6c5   :  { %3099 = vmatpush.xpose.msk.msra.mxu2 %vm524_vm3, %v1894_v63  ;;  %v2815_v63 = vld [vmem:[#allocation30 + $0x58] sm:$0xff] }
 0x6c9   :  { %2781 = vmatpush.msrb.mxu2 %v2542_v57  ;;  %v2604_v57 = vstv %s3080_s18 }
 0x6ca   :  { %vm2605_vm13 = vcmp.eq.s32.totalorder %v5543_v9, %v2604_v57  ;;  %v2898_v57 = vld [vmem:[%s3792_s14] sm:$0x1]  ;;  %s3570_s14 = scalar_lea.hbm %s3807_s29, 1 }
 0x6cb   :  { %2782 = vmatpush.msrb.mxu2 %v2541_v3  ;;  %vm2606_vm15 = vmand %vm382_vm8, %vm2605_vm13  ;;  %p3572_p7 = scmp.lt.s32.totalorder %s3570_s14, %s3568_s3 }
 0x6cc   :  { %3100 = vmatmul.msk.f32.vlgmr.msra.gmra.mxu2 %vm524_vm3, %v5303_v25  ;;  %v2607_v3 = vsel %vm2606_vm15, 1.0, %v5497_v4  ;;  %v2912_v25 = vld [vmem:[#allocation31 + $0x58] sm:$0xff] }
 0x6cd   :  { %2783 = vmatpush.msrb.mxu2 %v2540_v27  ;;  %p3573_p8 = por %p3572_p7, %p3571_p6 }
 0x6cf   :  { %2784 = vmatpush.msrb.mxu2 %v2539_v41  ;;  %p3574_p9 = pnand %p3573_p8, %p3569_p5 }
 0x6d1   :  { %2785 = vmatpush.msrb.mxu2 %v2538_v54  ;;  %v2817_v54 = vld [vmem:[#allocation30 + $0x68] sm:$0xff] }
 0x6d3   :  { %2786 = vmatpush.msrb.mxu2 %v2537_v44  ;;  %v2816_v44 = vld [vmem:[#allocation30 + $0x60] sm:$0xff] }
 0x6d5   :  { %2787 = vmatpush.msrb.mxu2 %v2536_v28 }
 0x6d7   :  { %2788 = vmatpush.msrb.mxu2 %v5245_v29  ;;  %v2556_v29 = vstv %s3072_s27 }
 0x6d8   :  { %vm2557_vm11 = vcmp.eq.s32.totalorder %v5543_v9, %v2556_v29  ;;  %v2868_v29 = vld [vmem:[#allocation30 + $0x90] sm:$0xff] }
 0x6d9   :  { %2789 = vmatpush.msrb.mxu2 %v5240_v5  ;;  %v2544_v5 = vstv %s2543_s24  ;;  %vm2558_vm1 = vmand %vm351_vm0, %vm2557_vm11  ;;  %vm2599_vm11 = vcmp.eq.s32.totalorder %v5543_v9, %v2598_v7 }
 0x6da   :  { %vm2545_vm4 = vcmp.eq.s32.totalorder %v5543_v9, %v2544_v5  ;;  %v2559_v35 = vsel %vm2558_vm1, 1.0, %v5497_v4  ;;  %vm2600_vm1 = vmand %vm382_vm8, %vm2599_vm11 }
 0x6db   :  { %2790 = vmatpush.msrb.mxu2 %v5235_v43  ;;  %vm2546_vm9 = vmand %vm351_vm0, %vm2545_vm4  ;;  %v2601_v51 = vsel %vm2600_vm1, 1.0, %v5497_v4 }
 0x6dc   :  { %v2547_v30 = vsel %vm2546_vm9, 1.0, %v5497_v4  ;;  %vm2587_vm9 = vcmp.eq.s32.totalorder %v5543_v9, %v2586_v15 }
 0x6dd   :  { %2791 = vmatpush.msrb.mxu2 %v5230_v49  ;;  %v2548_v42 = vmax.f32 %v2547_v30, 0.0  ;;  %v2870_v30 = vld [vmem:[#allocation30 + $0xa0] sm:$0xff] }
 0x6df   :  { %2792 = vmatpush.msrb.mxu2 %v5225_v23  ;;  %v2554_v0 = vmax.f32 %v2548_v42, %v2553_v37  ;;  %v2869_v42 = vld [vmem:[#allocation30 + $0x98] sm:$0xff]  ;;  %v2867_v37 = vld [vmem:[#allocation30 + $0x88] sm:$0xff] }
 0x6e1   :  { %2793 = vmatpush.msrb.mxu2 %v5220_v31  ;;  %v2560_v8 = vmax.f32 %v2554_v0, %v2559_v35  ;;  %v2866_v0 = vld [vmem:[#allocation30 + $0x80] sm:$0xff]  ;;  %v2915_v35 = vld [vmem:[#allocation31 + $0x70] sm:$0xff] }
 0x6e3   :  { %2794 = vmatpush.msrb.mxu2 %v5215_v12  ;;  %v2566_v34 = vmax.f32 %v2560_v8, %v2565_v2  ;;  %v2914_v8 = vld [vmem:[#allocation31 + $0x68] sm:$0xff]  ;;  %v2911_v2 = vld [vmem:[#allocation31 + $0x50] sm:$0xff] }
 0x6e5   :  { %2795 = vmatpush.msrb.mxu2 %v5210_v39  ;;  %v2572_v50 = vmax.f32 %v2566_v34, %v2571_v60  ;;  %v2910_v34 = vld [vmem:[#allocation31 + $0x48] sm:$0xff]  ;;  %v2908_v60 = vld [vmem:[#allocation31 + $0x38] sm:$0xff] }
 0x6e7   :  { %2796 = vmatpush.msrb.mxu2 %v5205_v17 }
 0x747   :  { %v2683_v6 = vpop.f32.mrf.mxu2 }
 0x748   :  { %v2687_v62 = vsel %vm2686_vm12, %v2683_v6, -inf }
 0x749   :  { %2688 = vmax.xlane.f32.xlu0 %v2687_v62  ;;  %v2813_v62 = vld [vmem:[#allocation30 + $0x48] sm:$0xff] }
 0x74f   :  { %v2738_v55 = vpop.f32.mrf.mxu2 }
 0x750   :  { %v2742_v43 = vsel %vm2741_vm6, %v2738_v55, -inf }
 0x751   :  { %2743 = vmax.xlane.f32.xlu0 %v2742_v43  ;;  %v2811_v43 = vld [vmem:[#allocation30 + $0x38] sm:$0xff] }
 0x7bc   :  { %v2689_v49 = vpop.xlane.xlu0 %2688 }
 0x7bd   :  { %v2690_v23 = vsub.f32 %v2683_v6, %v2689_v49  ;;  %v2814_v6 = vld [vmem:[#allocation30 + $0x50] sm:$0xff] }
 0x7be   :  { %v2810_v49 = vld [vmem:[#allocation30 + $0x30] sm:$0xff] }
 0x7bf   :  { %v2691_v61 = vmul.f32 1.442695, %v2690_v23  ;;  %v2809_v23 = vld [vmem:[#allocation30 + $0x28] sm:$0xff] }
 0x7c1   :  { %3222 = vpow2.f32 %v2691_v61  ;;  %v2808_v61 = vld [vmem:[#allocation30 + $0x20] sm:$0xff] }
 0x7c4   :  { %v2744_v31 = vpop.xlane.xlu0 %2743 }
 0x7c5   :  { %v2745_v12 = vsub.f32 %v2738_v55, %v2744_v31  ;;  %v2812_v55 = vld [vmem:[#allocation30 + $0x40] sm:$0xff]  ;;  %v2807_v31 = vld [vmem:[#allocation30 + $0x18] sm:$0xff] }
 0x7c7   :  { %v5320_v33 = vpop.eup %3222  ;;  %v2746_v39 = vmul.f32 1.442695, %v2745_v12  ;;  %v2806_v12 = vld [vmem:[#allocation30 + $0x10] sm:$0xff] }
 0x7c8   :  { %v2693_v17 = vsel %vm2686_vm12, %v5320_v33, 0.0  ;;  %vm2576_vm12 = vmand %vm351_vm0, %vm2575_vm5  ;;  %vm2757_vm5 = vcmask 1041408  }
 0x7c9   :  { %3224 = vpow2.f32 %v2746_v39  ;;  %2694 = vadd.xlane.f32.xlu1 %v2693_v17  ;;  %v2577_v58 = vsel %vm2576_vm12, 1.0, %v5497_v4  ;;  %vm2588_vm0 = vmand %vm382_vm8, %vm2587_vm9  ;;  %v2804_v39 = vld [vmem:[#allocation30] sm:$0xff]  ;;  %v2873_v17 = vld [vmem:[#allocation30 + $0xb8] sm:$0xff] }
 0x7ca   :  { %v2578_v56 = vmax.f32 %v2572_v50, %v2577_v58  ;;  %v2589_v10 = vsel %vm2588_vm0, 1.0, %v5497_v4  ;;  %2885 = vmatpush.msra.mxu2 %v2873_v17  ;;  %v2907_v50 = vld [vmem:[#allocation31 + $0x30] sm:$0xff]  ;;  %v2905_v58 = vld [vmem:[#allocation31 + $0x20] sm:$0xff] }
 0x7cf   :  { %v5324_v32 = vpop.eup %3224 }
 0x7d0   :  { %v2748_v11 = vsel %vm2741_vm6, %v5324_v32, 0.0  ;;  %vm2581_vm6 = vcmp.eq.s32.totalorder %v5543_v9, %v2580_v47  ;;  %v2906_v47 = vld [vmem:[#allocation31 + $0x28] sm:$0xff] }
 0x7d1   :  { %2749 = vadd.xlane.f32.xlu1 %v2748_v11  ;;  %vm2582_vm4 = vmand %vm382_vm8, %vm2581_vm6  ;;  %vm2753_vm8 = vcmask 15360   ;;  %v2871_v11 = vld [vmem:[#allocation30 + $0xa8] sm:$0xff] }
 0x7d2   :  { %v2583_v19 = vsel %vm2582_vm4, 1.0, %v5497_v4 }
 0x7d3   :  { %v2584_v36 = vmax.f32 %v2578_v56, %v2583_v19  ;;  %v2904_v19 = vld [vmem:[#allocation31 + $0x18] sm:$0xff] }
 0x7d5   :  { %v2590_v20 = vmax.f32 %v2584_v36, %v2589_v10  ;;  %v2903_v36 = vld [vmem:[#allocation31 + $0x10] sm:$0xff]  ;;  %v2901_v10 = vld [vmem:[#allocation31] sm:$0xff] }
 0x7d7   :  { %v2596_v26 = vmax.f32 %v2590_v20, %v2595_v18 }
 0x7d9   :  { %v2602_v1 = vmax.f32 %v2596_v26, %v2601_v51 }
 0x7db   :  { %v2608_v14 = vmax.f32 %v2602_v1, %v2607_v3  ;;  %v2917_v3 = vld [vmem:[%s3802_s8] sm:$0x1] }
 0x7dd   :  { %v2614_v59 = vmax.f32 %v2608_v14, %v2613_v16 }
 0x7df   :  { %3101 = vmatpush.msk.msra.mxu3 %vm2757_vm5, %v2614_v59 }
 0x83c   :  { %v2695_v27 = vpop.xlane.xlu1 %2694 }
 0x83d   :  { %3226 = vrcp.f32 %v2695_v27 }
 0x843   :  { %v3227_v22 = vpop.eup %3226 }
 0x844   :  { %v2697_v38 = vmul.f32 %v3227_v22, %v5320_v33  ;;  %v2750_v41 = vpop.xlane.xlu1 %2749  ;;  %v2805_v33 = vld [vmem:[#allocation30 + $0x8] sm:$0xff] }
 0x845   :  { %3228 = vrcp.f32 %v2750_v41 }
 0x846   :  { %2714 = vmatmul.f32.vlgmr.msrb.gmra.mxu3 %v2697_v38 }
 0x847   :  { %2831 = vmatpush.msrb.mxu3 %v2819_v48 }
 0x849   :  { %2832 = vmatpush.msrb.mxu3 %v2818_v46 }
 0x84b   :  { %v3229_v28 = vpop.eup %3228  ;;  %2833 = vmatpush.msrb.mxu3 %v2817_v54 }
 0x84c   :  { %v2752_v4 = vmul.f32 %v3229_v28, %v5324_v32  ;;  %v2872_v32 = vld [vmem:[#allocation30 + $0xb0] sm:$0xff] }
 0x84d   :  { %2834 = vmatpush.msrb.mxu3 %v2816_v44  ;;  %2886 = vmatpush.msra.mxu2 %v2872_v32 }
 0x84e   :  { %3102 = vmatmul.msk.f32.vlgmr.msra.gmra.mxu3 %vm2753_vm8, %v2752_v4 }
 0x84f   :  { %2835 = vmatpush.msrb.mxu3 %v2815_v63  ;;  %2887 = vmatpush.msra.mxu2 %v2871_v11 }
 0x851   :  { %2836 = vmatpush.msrb.mxu3 %v2814_v6  ;;  %2888 = vmatpush.msra.mxu2 %v2870_v30 }
 0x853   :  { %2837 = vmatpush.msrb.mxu3 %v2813_v62  ;;  %2889 = vmatpush.msra.mxu2 %v2869_v42 }
 0x855   :  { %2838 = vmatpush.msrb.mxu3 %v2812_v55  ;;  %2890 = vmatpush.msra.mxu2 %v2868_v29 }
 0x857   :  { %2854 = vmatpush.msra.mxu3 %v2811_v43  ;;  %2891 = vmatpush.msra.mxu2 %v2867_v37 }
 0x859   :  { %2855 = vmatpush.msra.mxu3 %v2810_v49  ;;  %2892 = vmatpush.msra.mxu2 %v2866_v0 }
 0x85b   :  { %2856 = vmatpush.msra.mxu3 %v2809_v23 }
 0x85d   :  { %2857 = vmatpush.msra.mxu3 %v2808_v61 }
 0x85f   :  { %2858 = vmatpush.msra.mxu3 %v2807_v31 }
 0x861   :  { %2859 = vmatpush.msra.mxu3 %v2806_v12 }
 0x863   :  { %2860 = vmatpush.msra.mxu3 %v2805_v33 }
 0x865   :  { %2861 = vmatpush.msra.mxu3 %v2804_v39 }
 0x8c9   :  { %v2715_v5 = vpop.f32.mrf.mxu3 }
 0x8ca   :  { %v2802_v9 = vmax.f32 %v2715_v5, 0.0 }
 0x8cc   :  { %3103 = vmatmul.msk.f32.vlgmr.msrb.gmra.mxu3 %vm524_vm3, %v2802_v9 }
 0x8cd   :  { %2918 = vmatpush.msrb.mxu3 %v2916_v45 }
 0x8cf   :  { %2919 = vmatpush.msrb.mxu3 %v2915_v35 }
 0x8d1   :  { %v2778_v13 = vpop.f32.mrf.mxu3  ;;  %2920 = vmatpush.msrb.mxu3 %v2914_v8 }
 0x8d2   :  { %2797 = vmatmul.f32.vlgmr.msrb.gmra.mxu2 %v2778_v13 }
 0x8d3   :  { %2921 = vmatpush.msrb.mxu3 %v2913_v52 }
 0x8d4   :  { %3104 = vmatmul.msk.f32.vlgmr.msra.gmra.mxu3 %vm524_vm3, %v2801_v40 }
 0x8d5   :  { %2922 = vmatpush.msrb.mxu3 %v2912_v25 }
 0x8d7   :  { %2923 = vmatpush.msrb.mxu3 %v2911_v2 }
 0x8d9   :  { %2924 = vmatpush.msrb.mxu3 %v2910_v34 }
 0x8db   :  { %2925 = vmatpush.msrb.mxu3 %v2909_v21 }
 0x8dd   :  { %2926 = vmatpush.msrb.mxu3 %v2908_v60 }
 0x8df   :  { %2927 = vmatpush.msrb.mxu3 %v2907_v50 }
 0x8e1   :  { %2928 = vmatpush.msrb.mxu3 %v2906_v47 }
 0x8e3   :  { %2929 = vmatpush.msrb.mxu3 %v2905_v58 }
 0x8e5   :  { %2930 = vmatpush.msrb.mxu3 %v2904_v19 }
 0x8e7   :  { %2931 = vmatpush.msrb.mxu3 %v2903_v36 }
 0x8e9   :  { %2932 = vmatpush.msrb.mxu3 %v2902_v24 }
 0x8eb   :  { %2933 = vmatpush.msrb.mxu3 %v2901_v10 }
 0x94f   :  { %v2840_v20 = vpop.f32.mrf.mxu3 }
 0x955   :  { %v2798_v56 = vpop.f32.mrf.mxu2 }
 0x956   :  { %v2803_v15 = vmax.f32 %v2798_v56, 0.0 }
 0x957   :  { %v2863_v7 = vpop.f32.mrf.mxu3 }
 0x958   :  { %3105 = vmatmul.msk.f32.vlgmr.msra.gmra.mxu2 %vm524_vm3, %v2803_v15  ;;  %v2864_v18 = vadd.f32 %v2863_v7, %v2840_v20 }
 0x9db   :  { %v2894_v26 = vpop.f32.mrf.mxu2 }
 0x9dc   :  { %v2897_v51 = vadd.f32 %v2894_v26, %v2864_v18 }
 0x9de   :  { %v2899_v53 = vadd.f32 %v2898_v57, %v2897_v51 }
 0x9e0   :  { %v2900_v1 = vmax.f32 %v2899_v53, 0.0 }
 0x9e2   :  { %2934 = vmatmul.f32.vlgmr.msrb.gmra.mxu3 %v2900_v1 }
 0xa65   :  { %v2935_v14 = vpop.f32.mrf.mxu3 }
 0xa66   :  { %v2936_v16 = vadd.f32 %v2935_v14, %v2917_v3 }
 0xa68   :  { %2938 = vst [vmem:[#allocation33] sm:$0x1] %v2936_v16 }
 0xa69   :  { %3577 = shalt.err (!%p3574_p9)
}
 0xa6a   :  { %2949 = dma.vmem_to_hbm [thread:$0]  %s2945_s22, 16, %s2947_s11, [#allocation10]  }
 0xa6b   :  { %3596 = dma.done.wait [#allocation10], 16  }
 0xa6c   :  { %3597 = vsyncadd [#allocation10], 4294967280 }
 0xa6d   :  { %2954 = vsyncpa [#allocation9], 1 }
 0xa6e   :  { %2955 = vsyncpa [#allocation17], 1 }
 0xa6f   :  { %2956 = vsyncpa [#allocation20], 1 }
 0xa70   :  { %2957 = vsyncpa [#allocation23], 1 }
 0xa71   :  { %2958 = vsyncpa [#allocation26], 1 }
 0xa72   :  { %2959 = vsyncpa [#allocation29], 1 }
 0xa73   :  { %2960 = vsyncpa [#allocation32], 1 }
 0xa74   :  { %2961 = vsyncpa [#allocation10], 1 }
 0xa75   :  { %2962 = vsyncpa [#allocation11], 1 }
 0xa76   :  { %2963 = vsyncpa [#allocation13], 1 }

</bundles_post_ra>
